<compile_context>
chip_gen: v7x
topology: tpu7x:2x2x1
jax: 0.10.0
libtpu: 0.0.40
codegen_flags: <defaults>
</compile_context>

<pallas_src>
import jax
import jax.numpy as jnp
from jax.experimental import pallas as pl
from jax.experimental.pallas import tpu as pltpu

EPS = 1e-5
KERNEL_SIZES = (3, 5, 9, 11)          # square kernels, per the module
KH_MAX = max(KERNEL_SIZES)            # 11
PH_MAX = KH_MAX // 2                  # 5


# ----------------------------------------------------------------------------
# Host-side parameter packing
# ----------------------------------------------------------------------------
def _band_weight(w, width):
    """Conv weight (kh, kw, Cin, Cout) -> row-band matrices (kh, W*Cin, W*Cout).

    Wband[dy][(x_src, ci), (x_dst, co)] = w[dy, x_src - x_dst + kw//2, ci, co]
    (0 when the tap is outside the kernel window), so one matmul per kernel-row dy
    realizes all kw width taps including 'same' zero padding along width.
    """
    kh, kw, cin, cout = w.shape
    pw = kw // 2
    xs = jnp.arange(width)
    dx = xs[:, None] - xs[None, :] + pw                 # (W_src, W_dst)
    valid = (dx >= 0) & (dx < kw)
    dxc = jnp.clip(dx, 0, kw - 1)
    b = w[:, dxc, :, :]                                 # (kh, Wsrc, Wdst, cin, cout)
    b = jnp.where(valid[None, :, :, None, None], b, 0.0)
    b = jnp.transpose(b, (0, 1, 3, 2, 4))               # (kh, Wsrc, cin, Wdst, cout)
    return b.reshape(kh, width * cin, width * cout)


def _affine_rows(p, width):
    """Fold conv bias + BatchNorm2d(eval) into (3, W*Cout): bias / scale / shift rows."""
    bias = p['b'][0]
    scale = p['gamma'][0] * jax.lax.rsqrt(p['var'][0] + EPS)
    shift = p['beta'][0] - p['mean'][0] * scale
    return jnp.stack([jnp.tile(bias, width),
                      jnp.tile(scale, width),
                      jnp.tile(shift, width)])          # (3, W*Cout)


def pack_params(params, tcr_len, pep_len):
    """Pack all per-block params into a handful of large, lane-dense operands."""
    H, W = tcr_len, pep_len
    C0 = params['encoder'][0][0]['w'].shape[2]
    C1 = params['encoder'][0][0]['w'].shape[3]
    C2 = params['encoder'][0][1]['w'].shape[3]
    WC0, WC1, WC2 = W * C0, W * C1, W * C2
    n_br = len(KERNEL_SIZES)

    def pack_encoder(enc):
        # stage 0: taps unified to KH_MAX (zero taps for smaller kernels), branches
        # concatenated along N -> one (KH_MAX*W*C0, 4*W*C1) matrix.
        w0 = jnp.zeros((KH_MAX, WC0, n_br * WC1), jnp.float32)
        aff0, w1_parts, w2_parts, aff12 = [], [], [], []
        for r, kh in enumerate(KERNEL_SIZES):
            blk0, blk1, blk2 = enc[r]
            t0 = PH_MAX - kh // 2
            w0 = w0.at[t0:t0 + kh, :, r * WC1:(r + 1) * WC1].set(
                _band_weight(blk0['w'], W))
            aff0.append(_affine_rows(blk0, W))                         # (3, WC1)
            w1_parts.append(_band_weight(blk1['w'], W).reshape(kh * WC1, WC2))
            w2_parts.append(_band_weight(blk2['w'], W).reshape(kh * WC2, W))
            a1 = _affine_rows(blk1, W)                                 # (3, WC2)
            a2 = _affine_rows(blk2, W)                                 # (3, W)
            a1 = jnp.pad(a1, ((0, 0), (0, WC1 - a1.shape[1])))
            a2 = jnp.pad(a2, ((0, 0), (0, WC1 - a2.shape[1])))
            aff12.append(jnp.stack([a1, a2]))                          # (2, 3, WC1)
        return (w0.reshape(KH_MAX * WC0, n_br * WC1),
                jnp.concatenate(w1_parts, axis=0),                     # (sum kh*WC1, WC2)
                jnp.concatenate(w2_parts, axis=0),                     # (sum kh*WC2, W)
                jnp.concatenate(aff0, axis=1),                         # (3, 4*WC1)
                jnp.stack(aff12))                                      # (4, 2, 3, WC1)

    eb = pack_encoder(params['encoder'])
    ea = pack_encoder(params['aencoder'])
    stack2 = lambda i, dt=jnp.float32: jnp.stack([eb[i], ea[i]]).astype(dt)

    # Fold BatchNorm1d(eval) into the FC layer (per-encoder row weights + scalar bias).
    F = H * W

    def bn_fold(bn):
        s = bn['gamma'][0] * jax.lax.rsqrt(bn['var'][0] + EPS)
        return s, bn['beta'][0] - bn['mean'][0] * s

    sb, tb = bn_fold(params['b_bn'])
    sa, ta = bn_fold(params['a_bn'])
    wcol = params['fc_w'][:, 0]                                        # (2F,)
    hw = jnp.stack([(wcol[:F] * sb).reshape(H, W),
                    (wcol[F:] * sa).reshape(H, W)])                    # (2, H, W)
    hb = params['fc_b'] + jnp.sum(tb * wcol[:F]) + jnp.sum(ta * wcol[F:])

    off1, off2 = [0], [0]
    for kh in KERNEL_SIZES:
        off1.append(off1[-1] + kh * WC1)
        off2.append(off2[-1] + kh * WC2)

    return dict(w0=stack2(0, jnp.bfloat16), w1=stack2(1, jnp.bfloat16),
                w2=stack2(2, jnp.bfloat16), aff0=stack2(3), aff12=stack2(4),
                hw=hw, hb=hb, off1=tuple(off1), off2=tuple(off2),
                dims=(H, W, C0, C1, C2))


# ----------------------------------------------------------------------------
# Fused Pallas kernel: one grid step = one encoder x one batch tile
# ----------------------------------------------------------------------------
def _build_kernel(dims, bt, off1, off2):
    H, W, C0, C1, C2 = dims
    WC0, WC1, WC2 = W * C0, W * C1, W * C2

    def kernel(x_ref, w0_ref, w1_ref, w2_ref, aff0_ref, aff12_ref, hw_ref,
               out_ref, pad_ref):
        # Persistent pad scratch: border rows stay zero and realize 'same' padding
        # along H for every block; only the interior is rewritten per block.
        pad_ref[...] = jnp.zeros_like(pad_ref)

        def lhs_taps(kh, cols):
            # Deep-K LHS: lane-axis concat of the kh shifted H-slices -> (bt*H, kh*cols)
            base = PH_MAX - kh // 2
            parts = [pad_ref[:, base + dy: base + dy + H, :cols] for dy in range(kh)]
            return jnp.concatenate(parts, axis=2).reshape(bt * H, kh * cols)

        def affine(z, rows):
            z = jnp.maximum(z + rows[0:1, :], 0.0)         # conv bias + ReLU
            return z * rows[1:2, :] + rows[2:3, :]          # BN2d (eval), folded
            # Dropout2d is identity in eval mode.

        # ---- stage 0: all 4 branches in ONE matmul (K = 11*W*C0, N = 4*W*C1) ----
        pad_ref[:, PH_MAX:PH_MAX + H, :WC0] = x_ref[...]
        y0 = jnp.dot(lhs_taps(KH_MAX, WC0),
                     w0_ref[...].astype(jnp.float32),
                     preferred_element_type=jnp.float32)    # (bt*H, 4*WC1)
        y0 = affine(y0, aff0_ref[...])

        acc = None
        for r, kh in enumerate(KERNEL_SIZES):
            # ---- stage 1: single deep-K matmul (K = kh*W*C1) ----
            pad_ref[:, PH_MAX:PH_MAX + H, :WC1] = (
                y0[:, r * WC1:(r + 1) * WC1].reshape(bt, H, WC1))
            z = jnp.dot(lhs_taps(kh, WC1),
                        w1_ref[off1[r]:off1[r] + kh * WC1, :].astype(jnp.float32),
                        preferred_element_type=jnp.float32)          # (bt*H, WC2)
            z = affine(z, aff12_ref[r, 0][:, :WC2])
            # ---- stage 2: single deep-K matmul (K = kh*W*C2, Cout = 1) ----
            pad_ref[:, PH_MAX:PH_MAX + H, :WC2] = z.reshape(bt, H, WC2)
            z = jnp.dot(lhs_taps(kh, WC2),
                        w2_ref[off2[r]:off2[r] + kh * WC2, :].astype(jnp.float32),
                        preferred_element_type=jnp.float32)          # (bt*H, W)
            z = affine(z, aff12_ref[r, 1][:, :W]).reshape(bt, H, W)
            acc = z if acc is None else acc + z             # branch sum

        # Head (BN1d + FC folded into hw): per-encoder partial logit; bias + sigmoid
        # are applied outside the kernel so the encoder grid axis stays independent.
        prod = acc * hw_ref[...][None, :, :]                # (bt, H, W)
        rows = jnp.sum(prod, axis=2)
        out_ref[...] = jnp.sum(rows, axis=1, keepdims=True)  # (bt, 1)

    return kernel


def sgtpmi_forward(packed, b3p, a3p):
    assert b3p.shape == a3p.shape
    B, H, W, C0 = b3p.shape
    _, _, _, C1, C2 = packed['dims']
    xin = jnp.stack([b3p.reshape(B, H, W * C0), a3p.reshape(B, H, W * C0)])

    bt = B if B <= 8 else 8          # batch tile; weights stay resident across tiles
    assert B % bt == 0
    n_bt = B // bt

    def wspec(arr):
        shp = arr.shape[1:]
        zeros = (0,) * len(shp)
        return pl.BlockSpec((None,) + shp, lambda e, t: (e,) + zeros)

    kernel = _build_kernel(packed['dims'], bt, packed['off1'], packed['off2'])
    partial = pl.pallas_call(
        kernel,
        out_shape=jax.ShapeDtypeStruct((2, B, 1), jnp.float32),
        grid_spec=pltpu.PrefetchScalarGridSpec(
            num_scalar_prefetch=0,
            grid=(2, n_bt),                                 # (encoder, batch tile)
            in_specs=[
                pl.BlockSpec((None, bt, H, W * C0), lambda e, t: (e, t, 0, 0)),
                wspec(packed['w0']), wspec(packed['w1']), wspec(packed['w2']),
                wspec(packed['aff0']), wspec(packed['aff12']), wspec(packed['hw']),
            ],
            out_specs=pl.BlockSpec((None, bt, 1), lambda e, t: (e, t, 0)),
            scratch_shapes=[pltpu.VMEM(
                (bt, H + 2 * PH_MAX, W * max(C0, C1, C2)), jnp.float32)],
        ),
        compiler_params=pltpu.CompilerParams(
            dimension_semantics=("parallel", "parallel"),
            vmem_limit_bytes=32 * 1024 * 1024),
    )(xin, packed['w0'], packed['w1'], packed['w2'],
      packed['aff0'], packed['aff12'], packed['hw'])

    logits = partial[0] + partial[1] + packed['hb']         # (B,1) + (1,1)
    return jax.nn.sigmoid(logits)


# ----------------------------------------------------------------------------
# Deterministic parameter init (shapes per SGTPMI.__init__)
# ----------------------------------------------------------------------------
def init_cnn2d(key, cin, cout, ks):
    kh, kw = ks
    k = jax.random.split(key, 6)
    return dict(
        w=jax.random.normal(k[0], (kh, kw, cin, cout), jnp.float32)
          * (1.0 / (kh * kw * cin) ** 0.5),
        b=0.1 * jax.random.normal(k[1], (1, cout), jnp.float32),
        gamma=1.0 + 0.1 * jax.random.normal(k[2], (1, cout), jnp.float32),
        beta=0.1 * jax.random.normal(k[3], (1, cout), jnp.float32),
        mean=0.1 * jax.random.normal(k[4], (1, cout), jnp.float32),
        var=jnp.abs(1.0 + 0.1 * jax.random.normal(k[5], (1, cout), jnp.float32)),
    )


def init_bn1d(key, feat):
    k = jax.random.split(key, 4)
    return dict(
        gamma=1.0 + 0.1 * jax.random.normal(k[0], (1, feat), jnp.float32),
        beta=0.1 * jax.random.normal(k[1], (1, feat), jnp.float32),
        mean=0.1 * jax.random.normal(k[2], (1, feat), jnp.float32),
        var=jnp.abs(1.0 + 0.1 * jax.random.normal(k[3], (1, feat), jnp.float32)),
    )


def init_params(key, tcr_len, pep_len, map_num, hidden):
    feat = tcr_len * pep_len
    keys = jax.random.split(key, 4)

    def make_branches(bkey):
        bkeys = jax.random.split(bkey, len(KERNEL_SIZES))
        branches = []
        for kh, kk in zip(KERNEL_SIZES, bkeys):
            ck = jax.random.split(kk, 3)
            branches.append([
                init_cnn2d(ck[0], map_num, hidden, (kh, kh)),
                init_cnn2d(ck[1], hidden, hidden // 2, (kh, kh)),
                init_cnn2d(ck[2], hidden // 2, 1, (kh, kh)),
            ])
        return branches

    fck = jax.random.split(keys[3], 2)
    bnk = jax.random.split(keys[2], 2)
    return dict(
        encoder=make_branches(keys[0]),
        aencoder=make_branches(keys[1]),
        b_bn=init_bn1d(bnk[0], feat),
        a_bn=init_bn1d(bnk[1], feat),
        fc_w=0.05 * jax.random.normal(fck[0], (2 * feat, 1), jnp.float32),
        fc_b=0.05 * jax.random.normal(fck[1], (1, 1), jnp.float32),
    )


def round_conv_weights_bf16(params):
    """Deploy-time decision: conv weights are stored in bf16 (used by BOTH the kernel
    and the reference so the comparison stays tight)."""
    def rnd(blk):
        blk = dict(blk)
        blk['w'] = blk['w'].astype(jnp.bfloat16).astype(jnp.float32)
        return blk
    out = dict(params)
    out['encoder'] = [[rnd(b) for b in br] for br in params['encoder']]
    out['aencoder'] = [[rnd(b) for b in br] for br in params['aencoder']]
    return out


# ----------------------------------------------------------------------------
# Pure-JAX reference (independent of the Pallas path) for a sanity check
# ----------------------------------------------------------------------------
def _ref_block(x, p):
    kh, kw = p['w'].shape[0], p['w'].shape[1]
    y = jax.lax.conv_general_dilated(
        x, p['w'], window_strides=(1, 1),
        padding=((kh // 2, kh // 2), (kw // 2, kw // 2)),
        dimension_numbers=('NHWC', 'HWIO', 'NHWC'))
    y = jnp.maximum(y + p['b'].reshape(1, 1, 1, -1), 0.0)
    inv = jax.lax.rsqrt(p['var'].reshape(1, 1, 1, -1) + EPS)
    return (y - p['mean'].reshape(1, 1, 1, -1)) * inv * p['gamma'].reshape(1, 1, 1, -1) \
        + p['beta'].reshape(1, 1, 1, -1)


def _ref_encoder(x, branches):
    B, H, W, _ = x.shape
    acc = None
    for branch in branches:
        y = x
        for blk in branch:
            y = _ref_block(y, blk)
        acc = y if acc is None else acc + y
    return acc.reshape(B, H * W)


def _ref_bn1d(x, p):
    return (x - p['mean']) * jax.lax.rsqrt(p['var'] + EPS) * p['gamma'] + p['beta']


def sgtpmi_reference(params, b3p, a3p):
    bp = _ref_bn1d(_ref_encoder(b3p, params['encoder']), params['b_bn'])
    ap = _ref_bn1d(_ref_encoder(a3p, params['aencoder']), params['a_bn'])
    cdr3 = jnp.concatenate([bp, ap], axis=1)
    return jax.nn.sigmoid(cdr3 @ params['fc_w'] + params['fc_b'])


# ----------------------------------------------------------------------------
if __name__ == "__main__":
    B = 2
    TCR_LEN, PEP_LEN = 16, 16          # tcr_padding_len, peptide_padding_len
    MAP_NUM = 4                        # input channels of the interaction maps
    HIDDEN = 8                         # hidden_channel (hidden//2 = 4)

    key = jax.random.PRNGKey(0)
    kp, kb, ka = jax.random.split(key, 3)
    params = round_conv_weights_bf16(
        init_params(kp, TCR_LEN, PEP_LEN, MAP_NUM, HIDDEN))
    packed = pack_params(params, TCR_LEN, PEP_LEN)

    # data['b3p_map'] / data['a3p_map'] : (B, tcr_len, pep_len, map_num), NHWC.
    b3p_map = jax.random.normal(kb, (B, TCR_LEN, PEP_LEN, MAP_NUM), jnp.float32)
    a3p_map = jax.random.normal(ka, (B, TCR_LEN, PEP_LEN, MAP_NUM), jnp.float32)

    out = jax.block_until_ready(sgtpmi_forward(packed, b3p_map, a3p_map))
    assert out.shape == (B, 1), out.shape

    ref = jax.block_until_ready(sgtpmi_reference(params, b3p_map, a3p_map))
    assert jnp.allclose(out, ref, rtol=1e-3, atol=2e-4), (out, ref)

    print("KERNEL_OK")
</pallas_src>

<mosaic_0001>
module attributes {stable_mosaic.version = 11 : i64} {
  func.func @kernel(%arg0: i32, %arg1: i32, %arg2: memref<1x2x16x64xf32, #tpu.memory_space<vmem>>, %arg3: memref<1x704x512xbf16, #tpu.memory_space<vmem>>, %arg4: memref<1x3584x64xbf16, #tpu.memory_space<vmem>>, %arg5: memref<1x1792x16xbf16, #tpu.memory_space<vmem>>, %arg6: memref<1x3x512xf32, #tpu.memory_space<vmem>>, %arg7: memref<1x4x2x3x128xf32, #tpu.memory_space<vmem>>, %arg8: memref<1x16x16xf32, #tpu.memory_space<vmem>>, %arg9: memref<1x2x1xf32, #tpu.memory_space<vmem>>, %arg10: memref<2x26x128xf32, #tpu.memory_space<vmem>>) attributes {dimension_semantics = [#tpu.dimension_semantics<parallel>, #tpu.dimension_semantics<parallel>], iteration_bounds = array<i64: 2, 1>, scalar_prefetch = 0 : i64, scratch_operands = 1 : i64, tpu.core_type = #tpu.core_type<tc>, window_params = [{transform_indices = @transform_0, window_bounds = array<i64: 1, 2, 16, 64>}, {transform_indices = @transform_1, window_bounds = array<i64: 1, 704, 512>}, {transform_indices = @transform_2, window_bounds = array<i64: 1, 3584, 64>}, {transform_indices = @transform_3, window_bounds = array<i64: 1, 1792, 16>}, {transform_indices = @transform_4, window_bounds = array<i64: 1, 3, 512>}, {transform_indices = @transform_5, window_bounds = array<i64: 1, 4, 2, 3, 128>}, {transform_indices = @transform_6, window_bounds = array<i64: 1, 16, 16>}, {transform_indices = @transform_7, window_bounds = array<i64: 1, 2, 1>}]} {
    %cst = arith.constant 0.000000e+00 : f32
    %0 = vector.broadcast %cst : f32 to vector<2x26x128xf32>
    %c0 = arith.constant 0 : index
    %c0_0 = arith.constant 0 : index
    %c0_1 = arith.constant 0 : index
    %1 = vector.load %arg10[%c0, %c0_0, %c0_1] : memref<2x26x128xf32, #tpu.memory_space<vmem>>, vector<2x26x128xf32>
    tpu.vector_store %arg10[%c0, %c0_0, %c0_1], %0 {strides = array<i32>} : memref<2x26x128xf32, #tpu.memory_space<vmem>>, vector<2x26x128xf32>,
    %c0_2 = arith.constant 0 : index
    %c0_3 = arith.constant 0 : index
    %c0_4 = arith.constant 0 : index
    %c0_5 = arith.constant 0 : index
    %2 = vector.load %arg2[%c0_2, %c0_3, %c0_4, %c0_5] : memref<1x2x16x64xf32, #tpu.memory_space<vmem>>, vector<1x2x16x64xf32>
    %3 = vector.shape_cast %2 : vector<1x2x16x64xf32> to vector<2x16x64xf32>
    %c0_6 = arith.constant 0 : index
    %c5 = arith.constant 5 : index
    %c0_7 = arith.constant 0 : index
    %4 = vector.load %arg10[%c0_6, %c5, %c0_7] : memref<2x26x128xf32, #tpu.memory_space<vmem>>, vector<2x16x64xf32>
    tpu.vector_store %arg10[%c0_6, %c5, %c0_7], %3 {strides = array<i32>} : memref<2x26x128xf32, #tpu.memory_space<vmem>>, vector<2x16x64xf32>,
    %c0_8 = arith.constant 0 : index
    %c0_9 = arith.constant 0 : index
    %c0_10 = arith.constant 0 : index
    %5 = vector.load %arg10[%c0_8, %c0_9, %c0_10] : memref<2x26x128xf32, #tpu.memory_space<vmem>>, vector<2x16x64xf32>
    %c0_11 = arith.constant 0 : index
    %c1 = arith.constant 1 : index
    %c0_12 = arith.constant 0 : index
    %6 = vector.load %arg10[%c0_11, %c1, %c0_12] : memref<2x26x128xf32, #tpu.memory_space<vmem>>, vector<2x16x64xf32>
    %c0_13 = arith.constant 0 : index
    %c2 = arith.constant 2 : index
    %c0_14 = arith.constant 0 : index
    %7 = vector.load %arg10[%c0_13, %c2, %c0_14] : memref<2x26x128xf32, #tpu.memory_space<vmem>>, vector<2x16x64xf32>
    %c0_15 = arith.constant 0 : index
    %c3 = arith.constant 3 : index
    %c0_16 = arith.constant 0 : index
    %8 = vector.load %arg10[%c0_15, %c3, %c0_16] : memref<2x26x128xf32, #tpu.memory_space<vmem>>, vector<2x16x64xf32>
    %c0_17 = arith.constant 0 : index
    %c4 = arith.constant 4 : index
    %c0_18 = arith.constant 0 : index
    %9 = vector.load %arg10[%c0_17, %c4, %c0_18] : memref<2x26x128xf32, #tpu.memory_space<vmem>>, vector<2x16x64xf32>
    %c0_19 = arith.constant 0 : index
    %c5_20 = arith.constant 5 : index
    %c0_21 = arith.constant 0 : index
    %10 = vector.load %arg10[%c0_19, %c5_20, %c0_21] : memref<2x26x128xf32, #tpu.memory_space<vmem>>, vector<2x16x64xf32>
    %c0_22 = arith.constant 0 : index
    %c6 = arith.constant 6 : index
    %c0_23 = arith.constant 0 : index
    %11 = vector.load %arg10[%c0_22, %c6, %c0_23] : memref<2x26x128xf32, #tpu.memory_space<vmem>>, vector<2x16x64xf32>
    %c0_24 = arith.constant 0 : index
    %c7 = arith.constant 7 : index
    %c0_25 = arith.constant 0 : index
    %12 = vector.load %arg10[%c0_24, %c7, %c0_25] : memref<2x26x128xf32, #tpu.memory_space<vmem>>, vector<2x16x64xf32>
    %c0_26 = arith.constant 0 : index
    %c8 = arith.constant 8 : index
    %c0_27 = arith.constant 0 : index
    %13 = vector.load %arg10[%c0_26, %c8, %c0_27] : memref<2x26x128xf32, #tpu.memory_space<vmem>>, vector<2x16x64xf32>
    %c0_28 = arith.constant 0 : index
    %c9 = arith.constant 9 : index
    %c0_29 = arith.constant 0 : index
    %14 = vector.load %arg10[%c0_28, %c9, %c0_29] : memref<2x26x128xf32, #tpu.memory_space<vmem>>, vector<2x16x64xf32>
    %c0_30 = arith.constant 0 : index
    %c10 = arith.constant 10 : index
    %c0_31 = arith.constant 0 : index
    %15 = vector.load %arg10[%c0_30, %c10, %c0_31] : memref<2x26x128xf32, #tpu.memory_space<vmem>>, vector<2x16x64xf32>
    %16 = tpu.concatenate %5, %6, %7, %8, %9, %10, %11, %12, %13, %14, %15 in 2 : vector<2x16x64xf32>, vector<2x16x64xf32>, vector<2x16x64xf32>, vector<2x16x64xf32>, vector<2x16x64xf32>, vector<2x16x64xf32>, vector<2x16x64xf32>, vector<2x16x64xf32>, vector<2x16x64xf32>, vector<2x16x64xf32>, vector<2x16x64xf32> -> vector<2x16x704xf32>
    %17 = vector.shape_cast %16 : vector<2x16x704xf32> to vector<32x704xf32>
    %c0_32 = arith.constant 0 : index
    %c0_33 = arith.constant 0 : index
    %c0_34 = arith.constant 0 : index
    %18 = vector.load %arg3[%c0_32, %c0_33, %c0_34] : memref<1x704x512xbf16, #tpu.memory_space<vmem>>, vector<1x704x512xbf16>
    %19 = vector.shape_cast %18 : vector<1x704x512xbf16> to vector<704x512xbf16>
    %20 = arith.extf %19 : vector<704x512xbf16> to vector<704x512xf32>
    %cst_35 = arith.constant dense<0.000000e+00> : vector<32x512xf32>
    %21 = tpu.matmul %17, %20, %cst_35 {dimension_numbers = #tpu.dot_dimension_numbers<[1], [0], [0], [1], [0, 0, 1, 1], [], []>} : vector<32x704xf32>, vector<704x512xf32>, vector<32x512xf32> -> vector<32x512xf32>
    %c0_36 = arith.constant 0 : index
    %c0_37 = arith.constant 0 : index
    %c0_38 = arith.constant 0 : index
    %22 = vector.load %arg6[%c0_36, %c0_37, %c0_38] : memref<1x3x512xf32, #tpu.memory_space<vmem>>, vector<1x3x512xf32>
    %23 = vector.shape_cast %22 : vector<1x3x512xf32> to vector<3x512xf32>
    %24 = vector.extract_strided_slice %23 {offsets = [0, 0], sizes = [1, 512], strides = [1, 1]} : vector<3x512xf32> to vector<1x512xf32>
    %25 = vector.broadcast %24 : vector<1x512xf32> to vector<32x512xf32>
    %26 = arith.addf %21, %25 : vector<32x512xf32>
    %cst_39 = arith.constant 0.000000e+00 : f32
    %27 = vector.broadcast %cst_39 : f32 to vector<32x512xf32>
    %28 = arith.maximumf %26, %27 : vector<32x512xf32>
    %29 = vector.extract_strided_slice %23 {offsets = [1, 0], sizes = [1, 512], strides = [1, 1]} : vector<3x512xf32> to vector<1x512xf32>
    %30 = vector.broadcast %29 : vector<1x512xf32> to vector<32x512xf32>
    %31 = arith.mulf %28, %30 : vector<32x512xf32>
    %32 = vector.extract_strided_slice %23 {offsets = [2, 0], sizes = [1, 512], strides = [1, 1]} : vector<3x512xf32> to vector<1x512xf32>
    %33 = vector.broadcast %32 : vector<1x512xf32> to vector<32x512xf32>
    %34 = arith.addf %31, %33 : vector<32x512xf32>
    %35 = vector.extract_strided_slice %34 {offsets = [0, 0], sizes = [32, 128], strides = [1, 1]} : vector<32x512xf32> to vector<32x128xf32>
    %36 = vector.shape_cast %35 : vector<32x128xf32> to vector<2x16x128xf32>
    %c0_40 = arith.constant 0 : index
    %c5_41 = arith.constant 5 : index
    %c0_42 = arith.constant 0 : index
    %37 = vector.load %arg10[%c0_40, %c5_41, %c0_42] : memref<2x26x128xf32, #tpu.memory_space<vmem>>, vector<2x16x128xf32>
    tpu.vector_store %arg10[%c0_40, %c5_41, %c0_42], %36 {strides = array<i32>} : memref<2x26x128xf32, #tpu.memory_space<vmem>>, vector<2x16x128xf32>,
    %c0_43 = arith.constant 0 : index
    %c4_44 = arith.constant 4 : index
    %c0_45 = arith.constant 0 : index
    %38 = vector.load %arg10[%c0_43, %c4_44, %c0_45] : memref<2x26x128xf32, #tpu.memory_space<vmem>>, vector<2x16x128xf32>
    %c0_46 = arith.constant 0 : index
    %c5_47 = arith.constant 5 : index
    %c0_48 = arith.constant 0 : index
    %39 = vector.load %arg10[%c0_46, %c5_47, %c0_48] : memref<2x26x128xf32, #tpu.memory_space<vmem>>, vector<2x16x128xf32>
    %c0_49 = arith.constant 0 : index
    %c6_50 = arith.constant 6 : index
    %c0_51 = arith.constant 0 : index
    %40 = vector.load %arg10[%c0_49, %c6_50, %c0_51] : memref<2x26x128xf32, #tpu.memory_space<vmem>>, vector<2x16x128xf32>
    %41 = tpu.concatenate %38, %39, %40 in 2 : vector<2x16x128xf32>, vector<2x16x128xf32>, vector<2x16x128xf32> -> vector<2x16x384xf32>
    %42 = vector.shape_cast %41 : vector<2x16x384xf32> to vector<32x384xf32>
    %c0_52 = arith.constant 0 : index
    %c0_53 = arith.constant 0 : index
    %c0_54 = arith.constant 0 : index
    %43 = vector.load %arg4[%c0_52, %c0_53, %c0_54] : memref<1x3584x64xbf16, #tpu.memory_space<vmem>>, vector<1x384x64xbf16>
    %44 = vector.shape_cast %43 : vector<1x384x64xbf16> to vector<384x64xbf16>
    %45 = arith.extf %44 : vector<384x64xbf16> to vector<384x64xf32>
    %cst_55 = arith.constant dense<0.000000e+00> : vector<32x64xf32>
    %46 = tpu.matmul %42, %45, %cst_55 {dimension_numbers = #tpu.dot_dimension_numbers<[1], [0], [0], [1], [0, 0, 1, 1], [], []>} : vector<32x384xf32>, vector<384x64xf32>, vector<32x64xf32> -> vector<32x64xf32>
    %c0_56 = arith.constant 0 : index
    %c0_57 = arith.constant 0 : index
    %c0_58 = arith.constant 0 : index
    %c0_59 = arith.constant 0 : index
    %c0_60 = arith.constant 0 : index
    %47 = vector.load %arg7[%c0_56, %c0_57, %c0_58, %c0_59, %c0_60] : memref<1x4x2x3x128xf32, #tpu.memory_space<vmem>>, vector<1x1x1x3x128xf32>
    %48 = vector.shape_cast %47 : vector<1x1x1x3x128xf32> to vector<3x128xf32>
    %49 = vector.extract_strided_slice %48 {offsets = [0, 0], sizes = [3, 64], strides = [1, 1]} : vector<3x128xf32> to vector<3x64xf32>
    %50 = vector.extract_strided_slice %49 {offsets = [0, 0], sizes = [1, 64], strides = [1, 1]} : vector<3x64xf32> to vector<1x64xf32>
    %51 = vector.broadcast %50 : vector<1x64xf32> to vector<32x64xf32>
    %52 = arith.addf %46, %51 : vector<32x64xf32>
    %cst_61 = arith.constant 0.000000e+00 : f32
    %53 = vector.broadcast %cst_61 : f32 to vector<32x64xf32>
    %54 = arith.maximumf %52, %53 : vector<32x64xf32>
    %55 = vector.extract_strided_slice %49 {offsets = [1, 0], sizes = [1, 64], strides = [1, 1]} : vector<3x64xf32> to vector<1x64xf32>
    %56 = vector.broadcast %55 : vector<1x64xf32> to vector<32x64xf32>
    %57 = arith.mulf %54, %56 : vector<32x64xf32>
    %58 = vector.extract_strided_slice %49 {offsets = [2, 0], sizes = [1, 64], strides = [1, 1]} : vector<3x64xf32> to vector<1x64xf32>
    %59 = vector.broadcast %58 : vector<1x64xf32> to vector<32x64xf32>
    %60 = arith.addf %57, %59 : vector<32x64xf32>
    %61 = vector.shape_cast %60 : vector<32x64xf32> to vector<2x16x64xf32>
    %c0_62 = arith.constant 0 : index
    %c5_63 = arith.constant 5 : index
    %c0_64 = arith.constant 0 : index
    %62 = vector.load %arg10[%c0_62, %c5_63, %c0_64] : memref<2x26x128xf32, #tpu.memory_space<vmem>>, vector<2x16x64xf32>
    tpu.vector_store %arg10[%c0_62, %c5_63, %c0_64], %61 {strides = array<i32>} : memref<2x26x128xf32, #tpu.memory_space<vmem>>, vector<2x16x64xf32>,
    %c0_65 = arith.constant 0 : index
    %c4_66 = arith.constant 4 : index
    %c0_67 = arith.constant 0 : index
    %63 = vector.load %arg10[%c0_65, %c4_66, %c0_67] : memref<2x26x128xf32, #tpu.memory_space<vmem>>, vector<2x16x64xf32>
    %c0_68 = arith.constant 0 : index
    %c5_69 = arith.constant 5 : index
    %c0_70 = arith.constant 0 : index
    %64 = vector.load %arg10[%c0_68, %c5_69, %c0_70] : memref<2x26x128xf32, #tpu.memory_space<vmem>>, vector<2x16x64xf32>
    %c0_71 = arith.constant 0 : index
    %c6_72 = arith.constant 6 : index
    %c0_73 = arith.constant 0 : index
    %65 = vector.load %arg10[%c0_71, %c6_72, %c0_73] : memref<2x26x128xf32, #tpu.memory_space<vmem>>, vector<2x16x64xf32>
    %66 = tpu.concatenate %63, %64, %65 in 2 : vector<2x16x64xf32>, vector<2x16x64xf32>, vector<2x16x64xf32> -> vector<2x16x192xf32>
    %67 = vector.shape_cast %66 : vector<2x16x192xf32> to vector<32x192xf32>
    %c0_74 = arith.constant 0 : index
    %c0_75 = arith.constant 0 : index
    %c0_76 = arith.constant 0 : index
    %68 = vector.load %arg5[%c0_74, %c0_75, %c0_76] : memref<1x1792x16xbf16, #tpu.memory_space<vmem>>, vector<1x192x16xbf16>
    %69 = vector.shape_cast %68 : vector<1x192x16xbf16> to vector<192x16xbf16>
    %70 = arith.extf %69 : vector<192x16xbf16> to vector<192x16xf32>
    %cst_77 = arith.constant dense<0.000000e+00> : vector<32x16xf32>
    %71 = tpu.matmul %67, %70, %cst_77 {dimension_numbers = #tpu.dot_dimension_numbers<[1], [0], [0], [1], [0, 0, 1, 1], [], []>} : vector<32x192xf32>, vector<192x16xf32>, vector<32x16xf32> -> vector<32x16xf32>
    %c0_78 = arith.constant 0 : index
    %c0_79 = arith.constant 0 : index
    %c1_80 = arith.constant 1 : index
    %c0_81 = arith.constant 0 : index
    %c0_82 = arith.constant 0 : index
    %72 = vector.load %arg7[%c0_78, %c0_79, %c1_80, %c0_81, %c0_82] : memref<1x4x2x3x128xf32, #tpu.memory_space<vmem>>, vector<1x1x1x3x128xf32>
    %73 = vector.shape_cast %72 : vector<1x1x1x3x128xf32> to vector<3x128xf32>
    %74 = vector.extract_strided_slice %73 {offsets = [0, 0], sizes = [3, 16], strides = [1, 1]} : vector<3x128xf32> to vector<3x16xf32>
    %75 = vector.extract_strided_slice %74 {offsets = [0, 0], sizes = [1, 16], strides = [1, 1]} : vector<3x16xf32> to vector<1x16xf32>
    %76 = vector.broadcast %75 : vector<1x16xf32> to vector<32x16xf32>
    %77 = arith.addf %71, %76 : vector<32x16xf32>
    %cst_83 = arith.constant 0.000000e+00 : f32
    %78 = vector.broadcast %cst_83 : f32 to vector<32x16xf32>
    %79 = arith.maximumf %77, %78 : vector<32x16xf32>
    %80 = vector.extract_strided_slice %74 {offsets = [1, 0], sizes = [1, 16], strides = [1, 1]} : vector<3x16xf32> to vector<1x16xf32>
    %81 = vector.broadcast %80 : vector<1x16xf32> to vector<32x16xf32>
    %82 = arith.mulf %79, %81 : vector<32x16xf32>
    %83 = vector.extract_strided_slice %74 {offsets = [2, 0], sizes = [1, 16], strides = [1, 1]} : vector<3x16xf32> to vector<1x16xf32>
    %84 = vector.broadcast %83 : vector<1x16xf32> to vector<32x16xf32>
    %85 = arith.addf %82, %84 : vector<32x16xf32>
    %86 = vector.shape_cast %85 : vector<32x16xf32> to vector<2x16x16xf32>
    %87 = vector.extract_strided_slice %34 {offsets = [0, 128], sizes = [32, 128], strides = [1, 1]} : vector<32x512xf32> to vector<32x128xf32>
    %88 = vector.shape_cast %87 : vector<32x128xf32> to vector<2x16x128xf32>
    %c0_84 = arith.constant 0 : index
    %c5_85 = arith.constant 5 : index
    %c0_86 = arith.constant 0 : index
    %89 = vector.load %arg10[%c0_84, %c5_85, %c0_86] : memref<2x26x128xf32, #tpu.memory_space<vmem>>, vector<2x16x128xf32>
    tpu.vector_store %arg10[%c0_84, %c5_85, %c0_86], %88 {strides = array<i32>} : memref<2x26x128xf32, #tpu.memory_space<vmem>>, vector<2x16x128xf32>,
    %c0_87 = arith.constant 0 : index
    %c3_88 = arith.constant 3 : index
    %c0_89 = arith.constant 0 : index
    %90 = vector.load %arg10[%c0_87, %c3_88, %c0_89] : memref<2x26x128xf32, #tpu.memory_space<vmem>>, vector<2x16x128xf32>
    %c0_90 = arith.constant 0 : index
    %c4_91 = arith.constant 4 : index
    %c0_92 = arith.constant 0 : index
    %91 = vector.load %arg10[%c0_90, %c4_91, %c0_92] : memref<2x26x128xf32, #tpu.memory_space<vmem>>, vector<2x16x128xf32>
    %c0_93 = arith.constant 0 : index
    %c5_94 = arith.constant 5 : index
    %c0_95 = arith.constant 0 : index
    %92 = vector.load %arg10[%c0_93, %c5_94, %c0_95] : memref<2x26x128xf32, #tpu.memory_space<vmem>>, vector<2x16x128xf32>
    %c0_96 = arith.constant 0 : index
    %c6_97 = arith.constant 6 : index
    %c0_98 = arith.constant 0 : index
    %93 = vector.load %arg10[%c0_96, %c6_97, %c0_98] : memref<2x26x128xf32, #tpu.memory_space<vmem>>, vector<2x16x128xf32>
    %c0_99 = arith.constant 0 : index
    %c7_100 = arith.constant 7 : index
    %c0_101 = arith.constant 0 : index
    %94 = vector.load %arg10[%c0_99, %c7_100, %c0_101] : memref<2x26x128xf32, #tpu.memory_space<vmem>>, vector<2x16x128xf32>
    %95 = tpu.concatenate %90, %91, %92, %93, %94 in 2 : vector<2x16x128xf32>, vector<2x16x128xf32>, vector<2x16x128xf32>, vector<2x16x128xf32>, vector<2x16x128xf32> -> vector<2x16x640xf32>
    %96 = vector.shape_cast %95 : vector<2x16x640xf32> to vector<32x640xf32>
    %c0_102 = arith.constant 0 : index
    %c384 = arith.constant 384 : index
    %c0_103 = arith.constant 0 : index
    %97 = vector.load %arg4[%c0_102, %c384, %c0_103] : memref<1x3584x64xbf16, #tpu.memory_space<vmem>>, vector<1x640x64xbf16>
    %98 = vector.shape_cast %97 : vector<1x640x64xbf16> to vector<640x64xbf16>
    %99 = arith.extf %98 : vector<640x64xbf16> to vector<640x64xf32>
    %cst_104 = arith.constant dense<0.000000e+00> : vector<32x64xf32>
    %100 = tpu.matmul %96, %99, %cst_104 {dimension_numbers = #tpu.dot_dimension_numbers<[1], [0], [0], [1], [0, 0, 1, 1], [], []>} : vector<32x640xf32>, vector<640x64xf32>, vector<32x64xf32> -> vector<32x64xf32>
    %c0_105 = arith.constant 0 : index
    %c1_106 = arith.constant 1 : index
    %c0_107 = arith.constant 0 : index
    %c0_108 = arith.constant 0 : index
    %c0_109 = arith.constant 0 : index
    %101 = vector.load %arg7[%c0_105, %c1_106, %c0_107, %c0_108, %c0_109] : memref<1x4x2x3x128xf32, #tpu.memory_space<vmem>>, vector<1x1x1x3x128xf32>
    %102 = vector.shape_cast %101 : vector<1x1x1x3x128xf32> to vector<3x128xf32>
    %103 = vector.extract_strided_slice %102 {offsets = [0, 0], sizes = [3, 64], strides = [1, 1]} : vector<3x128xf32> to vector<3x64xf32>
    %104 = vector.extract_strided_slice %103 {offsets = [0, 0], sizes = [1, 64], strides = [1, 1]} : vector<3x64xf32> to vector<1x64xf32>
    %105 = vector.broadcast %104 : vector<1x64xf32> to vector<32x64xf32>
    %106 = arith.addf %100, %105 : vector<32x64xf32>
    %cst_110 = arith.constant 0.000000e+00 : f32
    %107 = vector.broadcast %cst_110 : f32 to vector<32x64xf32>
    %108 = arith.maximumf %106, %107 : vector<32x64xf32>
    %109 = vector.extract_strided_slice %103 {offsets = [1, 0], sizes = [1, 64], strides = [1, 1]} : vector<3x64xf32> to vector<1x64xf32>
    %110 = vector.broadcast %109 : vector<1x64xf32> to vector<32x64xf32>
    %111 = arith.mulf %108, %110 : vector<32x64xf32>
    %112 = vector.extract_strided_slice %103 {offsets = [2, 0], sizes = [1, 64], strides = [1, 1]} : vector<3x64xf32> to vector<1x64xf32>
    %113 = vector.broadcast %112 : vector<1x64xf32> to vector<32x64xf32>
    %114 = arith.addf %111, %113 : vector<32x64xf32>
    %115 = vector.shape_cast %114 : vector<32x64xf32> to vector<2x16x64xf32>
    %c0_111 = arith.constant 0 : index
    %c5_112 = arith.constant 5 : index
    %c0_113 = arith.constant 0 : index
    %116 = vector.load %arg10[%c0_111, %c5_112, %c0_113] : memref<2x26x128xf32, #tpu.memory_space<vmem>>, vector<2x16x64xf32>
    tpu.vector_store %arg10[%c0_111, %c5_112, %c0_113], %115 {strides = array<i32>} : memref<2x26x128xf32, #tpu.memory_space<vmem>>, vector<2x16x64xf32>,
    %c0_114 = arith.constant 0 : index
    %c3_115 = arith.constant 3 : index
    %c0_116 = arith.constant 0 : index
    %117 = vector.load %arg10[%c0_114, %c3_115, %c0_116] : memref<2x26x128xf32, #tpu.memory_space<vmem>>, vector<2x16x64xf32>
    %c0_117 = arith.constant 0 : index
    %c4_118 = arith.constant 4 : index
    %c0_119 = arith.constant 0 : index
    %118 = vector.load %arg10[%c0_117, %c4_118, %c0_119] : memref<2x26x128xf32, #tpu.memory_space<vmem>>, vector<2x16x64xf32>
    %c0_120 = arith.constant 0 : index
    %c5_121 = arith.constant 5 : index
    %c0_122 = arith.constant 0 : index
    %119 = vector.load %arg10[%c0_120, %c5_121, %c0_122] : memref<2x26x128xf32, #tpu.memory_space<vmem>>, vector<2x16x64xf32>
    %c0_123 = arith.constant 0 : index
    %c6_124 = arith.constant 6 : index
    %c0_125 = arith.constant 0 : index
    %120 = vector.load %arg10[%c0_123, %c6_124, %c0_125] : memref<2x26x128xf32, #tpu.memory_space<vmem>>, vector<2x16x64xf32>
    %c0_126 = arith.constant 0 : index
    %c7_127 = arith.constant 7 : index
    %c0_128 = arith.constant 0 : index
    %121 = vector.load %arg10[%c0_126, %c7_127, %c0_128] : memref<2x26x128xf32, #tpu.memory_space<vmem>>, vector<2x16x64xf32>
    %122 = tpu.concatenate %117, %118, %119, %120, %121 in 2 : vector<2x16x64xf32>, vector<2x16x64xf32>, vector<2x16x64xf32>, vector<2x16x64xf32>, vector<2x16x64xf32> -> vector<2x16x320xf32>
    %123 = vector.shape_cast %122 : vector<2x16x320xf32> to vector<32x320xf32>
    %c0_129 = arith.constant 0 : index
    %c192 = arith.constant 192 : index
    %c0_130 = arith.constant 0 : index
    %124 = vector.load %arg5[%c0_129, %c192, %c0_130] : memref<1x1792x16xbf16, #tpu.memory_space<vmem>>, vector<1x320x16xbf16>
    %125 = vector.shape_cast %124 : vector<1x320x16xbf16> to vector<320x16xbf16>
    %126 = arith.extf %125 : vector<320x16xbf16> to vector<320x16xf32>
    %cst_131 = arith.constant dense<0.000000e+00> : vector<32x16xf32>
    %127 = tpu.matmul %123, %126, %cst_131 {dimension_numbers = #tpu.dot_dimension_numbers<[1], [0], [0], [1], [0, 0, 1, 1], [], []>} : vector<32x320xf32>, vector<320x16xf32>, vector<32x16xf32> -> vector<32x16xf32>
    %c0_132 = arith.constant 0 : index
    %c1_133 = arith.constant 1 : index
    %c1_134 = arith.constant 1 : index
    %c0_135 = arith.constant 0 : index
    %c0_136 = arith.constant 0 : index
    %128 = vector.load %arg7[%c0_132, %c1_133, %c1_134, %c0_135, %c0_136] : memref<1x4x2x3x128xf32, #tpu.memory_space<vmem>>, vector<1x1x1x3x128xf32>
    %129 = vector.shape_cast %128 : vector<1x1x1x3x128xf32> to vector<3x128xf32>
    %130 = vector.extract_strided_slice %129 {offsets = [0, 0], sizes = [3, 16], strides = [1, 1]} : vector<3x128xf32> to vector<3x16xf32>
    %131 = vector.extract_strided_slice %130 {offsets = [0, 0], sizes = [1, 16], strides = [1, 1]} : vector<3x16xf32> to vector<1x16xf32>
    %132 = vector.broadcast %131 : vector<1x16xf32> to vector<32x16xf32>
    %133 = arith.addf %127, %132 : vector<32x16xf32>
    %cst_137 = arith.constant 0.000000e+00 : f32
    %134 = vector.broadcast %cst_137 : f32 to vector<32x16xf32>
    %135 = arith.maximumf %133, %134 : vector<32x16xf32>
    %136 = vector.extract_strided_slice %130 {offsets = [1, 0], sizes = [1, 16], strides = [1, 1]} : vector<3x16xf32> to vector<1x16xf32>
    %137 = vector.broadcast %136 : vector<1x16xf32> to vector<32x16xf32>
    %138 = arith.mulf %135, %137 : vector<32x16xf32>
    %139 = vector.extract_strided_slice %130 {offsets = [2, 0], sizes = [1, 16], strides = [1, 1]} : vector<3x16xf32> to vector<1x16xf32>
    %140 = vector.broadcast %139 : vector<1x16xf32> to vector<32x16xf32>
    %141 = arith.addf %138, %140 : vector<32x16xf32>
    %142 = vector.shape_cast %141 : vector<32x16xf32> to vector<2x16x16xf32>
    %143 = arith.addf %86, %142 : vector<2x16x16xf32>
    %144 = vector.extract_strided_slice %34 {offsets = [0, 256], sizes = [32, 128], strides = [1, 1]} : vector<32x512xf32> to vector<32x128xf32>
    %145 = vector.shape_cast %144 : vector<32x128xf32> to vector<2x16x128xf32>
    %c0_138 = arith.constant 0 : index
    %c5_139 = arith.constant 5 : index
    %c0_140 = arith.constant 0 : index
    %146 = vector.load %arg10[%c0_138, %c5_139, %c0_140] : memref<2x26x128xf32, #tpu.memory_space<vmem>>, vector<2x16x128xf32>
    tpu.vector_store %arg10[%c0_138, %c5_139, %c0_140], %145 {strides = array<i32>} : memref<2x26x128xf32, #tpu.memory_space<vmem>>, vector<2x16x128xf32>,
    %c0_141 = arith.constant 0 : index
    %c1_142 = arith.constant 1 : index
    %c0_143 = arith.constant 0 : index
    %147 = vector.load %arg10[%c0_141, %c1_142, %c0_143] : memref<2x26x128xf32, #tpu.memory_space<vmem>>, vector<2x16x128xf32>
    %c0_144 = arith.constant 0 : index
    %c2_145 = arith.constant 2 : index
    %c0_146 = arith.constant 0 : index
    %148 = vector.load %arg10[%c0_144, %c2_145, %c0_146] : memref<2x26x128xf32, #tpu.memory_space<vmem>>, vector<2x16x128xf32>
    %c0_147 = arith.constant 0 : index
    %c3_148 = arith.constant 3 : index
    %c0_149 = arith.constant 0 : index
    %149 = vector.load %arg10[%c0_147, %c3_148, %c0_149] : memref<2x26x128xf32, #tpu.memory_space<vmem>>, vector<2x16x128xf32>
    %c0_150 = arith.constant 0 : index
    %c4_151 = arith.constant 4 : index
    %c0_152 = arith.constant 0 : index
    %150 = vector.load %arg10[%c0_150, %c4_151, %c0_152] : memref<2x26x128xf32, #tpu.memory_space<vmem>>, vector<2x16x128xf32>
    %c0_153 = arith.constant 0 : index
    %c5_154 = arith.constant 5 : index
    %c0_155 = arith.constant 0 : index
    %151 = vector.load %arg10[%c0_153, %c5_154, %c0_155] : memref<2x26x128xf32, #tpu.memory_space<vmem>>, vector<2x16x128xf32>
    %c0_156 = arith.constant 0 : index
    %c6_157 = arith.constant 6 : index
    %c0_158 = arith.constant 0 : index
    %152 = vector.load %arg10[%c0_156, %c6_157, %c0_158] : memref<2x26x128xf32, #tpu.memory_space<vmem>>, vector<2x16x128xf32>
    %c0_159 = arith.constant 0 : index
    %c7_160 = arith.constant 7 : index
    %c0_161 = arith.constant 0 : index
    %153 = vector.load %arg10[%c0_159, %c7_160, %c0_161] : memref<2x26x128xf32, #tpu.memory_space<vmem>>, vector<2x16x128xf32>
    %c0_162 = arith.constant 0 : index
    %c8_163 = arith.constant 8 : index
    %c0_164 = arith.constant 0 : index
    %154 = vector.load %arg10[%c0_162, %c8_163, %c0_164] : memref<2x26x128xf32, #tpu.memory_space<vmem>>, vector<2x16x128xf32>
    %c0_165 = arith.constant 0 : index
    %c9_166 = arith.constant 9 : index
    %c0_167 = arith.constant 0 : index
    %155 = vector.load %arg10[%c0_165, %c9_166, %c0_167] : memref<2x26x128xf32, #tpu.memory_space<vmem>>, vector<2x16x128xf32>
    %156 = tpu.concatenate %147, %148, %149, %150, %151, %152, %153, %154, %155 in 2 : vector<2x16x128xf32>, vector<2x16x128xf32>, vector<2x16x128xf32>, vector<2x16x128xf32>, vector<2x16x128xf32>, vector<2x16x128xf32>, vector<2x16x128xf32>, vector<2x16x128xf32>, vector<2x16x128xf32> -> vector<2x16x1152xf32>
    %157 = vector.shape_cast %156 : vector<2x16x1152xf32> to vector<32x1152xf32>
    %c0_168 = arith.constant 0 : index
    %c1024 = arith.constant 1024 : index
    %c0_169 = arith.constant 0 : index
    %158 = vector.load %arg4[%c0_168, %c1024, %c0_169] : memref<1x3584x64xbf16, #tpu.memory_space<vmem>>, vector<1x1152x64xbf16>
    %159 = vector.shape_cast %158 : vector<1x1152x64xbf16> to vector<1152x64xbf16>
    %160 = arith.extf %159 : vector<1152x64xbf16> to vector<1152x64xf32>
    %cst_170 = arith.constant dense<0.000000e+00> : vector<32x64xf32>
    %161 = tpu.matmul %157, %160, %cst_170 {dimension_numbers = #tpu.dot_dimension_numbers<[1], [0], [0], [1], [0, 0, 1, 1], [], []>} : vector<32x1152xf32>, vector<1152x64xf32>, vector<32x64xf32> -> vector<32x64xf32>
    %c0_171 = arith.constant 0 : index
    %c2_172 = arith.constant 2 : index
    %c0_173 = arith.constant 0 : index
    %c0_174 = arith.constant 0 : index
    %c0_175 = arith.constant 0 : index
    %162 = vector.load %arg7[%c0_171, %c2_172, %c0_173, %c0_174, %c0_175] : memref<1x4x2x3x128xf32, #tpu.memory_space<vmem>>, vector<1x1x1x3x128xf32>
    %163 = vector.shape_cast %162 : vector<1x1x1x3x128xf32> to vector<3x128xf32>
    %164 = vector.extract_strided_slice %163 {offsets = [0, 0], sizes = [3, 64], strides = [1, 1]} : vector<3x128xf32> to vector<3x64xf32>
    %165 = vector.extract_strided_slice %164 {offsets = [0, 0], sizes = [1, 64], strides = [1, 1]} : vector<3x64xf32> to vector<1x64xf32>
    %166 = vector.broadcast %165 : vector<1x64xf32> to vector<32x64xf32>
    %167 = arith.addf %161, %166 : vector<32x64xf32>
    %cst_176 = arith.constant 0.000000e+00 : f32
    %168 = vector.broadcast %cst_176 : f32 to vector<32x64xf32>
    %169 = arith.maximumf %167, %168 : vector<32x64xf32>
    %170 = vector.extract_strided_slice %164 {offsets = [1, 0], sizes = [1, 64], strides = [1, 1]} : vector<3x64xf32> to vector<1x64xf32>
    %171 = vector.broadcast %170 : vector<1x64xf32> to vector<32x64xf32>
    %172 = arith.mulf %169, %171 : vector<32x64xf32>
    %173 = vector.extract_strided_slice %164 {offsets = [2, 0], sizes = [1, 64], strides = [1, 1]} : vector<3x64xf32> to vector<1x64xf32>
    %174 = vector.broadcast %173 : vector<1x64xf32> to vector<32x64xf32>
    %175 = arith.addf %172, %174 : vector<32x64xf32>
    %176 = vector.shape_cast %175 : vector<32x64xf32> to vector<2x16x64xf32>
    %c0_177 = arith.constant 0 : index
    %c5_178 = arith.constant 5 : index
    %c0_179 = arith.constant 0 : index
    %177 = vector.load %arg10[%c0_177, %c5_178, %c0_179] : memref<2x26x128xf32, #tpu.memory_space<vmem>>, vector<2x16x64xf32>
    tpu.vector_store %arg10[%c0_177, %c5_178, %c0_179], %176 {strides = array<i32>} : memref<2x26x128xf32, #tpu.memory_space<vmem>>, vector<2x16x64xf32>,
    %c0_180 = arith.constant 0 : index
    %c1_181 = arith.constant 1 : index
    %c0_182 = arith.constant 0 : index
    %178 = vector.load %arg10[%c0_180, %c1_181, %c0_182] : memref<2x26x128xf32, #tpu.memory_space<vmem>>, vector<2x16x64xf32>
    %c0_183 = arith.constant 0 : index
    %c2_184 = arith.constant 2 : index
    %c0_185 = arith.constant 0 : index
    %179 = vector.load %arg10[%c0_183, %c2_184, %c0_185] : memref<2x26x128xf32, #tpu.memory_space<vmem>>, vector<2x16x64xf32>
    %c0_186 = arith.constant 0 : index
    %c3_187 = arith.constant 3 : index
    %c0_188 = arith.constant 0 : index
    %180 = vector.load %arg10[%c0_186, %c3_187, %c0_188] : memref<2x26x128xf32, #tpu.memory_space<vmem>>, vector<2x16x64xf32>
    %c0_189 = arith.constant 0 : index
    %c4_190 = arith.constant 4 : index
    %c0_191 = arith.constant 0 : index
    %181 = vector.load %arg10[%c0_189, %c4_190, %c0_191] : memref<2x26x128xf32, #tpu.memory_space<vmem>>, vector<2x16x64xf32>
    %c0_192 = arith.constant 0 : index
    %c5_193 = arith.constant 5 : index
    %c0_194 = arith.constant 0 : index
    %182 = vector.load %arg10[%c0_192, %c5_193, %c0_194] : memref<2x26x128xf32, #tpu.memory_space<vmem>>, vector<2x16x64xf32>
    %c0_195 = arith.constant 0 : index
    %c6_196 = arith.constant 6 : index
    %c0_197 = arith.constant 0 : index
    %183 = vector.load %arg10[%c0_195, %c6_196, %c0_197] : memref<2x26x128xf32, #tpu.memory_space<vmem>>, vector<2x16x64xf32>
    %c0_198 = arith.constant 0 : index
    %c7_199 = arith.constant 7 : index
    %c0_200 = arith.constant 0 : index
    %184 = vector.load %arg10[%c0_198, %c7_199, %c0_200] : memref<2x26x128xf32, #tpu.memory_space<vmem>>, vector<2x16x64xf32>
    %c0_201 = arith.constant 0 : index
    %c8_202 = arith.constant 8 : index
    %c0_203 = arith.constant 0 : index
    %185 = vector.load %arg10[%c0_201, %c8_202, %c0_203] : memref<2x26x128xf32, #tpu.memory_space<vmem>>, vector<2x16x64xf32>
    %c0_204 = arith.constant 0 : index
    %c9_205 = arith.constant 9 : index
    %c0_206 = arith.constant 0 : index
    %186 = vector.load %arg10[%c0_204, %c9_205, %c0_206] : memref<2x26x128xf32, #tpu.memory_space<vmem>>, vector<2x16x64xf32>
    %187 = tpu.concatenate %178, %179, %180, %181, %182, %183, %184, %185, %186 in 2 : vector<2x16x64xf32>, vector<2x16x64xf32>, vector<2x16x64xf32>, vector<2x16x64xf32>, vector<2x16x64xf32>, vector<2x16x64xf32>, vector<2x16x64xf32>, vector<2x16x64xf32>, vector<2x16x64xf32> -> vector<2x16x576xf32>
    %188 = vector.shape_cast %187 : vector<2x16x576xf32> to vector<32x576xf32>
    %c0_207 = arith.constant 0 : index
    %c512 = arith.constant 512 : index
    %c0_208 = arith.constant 0 : index
    %189 = vector.load %arg5[%c0_207, %c512, %c0_208] : memref<1x1792x16xbf16, #tpu.memory_space<vmem>>, vector<1x576x16xbf16>
    %190 = vector.shape_cast %189 : vector<1x576x16xbf16> to vector<576x16xbf16>
    %191 = arith.extf %190 : vector<576x16xbf16> to vector<576x16xf32>
    %cst_209 = arith.constant dense<0.000000e+00> : vector<32x16xf32>
    %192 = tpu.matmul %188, %191, %cst_209 {dimension_numbers = #tpu.dot_dimension_numbers<[1], [0], [0], [1], [0, 0, 1, 1], [], []>} : vector<32x576xf32>, vector<576x16xf32>, vector<32x16xf32> -> vector<32x16xf32>
    %c0_210 = arith.constant 0 : index
    %c2_211 = arith.constant 2 : index
    %c1_212 = arith.constant 1 : index
    %c0_213 = arith.constant 0 : index
    %c0_214 = arith.constant 0 : index
    %193 = vector.load %arg7[%c0_210, %c2_211, %c1_212, %c0_213, %c0_214] : memref<1x4x2x3x128xf32, #tpu.memory_space<vmem>>, vector<1x1x1x3x128xf32>
    %194 = vector.shape_cast %193 : vector<1x1x1x3x128xf32> to vector<3x128xf32>
    %195 = vector.extract_strided_slice %194 {offsets = [0, 0], sizes = [3, 16], strides = [1, 1]} : vector<3x128xf32> to vector<3x16xf32>
    %196 = vector.extract_strided_slice %195 {offsets = [0, 0], sizes = [1, 16], strides = [1, 1]} : vector<3x16xf32> to vector<1x16xf32>
    %197 = vector.broadcast %196 : vector<1x16xf32> to vector<32x16xf32>
    %198 = arith.addf %192, %197 : vector<32x16xf32>
    %cst_215 = arith.constant 0.000000e+00 : f32
    %199 = vector.broadcast %cst_215 : f32 to vector<32x16xf32>
    %200 = arith.maximumf %198, %199 : vector<32x16xf32>
    %201 = vector.extract_strided_slice %195 {offsets = [1, 0], sizes = [1, 16], strides = [1, 1]} : vector<3x16xf32> to vector<1x16xf32>
    %202 = vector.broadcast %201 : vector<1x16xf32> to vector<32x16xf32>
    %203 = arith.mulf %200, %202 : vector<32x16xf32>
    %204 = vector.extract_strided_slice %195 {offsets = [2, 0], sizes = [1, 16], strides = [1, 1]} : vector<3x16xf32> to vector<1x16xf32>
    %205 = vector.broadcast %204 : vector<1x16xf32> to vector<32x16xf32>
    %206 = arith.addf %203, %205 : vector<32x16xf32>
    %207 = vector.shape_cast %206 : vector<32x16xf32> to vector<2x16x16xf32>
    %208 = arith.addf %143, %207 : vector<2x16x16xf32>
    %209 = vector.extract_strided_slice %34 {offsets = [0, 384], sizes = [32, 128], strides = [1, 1]} : vector<32x512xf32> to vector<32x128xf32>
    %210 = vector.shape_cast %209 : vector<32x128xf32> to vector<2x16x128xf32>
    %c0_216 = arith.constant 0 : index
    %c5_217 = arith.constant 5 : index
    %c0_218 = arith.constant 0 : index
    %211 = vector.load %arg10[%c0_216, %c5_217, %c0_218] : memref<2x26x128xf32, #tpu.memory_space<vmem>>, vector<2x16x128xf32>
    tpu.vector_store %arg10[%c0_216, %c5_217, %c0_218], %210 {strides = array<i32>} : memref<2x26x128xf32, #tpu.memory_space<vmem>>, vector<2x16x128xf32>,
    %c0_219 = arith.constant 0 : index
    %c0_220 = arith.constant 0 : index
    %c0_221 = arith.constant 0 : index
    %212 = vector.load %arg10[%c0_219, %c0_220, %c0_221] : memref<2x26x128xf32, #tpu.memory_space<vmem>>, vector<2x16x128xf32>
    %c0_222 = arith.constant 0 : index
    %c1_223 = arith.constant 1 : index
    %c0_224 = arith.constant 0 : index
    %213 = vector.load %arg10[%c0_222, %c1_223, %c0_224] : memref<2x26x128xf32, #tpu.memory_space<vmem>>, vector<2x16x128xf32>
    %c0_225 = arith.constant 0 : index
    %c2_226 = arith.constant 2 : index
    %c0_227 = arith.constant 0 : index
    %214 = vector.load %arg10[%c0_225, %c2_226, %c0_227] : memref<2x26x128xf32, #tpu.memory_space<vmem>>, vector<2x16x128xf32>
    %c0_228 = arith.constant 0 : index
    %c3_229 = arith.constant 3 : index
    %c0_230 = arith.constant 0 : index
    %215 = vector.load %arg10[%c0_228, %c3_229, %c0_230] : memref<2x26x128xf32, #tpu.memory_space<vmem>>, vector<2x16x128xf32>
    %c0_231 = arith.constant 0 : index
    %c4_232 = arith.constant 4 : index
    %c0_233 = arith.constant 0 : index
    %216 = vector.load %arg10[%c0_231, %c4_232, %c0_233] : memref<2x26x128xf32, #tpu.memory_space<vmem>>, vector<2x16x128xf32>
    %c0_234 = arith.constant 0 : index
    %c5_235 = arith.constant 5 : index
    %c0_236 = arith.constant 0 : index
    %217 = vector.load %arg10[%c0_234, %c5_235, %c0_236] : memref<2x26x128xf32, #tpu.memory_space<vmem>>, vector<2x16x128xf32>
    %c0_237 = arith.constant 0 : index
    %c6_238 = arith.constant 6 : index
    %c0_239 = arith.constant 0 : index
    %218 = vector.load %arg10[%c0_237, %c6_238, %c0_239] : memref<2x26x128xf32, #tpu.memory_space<vmem>>, vector<2x16x128xf32>
    %c0_240 = arith.constant 0 : index
    %c7_241 = arith.constant 7 : index
    %c0_242 = arith.constant 0 : index
    %219 = vector.load %arg10[%c0_240, %c7_241, %c0_242] : memref<2x26x128xf32, #tpu.memory_space<vmem>>, vector<2x16x128xf32>
    %c0_243 = arith.constant 0 : index
    %c8_244 = arith.constant 8 : index
    %c0_245 = arith.constant 0 : index
    %220 = vector.load %arg10[%c0_243, %c8_244, %c0_245] : memref<2x26x128xf32, #tpu.memory_space<vmem>>, vector<2x16x128xf32>
    %c0_246 = arith.constant 0 : index
    %c9_247 = arith.constant 9 : index
    %c0_248 = arith.constant 0 : index
    %221 = vector.load %arg10[%c0_246, %c9_247, %c0_248] : memref<2x26x128xf32, #tpu.memory_space<vmem>>, vector<2x16x128xf32>
    %c0_249 = arith.constant 0 : index
    %c10_250 = arith.constant 10 : index
    %c0_251 = arith.constant 0 : index
    %222 = vector.load %arg10[%c0_249, %c10_250, %c0_251] : memref<2x26x128xf32, #tpu.memory_space<vmem>>, vector<2x16x128xf32>
    %223 = tpu.concatenate %212, %213, %214, %215, %216, %217, %218, %219, %220, %221, %222 in 2 : vector<2x16x128xf32>, vector<2x16x128xf32>, vector<2x16x128xf32>, vector<2x16x128xf32>, vector<2x16x128xf32>, vector<2x16x128xf32>, vector<2x16x128xf32>, vector<2x16x128xf32>, vector<2x16x128xf32>, vector<2x16x128xf32>, vector<2x16x128xf32> -> vector<2x16x1408xf32>
    %224 = vector.shape_cast %223 : vector<2x16x1408xf32> to vector<32x1408xf32>
    %c0_252 = arith.constant 0 : index
    %c2176 = arith.constant 2176 : index
    %c0_253 = arith.constant 0 : index
    %225 = vector.load %arg4[%c0_252, %c2176, %c0_253] : memref<1x3584x64xbf16, #tpu.memory_space<vmem>>, vector<1x1408x64xbf16>
    %226 = vector.shape_cast %225 : vector<1x1408x64xbf16> to vector<1408x64xbf16>
    %227 = arith.extf %226 : vector<1408x64xbf16> to vector<1408x64xf32>
    %cst_254 = arith.constant dense<0.000000e+00> : vector<32x64xf32>
    %228 = tpu.matmul %224, %227, %cst_254 {dimension_numbers = #tpu.dot_dimension_numbers<[1], [0], [0], [1], [0, 0, 1, 1], [], []>} : vector<32x1408xf32>, vector<1408x64xf32>, vector<32x64xf32> -> vector<32x64xf32>
    %c0_255 = arith.constant 0 : index
    %c3_256 = arith.constant 3 : index
    %c0_257 = arith.constant 0 : index
    %c0_258 = arith.constant 0 : index
    %c0_259 = arith.constant 0 : index
    %229 = vector.load %arg7[%c0_255, %c3_256, %c0_257, %c0_258, %c0_259] : memref<1x4x2x3x128xf32, #tpu.memory_space<vmem>>, vector<1x1x1x3x128xf32>
    %230 = vector.shape_cast %229 : vector<1x1x1x3x128xf32> to vector<3x128xf32>
    %231 = vector.extract_strided_slice %230 {offsets = [0, 0], sizes = [3, 64], strides = [1, 1]} : vector<3x128xf32> to vector<3x64xf32>
    %232 = vector.extract_strided_slice %231 {offsets = [0, 0], sizes = [1, 64], strides = [1, 1]} : vector<3x64xf32> to vector<1x64xf32>
    %233 = vector.broadcast %232 : vector<1x64xf32> to vector<32x64xf32>
    %234 = arith.addf %228, %233 : vector<32x64xf32>
    %cst_260 = arith.constant 0.000000e+00 : f32
    %235 = vector.broadcast %cst_260 : f32 to vector<32x64xf32>
    %236 = arith.maximumf %234, %235 : vector<32x64xf32>
    %237 = vector.extract_strided_slice %231 {offsets = [1, 0], sizes = [1, 64], strides = [1, 1]} : vector<3x64xf32> to vector<1x64xf32>
    %238 = vector.broadcast %237 : vector<1x64xf32> to vector<32x64xf32>
    %239 = arith.mulf %236, %238 : vector<32x64xf32>
    %240 = vector.extract_strided_slice %231 {offsets = [2, 0], sizes = [1, 64], strides = [1, 1]} : vector<3x64xf32> to vector<1x64xf32>
    %241 = vector.broadcast %240 : vector<1x64xf32> to vector<32x64xf32>
    %242 = arith.addf %239, %241 : vector<32x64xf32>
    %243 = vector.shape_cast %242 : vector<32x64xf32> to vector<2x16x64xf32>
    %c0_261 = arith.constant 0 : index
    %c5_262 = arith.constant 5 : index
    %c0_263 = arith.constant 0 : index
    %244 = vector.load %arg10[%c0_261, %c5_262, %c0_263] : memref<2x26x128xf32, #tpu.memory_space<vmem>>, vector<2x16x64xf32>
    tpu.vector_store %arg10[%c0_261, %c5_262, %c0_263], %243 {strides = array<i32>} : memref<2x26x128xf32, #tpu.memory_space<vmem>>, vector<2x16x64xf32>,
    %c0_264 = arith.constant 0 : index
    %c0_265 = arith.constant 0 : index
    %c0_266 = arith.constant 0 : index
    %245 = vector.load %arg10[%c0_264, %c0_265, %c0_266] : memref<2x26x128xf32, #tpu.memory_space<vmem>>, vector<2x16x64xf32>
    %c0_267 = arith.constant 0 : index
    %c1_268 = arith.constant 1 : index
    %c0_269 = arith.constant 0 : index
    %246 = vector.load %arg10[%c0_267, %c1_268, %c0_269] : memref<2x26x128xf32, #tpu.memory_space<vmem>>, vector<2x16x64xf32>
    %c0_270 = arith.constant 0 : index
    %c2_271 = arith.constant 2 : index
    %c0_272 = arith.constant 0 : index
    %247 = vector.load %arg10[%c0_270, %c2_271, %c0_272] : memref<2x26x128xf32, #tpu.memory_space<vmem>>, vector<2x16x64xf32>
    %c0_273 = arith.constant 0 : index
    %c3_274 = arith.constant 3 : index
    %c0_275 = arith.constant 0 : index
    %248 = vector.load %arg10[%c0_273, %c3_274, %c0_275] : memref<2x26x128xf32, #tpu.memory_space<vmem>>, vector<2x16x64xf32>
    %c0_276 = arith.constant 0 : index
    %c4_277 = arith.constant 4 : index
    %c0_278 = arith.constant 0 : index
    %249 = vector.load %arg10[%c0_276, %c4_277, %c0_278] : memref<2x26x128xf32, #tpu.memory_space<vmem>>, vector<2x16x64xf32>
    %c0_279 = arith.constant 0 : index
    %c5_280 = arith.constant 5 : index
    %c0_281 = arith.constant 0 : index
    %250 = vector.load %arg10[%c0_279, %c5_280, %c0_281] : memref<2x26x128xf32, #tpu.memory_space<vmem>>, vector<2x16x64xf32>
    %c0_282 = arith.constant 0 : index
    %c6_283 = arith.constant 6 : index
    %c0_284 = arith.constant 0 : index
    %251 = vector.load %arg10[%c0_282, %c6_283, %c0_284] : memref<2x26x128xf32, #tpu.memory_space<vmem>>, vector<2x16x64xf32>
    %c0_285 = arith.constant 0 : index
    %c7_286 = arith.constant 7 : index
    %c0_287 = arith.constant 0 : index
    %252 = vector.load %arg10[%c0_285, %c7_286, %c0_287] : memref<2x26x128xf32, #tpu.memory_space<vmem>>, vector<2x16x64xf32>
    %c0_288 = arith.constant 0 : index
    %c8_289 = arith.constant 8 : index
    %c0_290 = arith.constant 0 : index
    %253 = vector.load %arg10[%c0_288, %c8_289, %c0_290] : memref<2x26x128xf32, #tpu.memory_space<vmem>>, vector<2x16x64xf32>
    %c0_291 = arith.constant 0 : index
    %c9_292 = arith.constant 9 : index
    %c0_293 = arith.constant 0 : index
    %254 = vector.load %arg10[%c0_291, %c9_292, %c0_293] : memref<2x26x128xf32, #tpu.memory_space<vmem>>, vector<2x16x64xf32>
    %c0_294 = arith.constant 0 : index
    %c10_295 = arith.constant 10 : index
    %c0_296 = arith.constant 0 : index
    %255 = vector.load %arg10[%c0_294, %c10_295, %c0_296] : memref<2x26x128xf32, #tpu.memory_space<vmem>>, vector<2x16x64xf32>
    %256 = tpu.concatenate %245, %246, %247, %248, %249, %250, %251, %252, %253, %254, %255 in 2 : vector<2x16x64xf32>, vector<2x16x64xf32>, vector<2x16x64xf32>, vector<2x16x64xf32>, vector<2x16x64xf32>, vector<2x16x64xf32>, vector<2x16x64xf32>, vector<2x16x64xf32>, vector<2x16x64xf32>, vector<2x16x64xf32>, vector<2x16x64xf32> -> vector<2x16x704xf32>
    %257 = vector.shape_cast %256 : vector<2x16x704xf32> to vector<32x704xf32>
    %c0_297 = arith.constant 0 : index
    %c1088 = arith.constant 1088 : index
    %c0_298 = arith.constant 0 : index
    %258 = vector.load %arg5[%c0_297, %c1088, %c0_298] : memref<1x1792x16xbf16, #tpu.memory_space<vmem>>, vector<1x704x16xbf16>
    %259 = vector.shape_cast %258 : vector<1x704x16xbf16> to vector<704x16xbf16>
    %260 = arith.extf %259 : vector<704x16xbf16> to vector<704x16xf32>
    %cst_299 = arith.constant dense<0.000000e+00> : vector<32x16xf32>
    %261 = tpu.matmul %257, %260, %cst_299 {dimension_numbers = #tpu.dot_dimension_numbers<[1], [0], [0], [1], [0, 0, 1, 1], [], []>} : vector<32x704xf32>, vector<704x16xf32>, vector<32x16xf32> -> vector<32x16xf32>
    %c0_300 = arith.constant 0 : index
    %c3_301 = arith.constant 3 : index
    %c1_302 = arith.constant 1 : index
    %c0_303 = arith.constant 0 : index
    %c0_304 = arith.constant 0 : index
    %262 = vector.load %arg7[%c0_300, %c3_301, %c1_302, %c0_303, %c0_304] : memref<1x4x2x3x128xf32, #tpu.memory_space<vmem>>, vector<1x1x1x3x128xf32>
    %263 = vector.shape_cast %262 : vector<1x1x1x3x128xf32> to vector<3x128xf32>
    %264 = vector.extract_strided_slice %263 {offsets = [0, 0], sizes = [3, 16], strides = [1, 1]} : vector<3x128xf32> to vector<3x16xf32>
    %265 = vector.extract_strided_slice %264 {offsets = [0, 0], sizes = [1, 16], strides = [1, 1]} : vector<3x16xf32> to vector<1x16xf32>
    %266 = vector.broadcast %265 : vector<1x16xf32> to vector<32x16xf32>
    %267 = arith.addf %261, %266 : vector<32x16xf32>
    %cst_305 = arith.constant 0.000000e+00 : f32
    %268 = vector.broadcast %cst_305 : f32 to vector<32x16xf32>
    %269 = arith.maximumf %267, %268 : vector<32x16xf32>
    %270 = vector.extract_strided_slice %264 {offsets = [1, 0], sizes = [1, 16], strides = [1, 1]} : vector<3x16xf32> to vector<1x16xf32>
    %271 = vector.broadcast %270 : vector<1x16xf32> to vector<32x16xf32>
    %272 = arith.mulf %269, %271 : vector<32x16xf32>
    %273 = vector.extract_strided_slice %264 {offsets = [2, 0], sizes = [1, 16], strides = [1, 1]} : vector<3x16xf32> to vector<1x16xf32>
    %274 = vector.broadcast %273 : vector<1x16xf32> to vector<32x16xf32>
    %275 = arith.addf %272, %274 : vector<32x16xf32>
    %276 = vector.shape_cast %275 : vector<32x16xf32> to vector<2x16x16xf32>
    %277 = arith.addf %208, %276 : vector<2x16x16xf32>
    %c0_306 = arith.constant 0 : index
    %c0_307 = arith.constant 0 : index
    %c0_308 = arith.constant 0 : index
    %278 = vector.load %arg8[%c0_306, %c0_307, %c0_308] : memref<1x16x16xf32, #tpu.memory_space<vmem>>, vector<1x16x16xf32>
    %279 = vector.shape_cast %278 : vector<1x16x16xf32> to vector<16x16xf32>
    %280 = vector.shape_cast %279 : vector<16x16xf32> to vector<1x16x16xf32>
    %281 = vector.broadcast %280 : vector<1x16x16xf32> to vector<2x16x16xf32>
    %282 = arith.mulf %277, %281 : vector<2x16x16xf32>
    %cst_309 = arith.constant dense<0.000000e+00> : vector<2x16xf32>
    %283 = vector.multi_reduction <add>, %282, %cst_309 [2] : vector<2x16x16xf32> to vector<2x16xf32>
    %cst_310 = arith.constant dense<0.000000e+00> : vector<2xf32>
    %284 = vector.multi_reduction <add>, %283, %cst_310 [1] : vector<2x16xf32> to vector<2xf32>
    %285 = vector.shape_cast %284 : vector<2xf32> to vector<2x1xf32>
    %c0_311 = arith.constant 0 : index
    %c0_312 = arith.constant 0 : index
    %c0_313 = arith.constant 0 : index
    %286 = vector.load %arg9[%c0_311, %c0_312, %c0_313] : memref<1x2x1xf32, #tpu.memory_space<vmem>>, vector<1x2x1xf32>
    %287 = vector.shape_cast %286 : vector<1x2x1xf32> to vector<2x1xf32>
    %288 = vector.shape_cast %285 : vector<2x1xf32> to vector<1x2x1xf32>
    tpu.vector_store %arg9[%c0_311, %c0_312, %c0_313], %288 {strides = array<i32>} : memref<1x2x1xf32, #tpu.memory_space<vmem>>, vector<1x2x1xf32>,
    return
  }
  func.func @transform_0(%arg0: i32, %arg1: i32) -> (i32, i32, i32, i32) {
    %c0_i32 = arith.constant 0 : i32
    %c0_i32_0 = arith.constant 0 : i32
    %c0_i32_1 = arith.constant 0 : i32
    return %arg0, %arg1, %c0_i32, %c0_i32_0 : i32, i32, i32, i32
  }
  func.func @transform_1(%arg0: i32, %arg1: i32) -> (i32, i32, i32) {
    %c0_i32 = arith.constant 0 : i32
    %c0_i32_0 = arith.constant 0 : i32
    %c0_i32_1 = arith.constant 0 : i32
    return %arg0, %c0_i32, %c0_i32_0 : i32, i32, i32
  }
  func.func @transform_2(%arg0: i32, %arg1: i32) -> (i32, i32, i32) {
    %c0_i32 = arith.constant 0 : i32
    %c0_i32_0 = arith.constant 0 : i32
    %c0_i32_1 = arith.constant 0 : i32
    return %arg0, %c0_i32, %c0_i32_0 : i32, i32, i32
  }
  func.func @transform_3(%arg0: i32, %arg1: i32) -> (i32, i32, i32) {
    %c0_i32 = arith.constant 0 : i32
    %c0_i32_0 = arith.constant 0 : i32
    %c0_i32_1 = arith.constant 0 : i32
    return %arg0, %c0_i32, %c0_i32_0 : i32, i32, i32
  }
  func.func @transform_4(%arg0: i32, %arg1: i32) -> (i32, i32, i32) {
    %c0_i32 = arith.constant 0 : i32
    %c0_i32_0 = arith.constant 0 : i32
    %c0_i32_1 = arith.constant 0 : i32
    return %arg0, %c0_i32, %c0_i32_0 : i32, i32, i32
  }
  func.func @transform_5(%arg0: i32, %arg1: i32) -> (i32, i32, i32, i32, i32) {
    %c0_i32 = arith.constant 0 : i32
    %c0_i32_0 = arith.constant 0 : i32
    %c0_i32_1 = arith.constant 0 : i32
    %c0_i32_2 = arith.constant 0 : i32
    %c0_i32_3 = arith.constant 0 : i32
    return %arg0, %c0_i32, %c0_i32_0, %c0_i32_1, %c0_i32_2 : i32, i32, i32, i32, i32
  }
  func.func @transform_6(%arg0: i32, %arg1: i32) -> (i32, i32, i32) {
    %c0_i32 = arith.constant 0 : i32
    %c0_i32_0 = arith.constant 0 : i32
    %c0_i32_1 = arith.constant 0 : i32
    return %arg0, %c0_i32, %c0_i32_0 : i32, i32, i32
  }
  func.func @transform_7(%arg0: i32, %arg1: i32) -> (i32, i32, i32) {
    %c0_i32 = arith.constant 0 : i32
    %c0_i32_0 = arith.constant 0 : i32
    return %arg0, %arg1, %c0_i32 : i32, i32, i32
  }
}

</mosaic_0001>

<bundles_post_ra>
// kernel: tpu_custom_call.1
= control target key start
LH: loop header
LB: loop body
LE: loop exit
PB: predicated region body
PF: predicated region fallthrough
CT: control target
= control target key end

     0   :  { %s10866_s24 = smov 0   ;;  %s10868_s25 = smov 0   ;;  %s12040_s0 = inlined_call_operand.vmem [shape: f32[2,2,16,64], index: 0, kind: input, shape index: {}]   ;;  %s12041_s1 = inlined_call_operand.vmem [shape: bf16[2,704,512], index: 1, kind: input, shape index: {}]   ;;  %s12042_s2 = inlined_call_operand.vmem [shape: bf16[2,3584,64], index: 2, kind: input, shape index: {}]   ;;  %s12043_s3 = inlined_call_operand.vmem [shape: bf16[2,1792,16], index: 3, kind: input, shape index: {}]   ;;  %s12044_s4 = inlined_call_operand.vmem [shape: f32[2,3,512], index: 4, kind: input, shape index: {}]   ;;  %s12045_s5 = inlined_call_operand.vmem [shape: f32[2,4,2,3,128], index: 5, kind: input, shape index: {}]   ;;  %s12046_s6 = inlined_call_operand.vmem [shape: f32[2,16,16], index: 6, kind: input, shape index: {}]   ;;  %s12047_s7 = inlined_call_operand.vmem [shape: f32[2,2,1], index: 7, kind: output, shape index: {}]  }
   0x1   :  { %s10870_s26 = smov 0  }
   0x2 LB: > { %s29_s27 = sadd.s32 1, %s10817_s25  ;;  %p6237_p0 = scmp.ge.s32.totalorder %s10821_s26, 1  ;;  %s10821_s26 = sphi %s10870_s26, %s17_s26   ;;  %s10817_s25 = sphi %s10868_s25, %s12049_s25   ;;  %s10813_s24 = sphi %s10866_s24, %s12048_s24  }
   0x3   : > { %p31_p1 = scmp.ge.s32.totalorder %s29_s27, 2  ;;  %p319_p2 = scmp.lt.s32.totalorder %s10821_s26, 3 }
   0x5   : > { %s12051_s27 = smov (%p31_p1, %s29_s27), 0  ;;  %p320_p3 = pnand %p6237_p0, %p319_p2 }
   0x6   : > { %p389_p4 = scmp.lt.s32.totalorder (!%p320_p3), %s10813_s24, 1  ;;  %v10823_v0 = vmov (!%p320_p3), 0.0   ;;  %vm448_vm0 = vcmask (!%p320_p3), 523264   ;;  %s10824_s13 = smov (!%p320_p3), 64   ;;  %vm6033_vm1 = vcmask (!%p320_p3), 130048   ;;  %vm6061_vm2 = vcmask (!%p320_p3), 130112  }
   0x7   : > { %323 = sbr.rel (%p320_p3) target bundleno = 2687 (0xa7f), region = 48  ;;  %436 = vst [vmem:[#allocation2] sm:$0xff] (!%p320_p3), %v10823_v0  ;;  %437 = vst [vmem:[#allocation2 + $0x8] sm:$0xff] (!%p320_p3), %v10823_v0  ;;  %vm6072_vm3 = vcmask (!%p320_p3), 1041409   ;;  %vm6075_vm4 = vcmask (!%p320_p3), 123904   ;;  %vm6079_vm5 = vcmask (!%p320_p3), 1024  }
   0x8   : > { %438 = vst [vmem:[#allocation2 + $0x10] sm:$0xff] (!%p320_p3), %v10823_v0  ;;  %442 = vst [vmem:[#allocation2 + $0x30] sm:$0xff] (!%p320_p3), %v10823_v0 }
   0x9   : > { %439 = vst [vmem:[#allocation2 + $0x18] sm:$0x3] (!%p320_p3), %v10823_v0  ;;  %440 = vst [vmem:[#allocation2 + $0x20] sm:$0xff] (!%p320_p3), %v10823_v0 }
   0xa   : > { %441 = vst [vmem:[#allocation2 + $0x28] sm:$0xff] (!%p320_p3), %v10823_v0  ;;  %443 = vst [vmem:[#allocation2 + $0x38] sm:$0x3] (!%p320_p3), %v10823_v0 }
   0xe   : > { %s12053_s24 = smov (!%p389_p4, %s10813_s24), 1 }
   0xf   : > { %s6283_s28 = sshll.u32 %s12053_s24, 5  ;;  %s10365_s29 = smul.u32 1408, %s12053_s24 }
  0x10   : > { %s397_s9 = scalar_lea.vmem %s12040_s0, %s6283_s28  ;;  %s10366_s14 = smul.u32 1792, %s12053_s24 }
  0x11   : > { %s10896_s12 = scalar_lea.vmem %s12041_s1, %s10365_s29  ;;  %v444_v1 = vld [vmem:[%s397_s9] sm:$0xff]  ;;  %v445_v2 = vld [vmem:[%s397_s9 + $0x8] sm:$0xff]  ;;  %v446_v3 = vld [vmem:[%s397_s9 + $0x10] sm:$0xff]  ;;  %s6284_s18 = sshll.u32 %s12053_s24, 4 }
  0x12   : > { %449 = vst.msk [vmem:[#allocation2 + $0x5] sm:$0xff] %vm448_vm0, %v444_v1  ;;  %450 = vst.msk [vmem:[#allocation2 + $0xd] sm:$0xff] %vm448_vm0, %v445_v2  ;;  %v10535_v4 = vld [vmem:[%s10896_s12 + $0x4] ss:$16 sps:$4 sm:$0xff]   ;;  %v10537_v5 = vld [vmem:[%s10896_s12 + $0xc] ss:$16 sps:$4 sm:$0xff]   ;;  %s11128_s17 = scalar_lea.vmem %s12042_s2, %s10366_s14  ;;  %s11166_s21 = scalar_lea.vmem %s12044_s4, %s6284_s18 }
  0x13   : > { %451 = vst.msk [vmem:[#allocation2 + $0x25] sm:$0xff] %vm448_vm0, %v446_v3  ;;  %9014 = vmatprep.subr.bf16.mxu0 %v10535_v4  ;;  %v10539_v6 = vld [vmem:[%s10896_s12] ss:$16 sps:$4 sm:$0xff]   ;;  %v10540_v7 = vld [vmem:[%s10896_s12 + $0x8] ss:$16 sps:$4 sm:$0xff]   ;;  %9190 = vmatprep.subr.bf16.mxu1 %v10537_v5  ;;  %s10367_s22 = smul.u32 896, %s12053_s24  ;;  %s11294_s10 = scalar_lea.vmem %s12045_s5, %s6283_s28 }
  0x14   : > { %v447_v8 = vld [vmem:[%s397_s9 + $0x18] sm:$0xff]  ;;  %v10541_v9 = vld [vmem:[%s10896_s12 + $0x24] ss:$16 sps:$4 sm:$0xff]   ;;  %9016 = vmatpush1.bf16.msra.mxu0 %v10539_v6  ;;  %9192 = vmatpush1.bf16.msra.mxu1 %v10540_v7  ;;  %v10545_v11 = vld [vmem:[%s10896_s12 + $0x20] ss:$16 sps:$4 sm:$0xff]  }
  0x15   : > { %452 = vst.msk [vmem:[#allocation2 + $0x2d] sm:$0xff] %vm448_vm0, %v447_v8  ;;  %v10543_v10 = vld [vmem:[%s10896_s12 + $0x2c] ss:$16 sps:$4 sm:$0xff]   ;;  %9018 = vmatprep.subr.bf16.mxu0 %v10541_v9  ;;  %v10546_v12 = vld [vmem:[%s10896_s12 + $0x28] ss:$16 sps:$4 sm:$0xff]   ;;  %s11265_s30 = scalar_lea.vmem %s12043_s3, %s10367_s22 }
  0x16   : > { %9194 = vmatprep.subr.bf16.mxu1 %v10543_v10  ;;  %v10547_v13 = vld [vmem:[%s10896_s12 + $0x44] ss:$16 sps:$4 sm:$0xff]   ;;  %v10549_v22 = vld [vmem:[%s10896_s12 + $0x4c] ss:$16 sps:$4 sm:$0xff]   ;;  %v10551_v23 = vld [vmem:[%s10896_s12 + $0x40] ss:$16 sps:$4 sm:$0xff]  }
  0x17   : > { %v10552_v27 = vld [vmem:[%s10896_s12 + $0x48] ss:$16 sps:$4 sm:$0xff]   ;;  %v10553_v31 = vld [vmem:[%s10896_s12 + $0x64] ss:$16 sps:$4 sm:$0xff]   ;;  %v10555_v32 = vld [vmem:[%s10896_s12 + $0x6c] ss:$16 sps:$4 sm:$0xff]  }
  0x18   : > { %9020 = vmatpush1.bf16.msra.mxu0 %v10545_v11  ;;  %9196 = vmatpush1.bf16.msra.mxu1 %v10546_v12  ;;  %v10557_v33 = vld [vmem:[%s10896_s12 + $0x60] ss:$16 sps:$4 sm:$0xff]   ;;  %v10558_v35 = vld [vmem:[%s10896_s12 + $0x68] ss:$16 sps:$4 sm:$0xff]   ;;  %v10559_v36 = vld [vmem:[%s10896_s12 + $0x84] ss:$16 sps:$4 sm:$0xff]  }
  0x19   : > { %v457_v14 = vld [vmem:[#allocation2 + $0x1] sm:$0xff]  ;;  %v458_v16 = vld [vmem:[#allocation2 + $0x9] sm:$0xff]  ;;  %9022 = vmatprep.subr.bf16.mxu0 %v10547_v13  ;;  %9198 = vmatprep.subr.bf16.mxu1 %v10549_v22 }
  0x1a   : > { %v465_v15 = vld [vmem:[#allocation2 + $0x3] sm:$0xff]  ;;  %v466_v18 = vld [vmem:[#allocation2 + $0xb] sm:$0xff] }
  0x1b   : > { %v10395_v17 = vpack.i.bf16 %v457_v14, %v465_v15  ;;  %v459_v19 = vld [vmem:[#allocation2 + $0x21] sm:$0xff]  ;;  %v10400_v24 = vpack.i.bf16 %v458_v16, %v466_v18  ;;  %v10561_v37 = vld [vmem:[%s10896_s12 + $0x8c] ss:$16 sps:$4 sm:$0xff]  }
  0x1c   : > { %v467_v20 = vld [vmem:[#allocation2 + $0x23] sm:$0xff]  ;;  %v468_v26 = vld [vmem:[#allocation2 + $0x2b] sm:$0xff]  ;;  %9024 = vmatpush1.bf16.msra.mxu0 %v10551_v23  ;;  %9200 = vmatpush1.bf16.msra.mxu1 %v10552_v27 }
  0x1d   : > { %v10405_v21 = vpack.i.bf16 %v459_v19, %v467_v20  ;;  %10396 = vrot.lane.b32.xlu0 %v10395_v17, %s10824_s13  ;;  %v460_v25 = vld [vmem:[#allocation2 + $0x29] sm:$0xff]  ;;  %9026 = vmatprep.subr.bf16.mxu0 %v10553_v31  ;;  %v10565_v40 = vld [vmem:[%s10896_s12 + $0xa4] ss:$16 sps:$4 sm:$0xff]  }
  0x1e   : > { %v10410_v28 = vpack.i.bf16 %v460_v25, %v468_v26  ;;  %v473_v29 = vld [vmem:[#allocation2 + $0x5] sm:$0xff]  ;;  %9202 = vmatprep.subr.bf16.mxu1 %v10555_v32  ;;  %v10563_v38 = vld [vmem:[%s10896_s12 + $0x80] ss:$16 sps:$4 sm:$0xff]  }
  0x1f   : > { %10406 = vrot.lane.b32.xlu1 %v10405_v21, %s10824_s13  ;;  %v481_v30 = vld [vmem:[#allocation2 + $0x7] sm:$0xff]  ;;  %v10569_v42 = vld [vmem:[%s10896_s12 + $0xa0] ss:$16 sps:$4 sm:$0xff]  }
  0x20   : > { %v10415_v34 = vpack.i.bf16 %v473_v29, %v481_v30  ;;  %9028 = vmatpush1.bf16.msra.mxu0 %v10557_v33  ;;  %9204 = vmatpush1.bf16.msra.mxu1 %v10558_v35  ;;  %v10564_v39 = vld [vmem:[%s10896_s12 + $0x88] ss:$16 sps:$4 sm:$0xff]   ;;  %v10567_v41 = vld [vmem:[%s10896_s12 + $0xac] ss:$16 sps:$4 sm:$0xff]   ;;  %v10571_v44 = vld [vmem:[%s10896_s12 + $0xc4] ss:$16 sps:$4 sm:$0xff]  }
  0x21   : > { %10401 = vrot.lane.b32.xlu0 %v10400_v24, %s10824_s13  ;;  %9030 = vmatprep.subr.bf16.mxu0 %v10559_v36  ;;  %v10570_v43 = vld [vmem:[%s10896_s12 + $0xa8] ss:$16 sps:$4 sm:$0xff]   ;;  %v10573_v45 = vld [vmem:[%s10896_s12 + $0xcc] ss:$16 sps:$4 sm:$0xff]   ;;  %v10575_v46 = vld [vmem:[%s10896_s12 + $0xc0] ss:$16 sps:$4 sm:$0xff]  }
  0x22   : > { %9206 = vmatprep.subr.bf16.mxu1 %v10561_v37  ;;  %v10576_v47 = vld [vmem:[%s10896_s12 + $0xc8] ss:$16 sps:$4 sm:$0xff]   ;;  %v10577_v48 = vld [vmem:[%s10896_s12 + $0xe4] ss:$16 sps:$4 sm:$0xff]   ;;  %v10579_v49 = vld [vmem:[%s10896_s12 + $0xec] ss:$16 sps:$4 sm:$0xff]  }
  0x23   : > { %10411 = vrot.lane.b32.xlu1 %v10410_v28, %s10824_s13  ;;  %v10581_v50 = vld [vmem:[%s10896_s12 + $0xe0] ss:$16 sps:$4 sm:$0xff]   ;;  %v10582_v51 = vld [vmem:[%s10896_s12 + $0xe8] ss:$16 sps:$4 sm:$0xff]   ;;  %v10583_v52 = vld [vmem:[%s10896_s12 + $0x104] ss:$16 sps:$4 sm:$0xff]  }
  0x24   : > { %9032 = vmatpush1.bf16.msra.mxu0 %v10563_v38  ;;  %9208 = vmatpush1.bf16.msra.mxu1 %v10564_v39  ;;  %v10585_v53 = vld [vmem:[%s10896_s12 + $0x10c] ss:$16 sps:$4 sm:$0xff]   ;;  %v10587_v54 = vld [vmem:[%s10896_s12 + $0x100] ss:$16 sps:$4 sm:$0xff]   ;;  %v10588_v55 = vld [vmem:[%s10896_s12 + $0x108] ss:$16 sps:$4 sm:$0xff]  }
  0x25   : > { %10416 = vrot.lane.b32.xlu0 %v10415_v34, %s10824_s13  ;;  %9034 = vmatprep.subr.bf16.mxu0 %v10565_v40  ;;  %v10589_v56 = vld [vmem:[%s10896_s12 + $0x124] ss:$16 sps:$4 sm:$0xff]   ;;  %v10591_v57 = vld [vmem:[%s10896_s12 + $0x12c] ss:$16 sps:$4 sm:$0xff]   ;;  %v10593_v58 = vld [vmem:[%s10896_s12 + $0x120] ss:$16 sps:$4 sm:$0xff]  }
  0x26   : > { %9210 = vmatprep.subr.bf16.mxu1 %v10567_v41  ;;  %v10594_v59 = vld [vmem:[%s10896_s12 + $0x128] ss:$16 sps:$4 sm:$0xff]   ;;  %v474_v60 = vld [vmem:[#allocation2 + $0xd] sm:$0xff]  ;;  %v453_v35 = vld [vmem:[#allocation2] sm:$0xff] }
  0x27   : > { %v482_v61 = vld [vmem:[#allocation2 + $0xf] sm:$0xff]  ;;  %v475_v1 = vld [vmem:[#allocation2 + $0x25] sm:$0xff] }
  0x28   : > { %9036 = vmatpush1.bf16.msra.mxu0 %v10569_v42  ;;  %9212 = vmatpush1.bf16.msra.mxu1 %v10570_v43  ;;  %v10595_v62 = vld [vmem:[%s10896_s12 + $0x144] ss:$16 sps:$4 sm:$0xff]   ;;  %v10420_v63 = vpack.i.bf16 %v474_v60, %v482_v61  ;;  %v10597_v0 = vld [vmem:[%s10896_s12 + $0x14c] ss:$16 sps:$4 sm:$0xff]   ;;  %v10599_v3 = vld [vmem:[%s10896_s12 + $0x140] ss:$16 sps:$4 sm:$0xff]  }
  0x29   : > { %9038 = vmatprep.subr.bf16.mxu0 %v10571_v44  ;;  %9214 = vmatprep.subr.bf16.mxu1 %v10573_v45  ;;  %v483_v2 = vld [vmem:[#allocation2 + $0x27] sm:$0xff]  ;;  %v484_v9 = vld [vmem:[#allocation2 + $0x2f] sm:$0xff] }
  0x2a   : > { %10421 = vrot.lane.b32.xlu1 %v10420_v63, %s10824_s13  ;;  %v10600_v4 = vld [vmem:[%s10896_s12 + $0x148] ss:$16 sps:$4 sm:$0xff]   ;;  %v10425_v5 = vpack.i.bf16 %v475_v1, %v483_v2  ;;  %v10601_v6 = vld [vmem:[%s10896_s12 + $0x164] ss:$16 sps:$4 sm:$0xff]   ;;  %v10603_v7 = vld [vmem:[%s10896_s12 + $0x16c] ss:$16 sps:$4 sm:$0xff]  }
  0x2b   : > { %v476_v8 = vld [vmem:[#allocation2 + $0x2d] sm:$0xff]  ;;  %v10606_v12 = vld [vmem:[%s10896_s12 + $0x168] ss:$16 sps:$4 sm:$0xff]   ;;  %v455_v60 = vld [vmem:[#allocation2 + $0x20] sm:$0xff] }
  0x2c   : > { %9040 = vmatpush1.bf16.msra.mxu0 %v10575_v46  ;;  %9216 = vmatpush1.bf16.msra.mxu1 %v10576_v47  ;;  %v10605_v10 = vld [vmem:[%s10896_s12 + $0x160] ss:$16 sps:$4 sm:$0xff]   ;;  %v10430_v11 = vpack.i.bf16 %v476_v8, %v484_v9  ;;  %v10607_v13 = vld [vmem:[%s10896_s12 + $0x184] ss:$16 sps:$4 sm:$0xff]   ;;  %v10609_v14 = vld [vmem:[%s10896_s12 + $0x18c] ss:$16 sps:$4 sm:$0xff]  }
  0x2d   : > { %9042 = vmatprep.subr.bf16.mxu0 %v10577_v48  ;;  %9218 = vmatprep.subr.bf16.mxu1 %v10579_v49  ;;  %v10611_v15 = vld [vmem:[%s10896_s12 + $0x180] ss:$16 sps:$4 sm:$0xff]   ;;  %v10612_v16 = vld [vmem:[%s10896_s12 + $0x188] ss:$16 sps:$4 sm:$0xff]   ;;  %v10613_v17 = vld [vmem:[%s10896_s12 + $0x1a4] ss:$16 sps:$4 sm:$0xff]  }
  0x2e   : > { %10426 = vrot.lane.b32.xlu0 %v10425_v5, %s10824_s13  ;;  %10431 = vrot.lane.b32.xlu1 %v10430_v11, %s10824_s13  ;;  %v10615_v18 = vld [vmem:[%s10896_s12 + $0x1ac] ss:$16 sps:$4 sm:$0xff]   ;;  %v10617_v19 = vld [vmem:[%s10896_s12 + $0x1a0] ss:$16 sps:$4 sm:$0xff]  }
  0x2f   : > { %v10618_v20 = vld [vmem:[%s10896_s12 + $0x1a8] ss:$16 sps:$4 sm:$0xff]   ;;  %v10619_v22 = vld [vmem:[%s10896_s12 + $0x1c4] ss:$16 sps:$4 sm:$0xff]   ;;  %v10621_v23 = vld [vmem:[%s10896_s12 + $0x1cc] ss:$16 sps:$4 sm:$0xff]  }
  0x30   : > { %9044 = vmatpush1.bf16.msra.mxu0 %v10581_v50  ;;  %9220 = vmatpush1.bf16.msra.mxu1 %v10582_v51  ;;  %v487_v21 = vld [vmem:[#allocation2 + $0x11] sm:$0xff]  ;;  %v10627_v28 = vld [vmem:[%s10896_s12 + $0x1ec] ss:$16 sps:$4 sm:$0xff]   ;;  %v461_v33 = vld [vmem:[#allocation2 + $0x2] sm:$0xff] }
  0x31   : > { %9046 = vmatprep.subr.bf16.mxu0 %v10583_v52  ;;  %9222 = vmatprep.subr.bf16.mxu1 %v10585_v53  ;;  %v488_v24 = vld [vmem:[#allocation2 + $0x31] sm:$0xff]  ;;  %v10634_v32 = vld [vmem:[%s10896_s12 + $0x20c] ss:$16 sps:$4 sm:$0xff]  }
  0x32   : > { %559 = vrot.lane.b32.xlu0 %v487_v21, %s10824_s13  ;;  %v10623_v25 = vld [vmem:[%s10896_s12 + $0x1c0] ss:$16 sps:$4 sm:$0xff]   ;;  %561 = vrot.lane.b32.xlu1 %v488_v24, %s10824_s13  ;;  %v10624_v26 = vld [vmem:[%s10896_s12 + $0x1c8] ss:$16 sps:$4 sm:$0xff]  }
  0x33   : > { %v10625_v27 = vld [vmem:[%s10896_s12 + $0x1e4] ss:$16 sps:$4 sm:$0xff]   ;;  %v10629_v29 = vld [vmem:[%s10896_s12 + $0x1e0] ss:$16 sps:$4 sm:$0xff]   ;;  %v10630_v30 = vld [vmem:[%s10896_s12 + $0x1e8] ss:$16 sps:$4 sm:$0xff]  }
  0x34   : > { %9048 = vmatpush1.bf16.msra.mxu0 %v10587_v54  ;;  %9224 = vmatpush1.bf16.msra.mxu1 %v10588_v55  ;;  %v10631_v31 = vld [vmem:[%s10896_s12 + $0x204] ss:$16 sps:$4 sm:$0xff]   ;;  %v10633_v38 = vld [vmem:[%s10896_s12 + $0x200] ss:$16 sps:$4 sm:$0xff]   ;;  %v10636_v40 = vld [vmem:[%s10896_s12 + $0x208] ss:$16 sps:$4 sm:$0xff]  }
  0x35   : > { %9050 = vmatprep.subr.bf16.mxu0 %v10589_v56  ;;  %9226 = vmatprep.subr.bf16.mxu1 %v10591_v57  ;;  %v10637_v43 = vld [vmem:[%s10896_s12 + $0x224] ss:$16 sps:$4 sm:$0xff]   ;;  %v10640_v44 = vld [vmem:[%s10896_s12 + $0x22c] ss:$16 sps:$4 sm:$0xff]   ;;  %v10639_v51 = vld [vmem:[%s10896_s12 + $0x220] ss:$16 sps:$4 sm:$0xff]  }
  0x36   : > { %v10984_v46 = vld [vmem:[#allocation2 + $0xa] sm:$0xff]  ;;  %v463_v55 = vld [vmem:[#allocation2 + $0x22] sm:$0xff] }
  0x37   : > { %v454_v47 = vld [vmem:[#allocation2 + $0x8] sm:$0xff]  ;;  %v10643_v56 = vld [vmem:[%s10896_s12 + $0x244] ss:$16 sps:$4 sm:$0xff]   ;;  %v10645_v63 = vld [vmem:[%s10896_s12 + $0x240] ss:$16 sps:$4 sm:$0xff]  }
  0x38   : > { %9052 = vmatpush1.bf16.msra.mxu0 %v10593_v58  ;;  %9228 = vmatpush1.bf16.msra.mxu1 %v10594_v59  ;;  %v10642_v52 = vld [vmem:[%s10896_s12 + $0x228] ss:$16 sps:$4 sm:$0xff]   ;;  %v10646_v57 = vld [vmem:[%s10896_s12 + $0x24c] ss:$16 sps:$4 sm:$0xff]   ;;  %v10649_v5 = vld [vmem:[%s10896_s12 + $0x264] ss:$16 sps:$4 sm:$0xff]  }
  0x39   : > { %9054 = vmatprep.subr.bf16.mxu0 %v10595_v62  ;;  %9230 = vmatprep.subr.bf16.mxu1 %v10597_v0  ;;  %v10648_v0 = vld [vmem:[%s10896_s12 + $0x248] ss:$16 sps:$4 sm:$0xff]   ;;  %v10663_v21 = vld [vmem:[%s10896_s12 + $0x2a0] ss:$16 sps:$4 sm:$0xff]   ;;  %v10670_v24 = vld [vmem:[%s10896_s12 + $0x2cc] ss:$16 sps:$4 sm:$0xff]  }
  0x3a   : > { %v10654_v11 = vld [vmem:[%s10896_s12 + $0x268] ss:$16 sps:$4 sm:$0xff]  }
  0x3c   : > { %9056 = vmatpush1.bf16.msra.mxu0 %v10599_v3  ;;  %9232 = vmatpush1.bf16.msra.mxu1 %v10600_v4  ;;  %v11003_v4 = vld [vmem:[#allocation2 + $0x2a] sm:$0xff] }
  0x3d   : > { %9058 = vmatprep.subr.bf16.mxu0 %v10601_v6  ;;  %9234 = vmatprep.subr.bf16.mxu1 %v10603_v7  ;;  %v10652_v6 = vld [vmem:[%s10896_s12 + $0x26c] ss:$16 sps:$4 sm:$0xff]  }
  0x3e   : > { %v456_v7 = vld [vmem:[#allocation2 + $0x28] sm:$0xff] }
  0x40   : > { %9060 = vmatpush1.bf16.msra.mxu0 %v10605_v10  ;;  %9236 = vmatpush1.bf16.msra.mxu1 %v10606_v12  ;;  %v10651_v10 = vld [vmem:[%s10896_s12 + $0x260] ss:$16 sps:$4 sm:$0xff]  }
  0x41   : > { %9062 = vmatprep.subr.bf16.mxu0 %v10607_v13  ;;  %9238 = vmatprep.subr.bf16.mxu1 %v10609_v14  ;;  %v477_v13 = vld [vmem:[#allocation2 + $0x6] sm:$0xff] }
  0x42   : > { %v10655_v14 = vld [vmem:[%s10896_s12 + $0x284] ss:$16 sps:$4 sm:$0xff]  }
  0x44   : > { %9064 = vmatpush1.bf16.msra.mxu0 %v10611_v15  ;;  %9240 = vmatpush1.bf16.msra.mxu1 %v10612_v16  ;;  %v10658_v15 = vld [vmem:[%s10896_s12 + $0x28c] ss:$16 sps:$4 sm:$0xff]  }
  0x45   : > { %9066 = vmatprep.subr.bf16.mxu0 %v10613_v17  ;;  %9242 = vmatprep.subr.bf16.mxu1 %v10615_v18  ;;  %v10657_v17 = vld [vmem:[%s10896_s12 + $0x280] ss:$16 sps:$4 sm:$0xff]   ;;  %v10660_v18 = vld [vmem:[%s10896_s12 + $0x288] ss:$16 sps:$4 sm:$0xff]  }
  0x48   : > { %9068 = vmatpush1.bf16.msra.mxu0 %v10617_v19  ;;  %9244 = vmatpush1.bf16.msra.mxu1 %v10618_v20  ;;  %v10661_v19 = vld [vmem:[%s10896_s12 + $0x2a4] ss:$16 sps:$4 sm:$0xff]   ;;  %v10664_v20 = vld [vmem:[%s10896_s12 + $0x2ac] ss:$16 sps:$4 sm:$0xff]  }
  0x49   : > { %9070 = vmatprep.subr.bf16.mxu0 %v10619_v22  ;;  %9246 = vmatprep.subr.bf16.mxu1 %v10621_v23  ;;  %v10666_v22 = vld [vmem:[%s10896_s12 + $0x2a8] ss:$16 sps:$4 sm:$0xff]   ;;  %v10667_v23 = vld [vmem:[%s10896_s12 + $0x2c4] ss:$16 sps:$4 sm:$0xff]  }
  0x4c   : > { %9072 = vmatpush1.bf16.msra.mxu0 %v10623_v25  ;;  %9248 = vmatpush1.bf16.msra.mxu1 %v10624_v26  ;;  %v10669_v25 = vld [vmem:[%s10896_s12 + $0x2c0] ss:$16 sps:$4 sm:$0xff]   ;;  %v10672_v26 = vld [vmem:[%s10896_s12 + $0x2c8] ss:$16 sps:$4 sm:$0xff]  }
  0x4d   : > { %9074 = vmatprep.subr.bf16.mxu0 %v10625_v27  ;;  %9250 = vmatprep.subr.bf16.mxu1 %v10627_v28  ;;  %v10673_v27 = vld [vmem:[%s10896_s12 + $0x2e4] ss:$16 sps:$4 sm:$0xff]   ;;  %v10676_v28 = vld [vmem:[%s10896_s12 + $0x2ec] ss:$16 sps:$4 sm:$0xff]  }
  0x50   : > { %9076 = vmatpush1.bf16.msra.mxu0 %v10629_v29  ;;  %9252 = vmatpush1.bf16.msra.mxu1 %v10630_v30  ;;  %v10675_v29 = vld [vmem:[%s10896_s12 + $0x2e0] ss:$16 sps:$4 sm:$0xff]   ;;  %v10678_v30 = vld [vmem:[%s10896_s12 + $0x2e8] ss:$16 sps:$4 sm:$0xff]  }
  0x51   : > { %9078 = vmatprep.subr.bf16.mxu0 %v10631_v31  ;;  %9254 = vmatprep.subr.bf16.mxu1 %v10634_v32  ;;  %v10679_v31 = vld [vmem:[%s10896_s12 + $0x304] ss:$16 sps:$4 sm:$0xff]   ;;  %v10682_v32 = vld [vmem:[%s10896_s12 + $0x30c] ss:$16 sps:$4 sm:$0xff]  }
  0x8f   : > { %v10397_v34 = vpop.permute.xlu0 %10396 }
  0x90   : > { %v10399_v36 = vunpack.i.h.bf16 %v10397_v34  ;;  %v10398_v37 = vunpack.i.l.bf16 %v10397_v34  ;;  %v10684_v34 = vld [vmem:[%s10896_s12 + $0x308] ss:$16 sps:$4 sm:$0xff]  }
  0x91   : > { %v10407_v39 = vpop.permute.xlu1 %10406 }
  0x92   : > { %v569_v41 = vsel %vm448_vm0, %v461_v33, %v10398_v37  ;;  %v565_v42 = vsel %vm448_vm0, %v453_v35, %v10399_v36  ;;  %v10408_v50 = vunpack.i.l.bf16 %v10407_v39  ;;  %v10409_v53 = vunpack.i.h.bf16 %v10407_v39  ;;  %v10681_v33 = vld [vmem:[%s10896_s12 + $0x300] ss:$16 sps:$4 sm:$0xff]   ;;  %v10685_v35 = vld [vmem:[%s10896_s12 + $0x324] ss:$16 sps:$4 sm:$0xff]   ;;  %v10688_v36 = vld [vmem:[%s10896_s12 + $0x32c] ss:$16 sps:$4 sm:$0xff]  }
  0x93   : > { %1227 = vmatprep.mubr.f32.mxu0 %v569_v41  ;;  %1494 = vmatprep.mubr.f32.mxu1 %v569_v41  ;;  %v10402_v45 = vpop.permute.xlu0 %10401  ;;  %v10687_v37 = vld [vmem:[%s10896_s12 + $0x320] ss:$16 sps:$4 sm:$0xff]   ;;  %v10691_v39 = vld [vmem:[%s10896_s12 + $0x344] ss:$16 sps:$4 sm:$0xff]  }
  0x94   : > { %1228 = vmatmul.mubr.f32.vlgmr.msra.gmra.mrb[0].mxu0 %v565_v42  ;;  %1495 = vmatmul.mubr.f32.vlgmr.msra.gmra.mrb[0].mxu1 %v565_v42  ;;  %v10404_v48 = vunpack.i.h.bf16 %v10402_v45  ;;  %v10403_v49 = vunpack.i.l.bf16 %v10402_v45  ;;  %v571_v62 = vsel %vm448_vm0, %v463_v55, %v10408_v50  ;;  %v567_v2 = vsel %vm448_vm0, %v455_v60, %v10409_v53  ;;  %v10693_v41 = vld [vmem:[%s10896_s12 + $0x340] ss:$16 sps:$4 sm:$0xff]   ;;  %v10696_v42 = vld [vmem:[%s10896_s12 + $0x348] ss:$16 sps:$4 sm:$0xff]   ;;  %v10712_v53 = vld [vmem:[%s10896_s12 + $0x3ac] ss:$16 sps:$4 sm:$0xff]  }
  0x95   : > { %9080 = vmatpush1.bf16.msra.mxu0 %v10633_v38  ;;  %9256 = vmatpush1.bf16.msra.mxu1 %v10636_v40  ;;  %v10412_v54 = vpop.permute.xlu1 %10411  ;;  %v10690_v38 = vld [vmem:[%s10896_s12 + $0x328] ss:$16 sps:$4 sm:$0xff]   ;;  %v10694_v40 = vld [vmem:[%s10896_s12 + $0x34c] ss:$16 sps:$4 sm:$0xff]   ;;  %v10699_v45 = vld [vmem:[%s10896_s12 + $0x360] ss:$16 sps:$4 sm:$0xff]  }
  0x96   : > { %9082 = vmatprep.subr.bf16.mxu0 %v10637_v43  ;;  %9258 = vmatprep.subr.bf16.mxu1 %v10640_v44  ;;  %v570_v58 = vsel %vm448_vm0, %v10984_v46, %v10403_v49  ;;  %v10993_v59 = vsel %vm448_vm0, %v454_v47, %v10404_v48  ;;  %v10413_v61 = vunpack.i.l.bf16 %v10412_v54  ;;  %v10414_v1 = vunpack.i.h.bf16 %v10412_v54  ;;  %v10697_v43 = vld [vmem:[%s10896_s12 + $0x364] ss:$16 sps:$4 sm:$0xff]   ;;  %v10700_v44 = vld [vmem:[%s10896_s12 + $0x36c] ss:$16 sps:$4 sm:$0xff]   ;;  %v10702_v47 = vld [vmem:[%s10896_s12 + $0x368] ss:$16 sps:$4 sm:$0xff]  }
  0x97   : > { %1233 = vmatprep.mubr.f32.mxu0 %v570_v58  ;;  %1500 = vmatprep.mubr.f32.mxu1 %v570_v58  ;;  %v11001_v3 = vpop.permute.xlu0 %10416  ;;  %v10703_v48 = vld [vmem:[%s10896_s12 + $0x384] ss:$16 sps:$4 sm:$0xff]   ;;  %v10706_v49 = vld [vmem:[%s10896_s12 + $0x38c] ss:$16 sps:$4 sm:$0xff]   ;;  %v10705_v50 = vld [vmem:[%s10896_s12 + $0x380] ss:$16 sps:$4 sm:$0xff]  }
  0x98   : > { %1234 = vmatmul.mubr.f32.gmra.mrb[2].mxu0 %v10993_v59  ;;  %1501 = vmatmul.mubr.f32.gmra.mrb[2].mxu1 %v10993_v59  ;;  %v10418_v8 = vunpack.i.l.bf16 %v11001_v3  ;;  %v572_v9 = vsel %vm448_vm0, %v11003_v4, %v10413_v61  ;;  %v11013_v12 = vsel %vm448_vm0, %v456_v7, %v10414_v1  ;;  %v10711_v54 = vld [vmem:[%s10896_s12 + $0x3a0] ss:$16 sps:$4 sm:$0xff]   ;;  %v10714_v55 = vld [vmem:[%s10896_s12 + $0x3a8] ss:$16 sps:$4 sm:$0xff]   ;;  %v10721_v61 = vld [vmem:[%s10896_s12 + $0x3e4] ss:$16 sps:$4 sm:$0xff]  }
  0x99   : > { %9084 = vmatpush1.bf16.msra.mxu0 %v10639_v51  ;;  %9260 = vmatpush1.bf16.msra.mxu1 %v10642_v52  ;;  %v10708_v51 = vld [vmem:[%s10896_s12 + $0x388] ss:$16 sps:$4 sm:$0xff]   ;;  %v10709_v52 = vld [vmem:[%s10896_s12 + $0x3a4] ss:$16 sps:$4 sm:$0xff]   ;;  %v10717_v58 = vld [vmem:[%s10896_s12 + $0x3c0] ss:$16 sps:$4 sm:$0xff]  }
  0x9a   : > { %9086 = vmatprep.subr.bf16.mxu0 %v10643_v56  ;;  %9262 = vmatprep.subr.bf16.mxu1 %v10646_v57  ;;  %v577_v16 = vsel %vm448_vm0, %v477_v13, %v10418_v8  ;;  %v10715_v56 = vld [vmem:[%s10896_s12 + $0x3c4] ss:$16 sps:$4 sm:$0xff]   ;;  %v10718_v57 = vld [vmem:[%s10896_s12 + $0x3cc] ss:$16 sps:$4 sm:$0xff]   ;;  %v10720_v60 = vld [vmem:[%s10896_s12 + $0x3c8] ss:$16 sps:$4 sm:$0xff]  }
  0x9b   : > { %1239 = vmatprep.mubr.f32.mxu0 %v571_v62  ;;  %1506 = vmatprep.mubr.f32.mxu1 %v571_v62  ;;  %v10724_v62 = vld [vmem:[%s10896_s12 + $0x3ec] ss:$16 sps:$4 sm:$0xff]   ;;  %v10726_v1 = vld [vmem:[%s10896_s12 + $0x3e8] ss:$16 sps:$4 sm:$0xff]  }
  0x9c   : > { %1240 = vmatmul.mubr.f32.gmra.mrb[4].mxu0 %v567_v2  ;;  %1507 = vmatmul.mubr.f32.gmra.mrb[4].mxu1 %v567_v2  ;;  %v10422_v2 = vpop.permute.xlu1 %10421  ;;  %v10730_v7 = vld [vmem:[%s10896_s12 + $0x40c] ss:$16 sps:$4 sm:$0xff]  }
  0x9d   : > { %9088 = vmatpush1.bf16.msra.mxu0 %v10645_v63  ;;  %9264 = vmatpush1.bf16.msra.mxu1 %v10648_v0  ;;  %v10419_v63 = vunpack.i.h.bf16 %v11001_v3  ;;  %v10723_v0 = vld [vmem:[%s10896_s12 + $0x3e0] ss:$16 sps:$4 sm:$0xff]   ;;  %v10423_v8 = vunpack.i.l.bf16 %v10422_v2  ;;  %v10424_v3 = vunpack.i.h.bf16 %v10422_v2 }
  0x9e   : > { %9090 = vmatprep.subr.bf16.mxu0 %v10649_v5  ;;  %9266 = vmatprep.subr.bf16.mxu1 %v10652_v6  ;;  %v469_v5 = vld [vmem:[#allocation2 + $0x4] sm:$0xff]  ;;  %v10783_v2 = vld [vmem:[%s10896_s12 + $0x520] ss:$16 sps:$4 sm:$0xff]  }
  0x9f   : > { %1245 = vmatprep.mubr.f32.mxu0 %v572_v9  ;;  %1512 = vmatprep.mubr.f32.mxu1 %v572_v9  ;;  %v10727_v6 = vld [vmem:[%s10896_s12 + $0x404] ss:$16 sps:$4 sm:$0xff]   ;;  %v573_v9 = vsel %vm448_vm0, %v469_v5, %v10419_v63  ;;  %v10780_v63 = vld [vmem:[%s10896_s12 + $0x508] ss:$16 sps:$4 sm:$0xff]  }
  0xa0   : > { %1246 = vmatmul.mubr.f32.gmra.mrb[6].mxu0 %v11013_v12  ;;  %1513 = vmatmul.mubr.f32.gmra.mrb[6].mxu1 %v11013_v12  ;;  %v10427_v13 = vpop.permute.xlu0 %10426  ;;  %v10786_v5 = vld [vmem:[%s10896_s12 + $0x528] ss:$16 sps:$4 sm:$0xff]  }
  0xa1   : > { %9092 = vmatpush1.bf16.msra.mxu0 %v10651_v10  ;;  %9268 = vmatpush1.bf16.msra.mxu1 %v10654_v11  ;;  %v10729_v10 = vld [vmem:[%s10896_s12 + $0x400] ss:$16 sps:$4 sm:$0xff]   ;;  %v10732_v11 = vld [vmem:[%s10896_s12 + $0x408] ss:$16 sps:$4 sm:$0xff]  }
  0xa2   : > { %9094 = vmatprep.subr.bf16.mxu0 %v10655_v14  ;;  %9270 = vmatprep.subr.bf16.mxu1 %v10658_v15  ;;  %v478_v14 = vld [vmem:[#allocation2 + $0xe] sm:$0xff] }
  0xa3   : > { %1316 = vmatprep.mubr.f32.mxu0 %v577_v16  ;;  %1583 = vmatprep.mubr.f32.mxu1 %v577_v16  ;;  %v10733_v15 = vld [vmem:[%s10896_s12 + $0x424] ss:$16 sps:$4 sm:$0xff]   ;;  %v10736_v16 = vld [vmem:[%s10896_s12 + $0x42c] ss:$16 sps:$4 sm:$0xff]  }
  0xa5   : > { %9096 = vmatpush1.bf16.msra.mxu0 %v10657_v17  ;;  %9272 = vmatpush1.bf16.msra.mxu1 %v10660_v18  ;;  %v470_v17 = vld [vmem:[#allocation2 + $0xc] sm:$0xff]  ;;  %v10428_v18 = vunpack.i.l.bf16 %v10427_v13 }
  0xa6   : > { %9098 = vmatprep.subr.bf16.mxu0 %v10661_v19  ;;  %9274 = vmatprep.subr.bf16.mxu1 %v10664_v20  ;;  %v578_v19 = vsel %vm448_vm0, %v478_v14, %v10423_v8  ;;  %v10735_v20 = vld [vmem:[%s10896_s12 + $0x420] ss:$16 sps:$4 sm:$0xff]  }
  0xa7   : > { %v10789_v8 = vld [vmem:[%s10896_s12 + $0x540] ss:$16 sps:$4 sm:$0xff]  }
  0xa8   : > { %v7638_v14 = vld [vmem:[%s11128_s17 + $0x40] sm:$0xff]  }
  0xa9   : > { %9100 = vmatpush1.bf16.msra.mxu0 %v10663_v21  ;;  %9276 = vmatpush1.bf16.msra.mxu1 %v10666_v22  ;;  %v10738_v21 = vld [vmem:[%s10896_s12 + $0x428] ss:$16 sps:$4 sm:$0xff]   ;;  %v10429_v22 = vunpack.i.h.bf16 %v10427_v13 }
  0xaa   : > { %9102 = vmatprep.subr.bf16.mxu0 %v10667_v23  ;;  %9278 = vmatprep.subr.bf16.mxu1 %v10670_v24  ;;  %v574_v23 = vsel %vm448_vm0, %v470_v17, %v10424_v3  ;;  %v10432_v24 = vpop.permute.xlu1 %10431  ;;  %v10795_v3 = vld [vmem:[%s10896_s12 + $0x560] ss:$16 sps:$4 sm:$0xff]   ;;  %v10798_v13 = vld [vmem:[%s10896_s12 + $0x568] ss:$16 sps:$4 sm:$0xff]  }
  0xab   : > { %v490_v17 = vld [vmem:[#allocation2 + $0x12] sm:$0xff] }
  0xad   : > { %9104 = vmatpush1.bf16.msra.mxu0 %v10669_v25  ;;  %9280 = vmatpush1.bf16.msra.mxu1 %v10672_v26  ;;  %v479_v25 = vld [vmem:[#allocation2 + $0x26] sm:$0xff] }
  0xae   : > { %9106 = vmatprep.subr.bf16.mxu0 %v10673_v27  ;;  %9282 = vmatprep.subr.bf16.mxu1 %v10676_v28  ;;  %v10739_v26 = vld [vmem:[%s10896_s12 + $0x444] ss:$16 sps:$4 sm:$0xff]   ;;  %v10742_v27 = vld [vmem:[%s10896_s12 + $0x44c] ss:$16 sps:$4 sm:$0xff]  }
  0xaf   : > { %v471_v28 = vld [vmem:[#allocation2 + $0x24] sm:$0xff] }
  0xb1   : > { %9108 = vmatpush1.bf16.msra.mxu0 %v10675_v29  ;;  %9284 = vmatpush1.bf16.msra.mxu1 %v10678_v30  ;;  %v10433_v29 = vunpack.i.l.bf16 %v10432_v24  ;;  %v579_v30 = vsel %vm448_vm0, %v479_v25, %v10428_v18  ;;  %v485_v18 = vld [vmem:[#allocation2 + $0x10] sm:$0xff] }
  0xb2   : > { %9110 = vmatprep.subr.bf16.mxu0 %v10679_v31  ;;  %9286 = vmatprep.subr.bf16.mxu1 %v10682_v32  ;;  %v10741_v31 = vld [vmem:[%s10896_s12 + $0x440] ss:$16 sps:$4 sm:$0xff]   ;;  %v10744_v32 = vld [vmem:[%s10896_s12 + $0x448] ss:$16 sps:$4 sm:$0xff]  }
  0xb3   : > { %v7648_v25 = vld [vmem:[%s11128_s17 + $0x90] sm:$0xff]  }
  0xb5   : > { %9112 = vmatpush1.bf16.msra.mxu0 %v10681_v33  ;;  %9288 = vmatpush1.bf16.msra.mxu1 %v10684_v34  ;;  %v10434_v33 = vunpack.i.h.bf16 %v10432_v24  ;;  %v575_v34 = vsel %vm448_vm0, %v471_v28, %v10429_v22  ;;  %v7640_v24 = vld [vmem:[%s11128_s17 + $0x50] sm:$0xff]  }
  0xb6   : > { %9114 = vmatprep.subr.bf16.mxu0 %v10685_v35  ;;  %9290 = vmatprep.subr.bf16.mxu1 %v10688_v36  ;;  %v480_v35 = vld [vmem:[#allocation2 + $0x2e] sm:$0xff] }
  0xb7   : > { %v10745_v36 = vld [vmem:[%s10896_s12 + $0x464] ss:$16 sps:$4 sm:$0xff]  }
  0xb8   : > { %v7632_v28 = vld [vmem:[%s11128_s17 + $0x10] sm:$0xff]  }
  0xb9   : > { %9116 = vmatpush1.bf16.msra.mxu0 %v10687_v37  ;;  %9292 = vmatpush1.bf16.msra.mxu1 %v10690_v38  ;;  %v10748_v37 = vld [vmem:[%s10896_s12 + $0x46c] ss:$16 sps:$4 sm:$0xff]  }
  0xba   : > { %9118 = vmatprep.subr.bf16.mxu0 %v10691_v39  ;;  %9294 = vmatprep.subr.bf16.mxu1 %v10694_v40  ;;  %v472_v38 = vld [vmem:[#allocation2 + $0x2c] sm:$0xff]  ;;  %v580_v39 = vsel %vm448_vm0, %v480_v35, %v10433_v29  ;;  %v7641_v29 = vld [vmem:[%s11128_s17 + $0x58] sm:$0xff]  }
  0xbb   : > { %v10747_v40 = vld [vmem:[%s10896_s12 + $0x460] ss:$16 sps:$4 sm:$0xff]  }
  0xbd   : > { %9120 = vmatpush1.bf16.msra.mxu0 %v10693_v41  ;;  %9296 = vmatpush1.bf16.msra.mxu1 %v10696_v42  ;;  %v10750_v41 = vld [vmem:[%s10896_s12 + $0x468] ss:$16 sps:$4 sm:$0xff]   ;;  %v576_v42 = vsel %vm448_vm0, %v472_v38, %v10434_v33  ;;  %v7634_v38 = vld [vmem:[%s11128_s17 + $0x20] sm:$0xff]  }
  0xbe   : > { %9122 = vmatprep.subr.bf16.mxu0 %v10697_v43  ;;  %9298 = vmatprep.subr.bf16.mxu1 %v10700_v44  ;;  %v10751_v43 = vld [vmem:[%s10896_s12 + $0x484] ss:$16 sps:$4 sm:$0xff]   ;;  %v10754_v44 = vld [vmem:[%s10896_s12 + $0x48c] ss:$16 sps:$4 sm:$0xff]  }
  0xc1   : > { %9124 = vmatpush1.bf16.msra.mxu0 %v10699_v45  ;;  %9300 = vmatpush1.bf16.msra.mxu1 %v10702_v47  ;;  %v10753_v45 = vld [vmem:[%s10896_s12 + $0x480] ss:$16 sps:$4 sm:$0xff]   ;;  %v10756_v47 = vld [vmem:[%s10896_s12 + $0x488] ss:$16 sps:$4 sm:$0xff]  }
  0xc2   : > { %9126 = vmatprep.subr.bf16.mxu0 %v10703_v48  ;;  %9302 = vmatprep.subr.bf16.mxu1 %v10706_v49  ;;  %v10757_v48 = vld [vmem:[%s10896_s12 + $0x4a4] ss:$16 sps:$4 sm:$0xff]   ;;  %v10760_v49 = vld [vmem:[%s10896_s12 + $0x4ac] ss:$16 sps:$4 sm:$0xff]  }
  0xc5   : > { %9128 = vmatpush1.bf16.msra.mxu0 %v10705_v50  ;;  %9304 = vmatpush1.bf16.msra.mxu1 %v10708_v51  ;;  %v10759_v50 = vld [vmem:[%s10896_s12 + $0x4a0] ss:$16 sps:$4 sm:$0xff]   ;;  %v10762_v51 = vld [vmem:[%s10896_s12 + $0x4a8] ss:$16 sps:$4 sm:$0xff]  }
  0xc6   : > { %9130 = vmatprep.subr.bf16.mxu0 %v10709_v52  ;;  %9306 = vmatprep.subr.bf16.mxu1 %v10712_v53  ;;  %v10763_v52 = vld [vmem:[%s10896_s12 + $0x4c4] ss:$16 sps:$4 sm:$0xff]   ;;  %v10766_v53 = vld [vmem:[%s10896_s12 + $0x4cc] ss:$16 sps:$4 sm:$0xff]  }
  0xc9   : > { %9132 = vmatpush1.bf16.msra.mxu0 %v10711_v54  ;;  %9308 = vmatpush1.bf16.msra.mxu1 %v10714_v55  ;;  %v10765_v54 = vld [vmem:[%s10896_s12 + $0x4c0] ss:$16 sps:$4 sm:$0xff]   ;;  %v10768_v55 = vld [vmem:[%s10896_s12 + $0x4c8] ss:$16 sps:$4 sm:$0xff]  }
  0xca   : > { %9134 = vmatprep.subr.bf16.mxu0 %v10715_v56  ;;  %9310 = vmatprep.subr.bf16.mxu1 %v10718_v57  ;;  %v10772_v56 = vld [vmem:[%s10896_s12 + $0x4ec] ss:$16 sps:$4 sm:$0xff]   ;;  %v10771_v57 = vld [vmem:[%s10896_s12 + $0x4e0] ss:$16 sps:$4 sm:$0xff]  }
  0xcd   : > { %9136 = vmatpush1.bf16.msra.mxu0 %v10717_v58  ;;  %9312 = vmatpush1.bf16.msra.mxu1 %v10720_v60  ;;  %v10774_v58 = vld [vmem:[%s10896_s12 + $0x4e8] ss:$16 sps:$4 sm:$0xff]   ;;  %v10775_v60 = vld [vmem:[%s10896_s12 + $0x504] ss:$16 sps:$4 sm:$0xff]  }
  0xce   : > { %9138 = vmatprep.subr.bf16.mxu0 %v10721_v61  ;;  %9314 = vmatprep.subr.bf16.mxu1 %v10724_v62  ;;  %v10778_v61 = vld [vmem:[%s10896_s12 + $0x50c] ss:$16 sps:$4 sm:$0xff]   ;;  %v10777_v62 = vld [vmem:[%s10896_s12 + $0x500] ss:$16 sps:$4 sm:$0xff]  }
  0xd1   : > { %9140 = vmatpush1.bf16.msra.mxu0 %v10723_v0  ;;  %9316 = vmatpush1.bf16.msra.mxu1 %v10726_v1  ;;  %v10781_v0 = vld [vmem:[%s10896_s12 + $0x524] ss:$16 sps:$4 sm:$0xff]   ;;  %v10784_v1 = vld [vmem:[%s10896_s12 + $0x52c] ss:$16 sps:$4 sm:$0xff]  }
  0xd2   : > { %9142 = vmatprep.subr.bf16.mxu0 %v10727_v6  ;;  %9318 = vmatprep.subr.bf16.mxu1 %v10730_v7  ;;  %v10787_v6 = vld [vmem:[%s10896_s12 + $0x544] ss:$16 sps:$4 sm:$0xff]   ;;  %v10790_v7 = vld [vmem:[%s10896_s12 + $0x54c] ss:$16 sps:$4 sm:$0xff]  }
  0xd4   : > { %1317 = vmatmul.mubr.f32.vlgmr.msra.gmra.mrb[0].mxu0 %v573_v9  ;;  %1584 = vmatmul.mubr.f32.vlgmr.msra.gmra.mrb[0].mxu1 %v573_v9  ;;  %v10792_v9 = vld [vmem:[%s10896_s12 + $0x548] ss:$16 sps:$4 sm:$0xff]  }
  0xd5   : > { %9144 = vmatpush1.bf16.msra.mxu0 %v10729_v10  ;;  %9320 = vmatpush1.bf16.msra.mxu1 %v10732_v11  ;;  %v10793_v10 = vld [vmem:[%s10896_s12 + $0x564] ss:$16 sps:$4 sm:$0xff]   ;;  %v10796_v11 = vld [vmem:[%s10896_s12 + $0x56c] ss:$16 sps:$4 sm:$0xff]  }
  0xd6   : > { %9146 = vmatprep.subr.bf16.mxu0 %v10733_v15  ;;  %9322 = vmatprep.subr.bf16.mxu1 %v10736_v16  ;;  %v7646_v15 = vld [vmem:[%s11128_s17 + $0x80] sm:$0xff]   ;;  %v560_v16 = vpop.permute.xlu0 %559 }
  0xd7   : > { %1322 = vmatprep.mubr.f32.mxu0 %v578_v19  ;;  %1589 = vmatprep.mubr.f32.mxu1 %v578_v19  ;;  %v6288_v19 = vld [vmem:[%s11128_s17] sm:$0xff]   ;;  %v581_v22 = vsel %vm448_vm0, %v485_v18, %v560_v16 }
  0xd8   : > { %1323 = vmatmul.mubr.f32.gmra.mrb[2].mxu0 %v574_v23  ;;  %1590 = vmatmul.mubr.f32.gmra.mrb[2].mxu1 %v574_v23  ;;  %v7631_v23 = vld [vmem:[%s11128_s17 + $0x8] sm:$0xff]  }
  0xd9   : > { %9148 = vmatpush1.bf16.msra.mxu0 %v10735_v20  ;;  %9324 = vmatpush1.bf16.msra.mxu1 %v10738_v21  ;;  %v7639_v20 = vld [vmem:[%s11128_s17 + $0x48] sm:$0xff]  }
  0xda   : > { %9150 = vmatprep.subr.bf16.mxu0 %v10739_v26  ;;  %9326 = vmatprep.subr.bf16.mxu1 %v10742_v27  ;;  %v7647_v21 = vld [vmem:[%s11128_s17 + $0x88] sm:$0xff]   ;;  %v492_v26 = vld [vmem:[#allocation2 + $0x32] sm:$0xff] }
  0xdb   : > { %1328 = vmatprep.mubr.f32.mxu0 %v579_v30  ;;  %1595 = vmatprep.mubr.f32.mxu1 %v579_v30  ;;  %v486_v27 = vld [vmem:[#allocation2 + $0x30] sm:$0xff]  ;;  %v7633_v30 = vld [vmem:[%s11128_s17 + $0x18] sm:$0xff]  }
  0xdc   : > { %1329 = vmatmul.mubr.f32.gmra.mrb[4].mxu0 %v575_v34  ;;  %1596 = vmatmul.mubr.f32.gmra.mrb[4].mxu1 %v575_v34 }
  0xdd   : > { %9152 = vmatpush1.bf16.msra.mxu0 %v10741_v31  ;;  %9328 = vmatpush1.bf16.msra.mxu1 %v10744_v32  ;;  %v1115_v31 = vlaneseq  ;;  %v11169_v32 = vld [vmem:[%s11166_s21 + $0x8] sm:$0x77] }
  0xde   : > { %9154 = vmatprep.subr.bf16.mxu0 %v10745_v36  ;;  %9330 = vmatprep.subr.bf16.mxu1 %v10748_v37  ;;  %v7642_v36 = vld [vmem:[%s11128_s17 + $0x60] sm:$0xff]   ;;  %v7649_v37 = vld [vmem:[%s11128_s17 + $0x98] sm:$0xff]  }
  0xdf   : > { %1334 = vmatprep.mubr.f32.mxu0 %v580_v39  ;;  %1601 = vmatprep.mubr.f32.mxu1 %v580_v39 }
  0xe0   : > { %1335 = vmatmul.mubr.f32.gmra.mrb[6].mxu0 %v576_v42  ;;  %1602 = vmatmul.mubr.f32.gmra.mrb[6].mxu1 %v576_v42  ;;  %v7643_v42 = vld [vmem:[%s11128_s17 + $0x68] sm:$0xff]  }
  0xe1   : > { %9156 = vmatpush1.bf16.msra.mxu0 %v10747_v40  ;;  %9332 = vmatpush1.bf16.msra.mxu1 %v10750_v41 }
  0xe2   : > { %9158 = vmatprep.subr.bf16.mxu0 %v10751_v43  ;;  %9334 = vmatprep.subr.bf16.mxu1 %v10754_v44  ;;  %v7650_v43 = vld [vmem:[%s11128_s17 + $0xa0] sm:$0xff]   ;;  %v7635_v44 = vld [vmem:[%s11128_s17 + $0x28] sm:$0xff]  }
  0xe3   : > { %6250 = vmatprep.mubr.msk.f32.mxu0 %vm448_vm0, %v10984_v46  ;;  %6254 = vmatprep.mubr.msk.f32.mxu1 %vm448_vm0, %v10984_v46  ;;  %v10769_v46 = vld [vmem:[%s10896_s12 + $0x4e4] ss:$16 sps:$4 sm:$0xff]   ;;  %s428_s12 = scalar_lea.vmem %s12046_s6, %s6284_s18 }
  0xe5   : > { %9160 = vmatpush1.bf16.msra.mxu0 %v10753_v45  ;;  %9336 = vmatpush1.bf16.msra.mxu1 %v10756_v47  ;;  %v7644_v45 = vld [vmem:[%s11128_s17 + $0x70] sm:$0xff]   ;;  %v7651_v47 = vld [vmem:[%s11128_s17 + $0xa8] sm:$0xff]  }
  0xe6   : > { %9162 = vmatprep.subr.bf16.mxu0 %v10757_v48  ;;  %9338 = vmatprep.subr.bf16.mxu1 %v10760_v49  ;;  %v7636_v48 = vld [vmem:[%s11128_s17 + $0x30] sm:$0xff]   ;;  %v7645_v49 = vld [vmem:[%s11128_s17 + $0x78] sm:$0xff]  }
  0xe9   : > { %9164 = vmatpush1.bf16.msra.mxu0 %v10759_v50  ;;  %9340 = vmatpush1.bf16.msra.mxu1 %v10762_v51  ;;  %v7652_v50 = vld [vmem:[%s11128_s17 + $0xb0] sm:$0xff]   ;;  %v7637_v51 = vld [vmem:[%s11128_s17 + $0x38] sm:$0xff]  }
  0xea   : > { %9166 = vmatprep.subr.bf16.mxu0 %v10763_v52  ;;  %9342 = vmatprep.subr.bf16.mxu1 %v10766_v53  ;;  %v7653_v52 = vld [vmem:[%s11128_s17 + $0xb8] sm:$0xff]  }
  0xed   : > { %9168 = vmatpush1.bf16.msra.mxu0 %v10765_v54  ;;  %9344 = vmatpush1.bf16.msra.mxu1 %v10768_v55  ;;  %v11200_v54 = vld [vmem:[%s11166_s21] sm:$0x77] }
  0xee   : > { %9170 = vmatprep.subr.bf16.mxu0 %v10769_v46  ;;  %9346 = vmatprep.subr.bf16.mxu1 %v10772_v56 }
  0xf1   : > { %9172 = vmatpush1.bf16.msra.mxu0 %v10771_v57  ;;  %9348 = vmatpush1.bf16.msra.mxu1 %v10774_v58 }
  0xf2   : > { %9174 = vmatprep.subr.bf16.mxu0 %v10775_v60  ;;  %9350 = vmatprep.subr.bf16.mxu1 %v10778_v61 }
  0xf5   : > { %9176 = vmatpush1.bf16.msra.mxu0 %v10777_v62  ;;  %9352 = vmatpush1.bf16.msra.mxu1 %v10780_v63 }
  0xf6   : > { %9178 = vmatprep.subr.bf16.mxu0 %v10781_v0  ;;  %9354 = vmatprep.subr.bf16.mxu1 %v10784_v1 }
  0xf9   : > { %9180 = vmatpush1.bf16.msra.mxu0 %v10783_v2  ;;  %9356 = vmatpush1.bf16.msra.mxu1 %v10786_v5 }
  0xfa   : > { %9182 = vmatprep.subr.bf16.mxu0 %v10787_v6  ;;  %9358 = vmatprep.subr.bf16.mxu1 %v10790_v7 }
  0xfd   : > { %9184 = vmatpush1.bf16.msra.mxu0 %v10789_v8  ;;  %9360 = vmatpush1.bf16.msra.mxu1 %v10792_v9 }
  0xfe   : > { %9186 = vmatprep.subr.bf16.mxu0 %v10793_v10  ;;  %9362 = vmatprep.subr.bf16.mxu1 %v10796_v11 }
 0x101   : > { %9188 = vmatpush1.bf16.msra.mxu0 %v10795_v3  ;;  %9364 = vmatpush1.bf16.msra.mxu1 %v10798_v13 }
 0x102   : > { %9366 = vmatprep.subr.bf16.mxu0 %v7638_v14  ;;  %9398 = vmatprep.subr.bf16.mxu1 %v7646_v15 }
 0x104   : > { %1406 = vmatmul.mubr.f32.vlgmr.msra.gmra.mrb[0].mxu0 %v10993_v59  ;;  %1673 = vmatmul.mubr.f32.vlgmr.msra.gmra.mrb[0].mxu1 %v10993_v59  ;;  %v562_v59 = vpop.permute.xlu1 %561 }
 0x105   : > { %6251 = vmatprep.mubr.msk.f32.mxu0 %vm448_vm0, %v490_v17  ;;  %6255 = vmatprep.mubr.msk.f32.mxu1 %vm448_vm0, %v490_v17 }
 0x106   : > { %9368 = vmatpush3.bf16.msra.mxu0 %v6288_v19  ;;  %9400 = vmatpush3.bf16.msra.mxu1 %v7646_v15 }
 0x107   : > { %9370 = vmatprep.subr.bf16.mxu0 %v7639_v20  ;;  %9402 = vmatprep.subr.bf16.mxu1 %v7647_v21 }
 0x108   : > { %1412 = vmatmul.mubr.f32.gmra.mrb[2].mxu0 %v581_v22  ;;  %1679 = vmatmul.mubr.f32.gmra.mrb[2].mxu1 %v581_v22 }
 0x109   : > { %6252 = vmatprep.mubr.msk.f32.mxu0 %vm448_vm0, %v11003_v4  ;;  %6256 = vmatprep.mubr.msk.f32.mxu1 %vm448_vm0, %v11003_v4  ;;  %v582_v4 = vsel %vm448_vm0, %v486_v27, %v562_v59 }
 0x10a   : > { %9372 = vmatpush3.bf16.msra.mxu0 %v7631_v23  ;;  %9404 = vmatpush3.bf16.msra.mxu1 %v7647_v21 }
 0x10b   : > { %9374 = vmatprep.subr.bf16.mxu0 %v7640_v24  ;;  %9406 = vmatprep.subr.bf16.mxu1 %v7648_v25 }
 0x10c   : > { %1418 = vmatmul.mubr.f32.gmra.mrb[4].mxu0 %v11013_v12  ;;  %1685 = vmatmul.mubr.f32.gmra.mrb[4].mxu1 %v11013_v12  ;;  %v11159_v12 = vshrl.u32 %v1115_v31, 7 }
 0x10d   : > { %6253 = vmatprep.mubr.msk.f32.mxu0 %vm448_vm0, %v492_v26  ;;  %6257 = vmatprep.mubr.msk.f32.mxu1 %vm448_vm0, %v492_v26 }
 0x10e   : > { %9376 = vmatpush3.bf16.msra.mxu0 %v7632_v28  ;;  %9408 = vmatpush3.bf16.msra.mxu1 %v7648_v25  ;;  %v1121_v33 = vsub.s32 4, %v11159_v12  ;;  %v1719_v35 = vsub.s32 5, %v11159_v12  ;;  %v1771_v39 = vsub.s32 6, %v11159_v12  ;;  %v11197_v53 = vsub.s32 0, %v11159_v12 }
 0x10f   : > { %9378 = vmatprep.subr.bf16.mxu0 %v7641_v29  ;;  %9410 = vmatprep.subr.bf16.mxu1 %v7649_v37  ;;  %v11205_v46 = vsub.s32 1, %v11159_v12  ;;  %v11208_v56 = vsub.s32 2, %v11159_v12 }
 0x110   : > { %1424 = vmatmul.mubr.f32.gmra.mrb[6].mxu0 %v582_v4  ;;  %1691 = vmatmul.mubr.f32.gmra.mrb[6].mxu1 %v582_v4  ;;  %v1130_v34 = vrot.slane %v11169_v32, %v1121_v33  ;;  %v1728_v40 = vrot.slane %v11169_v32, %v1719_v35  ;;  %v1780_v41 = vrot.slane %v11169_v32, %v1771_v39 }
 0x111   : > { %v1118_v55 = vrot.slane %v11200_v54, %v11197_v53  ;;  %v1716_v58 = vrot.slane %v11200_v54, %v11205_v46  ;;  %v1768_v61 = vrot.slane %v11200_v54, %v11208_v56 }
 0x112   : > { %9380 = vmatpush3.bf16.msra.mxu0 %v7633_v30  ;;  %9412 = vmatpush3.bf16.msra.mxu1 %v7649_v37  ;;  %v1150_v60 = vrot.slane %v1130_v34, %v11197_v53  ;;  %v1748_v7 = vrot.slane %v1728_v40, %v11205_v46  ;;  %v1800_v11 = vrot.slane %v1780_v41, %v11208_v56 }
 0x113   : > { %9382 = vmatprep.subr.bf16.mxu0 %v7642_v36  ;;  %9414 = vmatprep.subr.bf16.mxu1 %v7650_v43  ;;  %v1138_v57 = vrot.slane %v1118_v55, %v11197_v53  ;;  %v1736_v1 = vrot.slane %v1716_v58, %v11205_v46  ;;  %v1788_v9 = vrot.slane %v1768_v61, %v11208_v56 }
 0x116   : > { %9384 = vmatpush3.bf16.msra.mxu0 %v7634_v38  ;;  %9416 = vmatpush3.bf16.msra.mxu1 %v7650_v43 }
 0x117   : > { %9386 = vmatprep.subr.bf16.mxu0 %v7643_v42  ;;  %9418 = vmatprep.subr.bf16.mxu1 %v7651_v47 }
 0x11a   : > { %9388 = vmatpush3.bf16.msra.mxu0 %v7635_v44  ;;  %9420 = vmatpush3.bf16.msra.mxu1 %v7651_v47 }
 0x11b   : > { %9390 = vmatprep.subr.bf16.mxu0 %v7644_v45  ;;  %9422 = vmatprep.subr.bf16.mxu1 %v7652_v50 }
 0x11e   : > { %9392 = vmatpush3.bf16.msra.mxu0 %v7636_v48  ;;  %9424 = vmatpush3.bf16.msra.mxu1 %v7652_v50 }
 0x11f   : > { %9394 = vmatprep.subr.bf16.mxu0 %v7645_v49  ;;  %9426 = vmatprep.subr.bf16.mxu1 %v7653_v52 }
 0x122   : > { %9396 = vmatpush3.bf16.msra.mxu0 %v7637_v51  ;;  %9428 = vmatpush3.bf16.msra.mxu1 %v7653_v52 }
 0x1d7   : > { %v1407_v62 = vpop.f32.mrb[0].mxu0  ;;  %v11216_v63 = vpop.f32.mrb[0].mxu1 }
 0x1d8   : > { %v10141_v0 = vadd.f32 %v1407_v62, %v1138_v57  ;;  %v11219_v2 = vpop.f32.mrb[1].mxu0  ;;  %v1676_v5 = vpop.f32.mrb[1].mxu1 }
 0x1d9   : > { %v10150_v6 = vadd.f32 %v1676_v5, %v1150_v60 }
 0x1da   : > { %v1697_v8 = vmax.f32 %v10141_v0, 0.0 }
 0x1db   : > { %v1700_v10 = vmax.f32 %v10150_v6, 0.0  ;;  %v1413_v3 = vpop.f32.mrb[2].mxu0  ;;  %v11224_v13 = vpop.f32.mrb[2].mxu1 }
 0x1dc   : > { %v1749_v14 = vmul.f32 %v1736_v1, %v1697_v8  ;;  %v10143_v15 = vadd.f32 %v1413_v3, %v1138_v57  ;;  %v11226_v16 = vpop.f32.mrb[3].mxu0  ;;  %v1682_v17 = vpop.f32.mrb[3].mxu1  ;;  %v7673_v8 = vld [vmem:[%s11128_s17 + $0x100] sm:$0xff]   ;;  %v7675_v3 = vld [vmem:[%s11128_s17 + $0x110] sm:$0xff]  }
 0x1dd   : > { %v1752_v18 = vmul.f32 %v1748_v7, %v1700_v10  ;;  %v10152_v19 = vadd.f32 %v1682_v17, %v1150_v60  ;;  %9466 = vmatprep.subr.bf16.mxu1 %v7673_v8  ;;  %v7674_v10 = vld [vmem:[%s11128_s17 + $0x108] sm:$0xff]   ;;  %v7668_v17 = vld [vmem:[%s11128_s17 + $0xd8] sm:$0xff]  }
 0x1de   : > { %v1801_v20 = vadd.f32 %v1788_v9, %v1749_v14  ;;  %v1701_v21 = vmax.f32 %v10143_v15, 0.0  ;;  %v7667_v14 = vld [vmem:[%s11128_s17 + $0xd0] sm:$0xff]   ;;  %v7676_v15 = vld [vmem:[%s11128_s17 + $0x118] sm:$0xff]  }
 0x1df   : > { %v11228_v22 = vadd.f32 %v1800_v11, %v1752_v18  ;;  %v1704_v23 = vmax.f32 %v10152_v19, 0.0  ;;  %v1419_v24 = vpop.f32.mrb[4].mxu0  ;;  %v11230_v25 = vpop.f32.mrb[4].mxu1  ;;  %v7677_v18 = vld [vmem:[%s11128_s17 + $0x120] sm:$0xff]  }
 0x1e0   : > { %1817 = vst [vmem:[#allocation2 + $0x5] sm:$0xff] %v1801_v20  ;;  %v1753_v59 = vmul.f32 %v1736_v1, %v1701_v21  ;;  %v10145_v26 = vadd.f32 %v1419_v24, %v1138_v57  ;;  %v11232_v27 = vpop.f32.mrb[5].mxu0  ;;  %v1688_v28 = vpop.f32.mrb[5].mxu1  ;;  %1998 = vmatprep.mubr.f32.mxu0 %v1801_v20  ;;  %v7669_v19 = vld [vmem:[%s11128_s17 + $0xe0] sm:$0xff]   ;;  %v7678_v20 = vld [vmem:[%s11128_s17 + $0x128] sm:$0xff]   ;;  %v7671_v24 = vld [vmem:[%s11128_s17 + $0xf0] sm:$0xff]  }
 0x1e1   : > { %v1756_v29 = vmul.f32 %v1748_v7, %v1704_v23  ;;  %v10154_v4 = vadd.f32 %v1688_v28, %v1150_v60  ;;  %v7670_v21 = vld [vmem:[%s11128_s17 + $0xe8] sm:$0xff]   ;;  %v7679_v23 = vld [vmem:[%s11128_s17 + $0x130] sm:$0xff]   ;;  %v7689_v28 = vld [vmem:[%s11128_s17 + $0x180] sm:$0xff]  }
 0x1e2   : > { %v1805_v30 = vadd.f32 %v1788_v9, %v1753_v59  ;;  %v1705_v34 = vmax.f32 %v10145_v26, 0.0  ;;  %v7680_v59 = vld [vmem:[%s11128_s17 + $0x138] sm:$0xff]  }
 0x1e3   : > { %v11234_v36 = vadd.f32 %v1800_v11, %v1756_v29  ;;  %v1708_v37 = vmax.f32 %v10154_v4, 0.0  ;;  %v1425_v38 = vpop.f32.mrb[6].mxu0  ;;  %v11236_v40 = vpop.f32.mrb[6].mxu1  ;;  %v7672_v26 = vld [vmem:[%s11128_s17 + $0xf8] sm:$0xff]   ;;  %v6384_v29 = vld [vmem:[%s11265_s30] sm:$0xff]   ;;  %v10825_v4 = vmov 0.0|0.0  }
 0x1e4   : > { %1818 = vst [vmem:[#allocation2 + $0xd] sm:$0xff] %v1805_v30  ;;  %v1757_v41 = vmul.f32 %v1736_v1, %v1705_v34  ;;  %v10147_v42 = vadd.f32 %v1425_v38, %v1138_v57  ;;  %v11238_v43 = vpop.f32.mrb[7].mxu0  ;;  %v1694_v44 = vpop.f32.mrb[7].mxu1  ;;  %9429 = vmatprep.subr.bf16.mxu0 %v10825_v4  ;;  %v7655_v34 = vld [vmem:[%s11265_s30 + $0x10] sm:$0xff]   ;;  %v7657_v38 = vld [vmem:[%s11265_s30 + $0x20] sm:$0xff]  }
 0x1e5   : > { %v1760_v45 = vmul.f32 %v1748_v7, %v1708_v37  ;;  %v10156_v47 = vadd.f32 %v1694_v44, %v1150_v60  ;;  %v7656_v37 = vld [vmem:[%s11265_s30 + $0x18] sm:$0xff]  }
 0x1e6   : > { %v1809_v48 = vadd.f32 %v1788_v9, %v1757_v41  ;;  %v1709_v49 = vmax.f32 %v10147_v42, 0.0  ;;  %v7658_v41 = vld [vmem:[%s11265_s30 + $0x28] sm:$0xff]   ;;  %v7659_v42 = vld [vmem:[%s11265_s30 + $0x30] sm:$0xff]   ;;  %v7660_v44 = vld [vmem:[%s11265_s30 + $0x38] sm:$0xff]  }
 0x1e7   : > { %v11240_v50 = vadd.f32 %v1800_v11, %v1760_v45  ;;  %v1712_v51 = vmax.f32 %v10156_v47, 0.0  ;;  %v1821_v52 = vld [vmem:[#allocation2 + $0x4] sm:$0xff] }
 0x1e8   : > { %1819 = vst [vmem:[#allocation2 + $0x25] sm:$0xff] %v1809_v48  ;;  %v1761_v55 = vmul.f32 %v1736_v1, %v1709_v49  ;;  %1999 = vmatmul.mubr.f32.vlgmr.msra.gmra.mrb[8].mxu0 %v1821_v52  ;;  %v7661_v45 = vld [vmem:[%s11265_s30 + $0x40] sm:$0xff]   ;;  %v7662_v47 = vld [vmem:[%s11265_s30 + $0x48] sm:$0xff]   ;;  %v7664_v49 = vld [vmem:[%s11265_s30 + $0x58] sm:$0xff]  }
 0x1e9   : > { %v1764_v58 = vmul.f32 %v1748_v7, %v1712_v51  ;;  %2003 = vmatprep.mubr.f32.mxu0 %v1805_v30  ;;  %9431 = vmatpush1.bf16.msra.mxu0 %v6384_v29  ;;  %v7654_v30 = vld [vmem:[%s11265_s30 + $0x8] sm:$0xff]   ;;  %v1929_v51 = vld [vmem:[%s11294_s10] sm:$0x7] }
 0x1ea   : > { %v1813_v61 = vadd.f32 %v1788_v9, %v1761_v55  ;;  %v7665_v9 = vld [vmem:[%s11128_s17 + $0xc0] sm:$0xff]   ;;  %9432 = vmatprep.subr.bf16.mxu0 %v10825_v4  ;;  %v1933_v55 = vrot.slane %v1929_v51, %v11197_v53  ;;  %v2111_v8 = vrot.slane %v1929_v51, %v11205_v46 }
 0x1eb   : > { %v11242_v62 = vadd.f32 %v1800_v11, %v1764_v58  ;;  %v1829_v57 = vld [vmem:[#allocation2 + $0x6] sm:$0xff]  ;;  %v1830_v5 = vld [vmem:[#allocation2 + $0xe] sm:$0xff] }
 0x1ec   : > { %v1822_v0 = vld [vmem:[#allocation2 + $0xc] sm:$0xff]  ;;  %1820 = vst [vmem:[#allocation2 + $0x2d] sm:$0xff] %v1813_v61  ;;  %8849 = vmatprep.mubr.f32.mxu1 %v1829_v57 }
 0x1ed   : > { %2004 = vmatmul.mubr.f32.gmra.mrb[10].mxu0 %v1822_v0  ;;  %8850 = vmatmul.mubr.f32.vlgmr.msra.gmra.mrb[8].mxu1 %v1830_v5  ;;  %v7666_v11 = vld [vmem:[%s11128_s17 + $0xc8] sm:$0xff]   ;;  %v1122_v5 = vrot.slane %v11200_v54, %v1121_v33 }
 0x1ee   : > { %2008 = vmatprep.mubr.f32.mxu0 %v1809_v48  ;;  %9468 = vmatpush3.bf16.msra.mxu1 %v7665_v9  ;;  %v7663_v48 = vld [vmem:[%s11265_s30 + $0x50] sm:$0xff]  }
 0x1ef   : > { %v1823_v60 = vld [vmem:[#allocation2 + $0x24] sm:$0xff]  ;;  %9470 = vmatprep.subr.bf16.mxu1 %v7674_v10  ;;  %9434 = vmatpush1.bf16.msra.mxu0 %v7654_v30 }
 0x1f0   : > { %9435 = vmatprep.subr.bf16.mxu0 %v10825_v4 }
 0x1f1   : > { %2009 = vmatmul.mubr.f32.gmra.mrb[12].mxu0 %v1823_v60 }
 0x1f2   : > { %2013 = vmatprep.mubr.f32.mxu0 %v1813_v61  ;;  %9472 = vmatpush3.bf16.msra.mxu1 %v7666_v11 }
 0x1f3   : > { %v1831_v1 = vld [vmem:[#allocation2 + $0x26] sm:$0xff]  ;;  %v1832_v7 = vld [vmem:[#allocation2 + $0x2e] sm:$0xff]  ;;  %9474 = vmatprep.subr.bf16.mxu1 %v7675_v3  ;;  %9437 = vmatpush1.bf16.msra.mxu0 %v7655_v34  ;;  %v1142_v3 = vrot.slane %v1122_v5, %v11197_v53 }
 0x1f4   : > { %v1824_v6 = vld [vmem:[#allocation2 + $0x2c] sm:$0xff]  ;;  %8852 = vmatprep.mubr.f32.mxu1 %v1831_v1  ;;  %9438 = vmatprep.subr.bf16.mxu0 %v10825_v4 }
 0x1f5   : > { %2014 = vmatmul.mubr.f32.gmra.mrb[14].mxu0 %v1824_v6  ;;  %8853 = vmatmul.mubr.f32.gmra.mrb[10].mxu1 %v1832_v7 }
 0x1f6   : > { %9476 = vmatpush3.bf16.msra.mxu1 %v7667_v14  ;;  %v2119_v14 = vrot.slane %v1929_v51, %v11208_v56 }
 0x1f7   : > { %9478 = vmatprep.subr.bf16.mxu1 %v7676_v15  ;;  %9440 = vmatpush1.bf16.msra.mxu0 %v7656_v37 }
 0x1f8   : > { %9441 = vmatprep.subr.bf16.mxu0 %v10825_v4 }
 0x1fa   : > { %9480 = vmatpush3.bf16.msra.mxu1 %v7668_v17 }
 0x1fb   : > { %9482 = vmatprep.subr.bf16.mxu1 %v7677_v18  ;;  %9443 = vmatpush1.bf16.msra.mxu0 %v7657_v38 }
 0x1fc   : > { %9444 = vmatprep.subr.bf16.mxu0 %v10825_v4 }
 0x1fe   : > { %9484 = vmatpush3.bf16.msra.mxu1 %v7669_v19 }
 0x1ff   : > { %9486 = vmatprep.subr.bf16.mxu1 %v7678_v20  ;;  %9446 = vmatpush1.bf16.msra.mxu0 %v7658_v41  ;;  %v11307_v20 = vld [vmem:[%s11128_s17 + $0x1c0] sm:$0xff]  }
 0x200   : > { %9447 = vmatprep.subr.bf16.mxu0 %v10825_v4 }
 0x202   : > { %9488 = vmatpush3.bf16.msra.mxu1 %v7670_v21 }
 0x203   : > { %9490 = vmatprep.subr.bf16.mxu1 %v7679_v23  ;;  %9449 = vmatpush1.bf16.msra.mxu0 %v7659_v42 }
 0x204   : > { %9450 = vmatprep.subr.bf16.mxu0 %v10825_v4 }
 0x206   : > { %9492 = vmatpush3.bf16.msra.mxu1 %v7671_v24 }
 0x207   : > { %9494 = vmatprep.subr.bf16.mxu1 %v7680_v59  ;;  %9452 = vmatpush1.bf16.msra.mxu0 %v7660_v44  ;;  %v10142_v59 = vadd.f32 %v11219_v2, %v1142_v3  ;;  %v1772_v44 = vrot.slane %v11200_v54, %v1771_v39  ;;  %v10148_v39 = vadd.f32 %v11238_v43, %v1142_v3 }
 0x208   : > { %9453 = vmatprep.subr.bf16.mxu0 %v10825_v4 }
 0x20a   : > { %9496 = vmatpush3.bf16.msra.mxu1 %v7672_v26  ;;  %v1720_v26 = vrot.slane %v11200_v54, %v1719_v35 }
 0x20b   : > { %9498 = vmatprep.subr.bf16.mxu1 %v7689_v28  ;;  %9455 = vmatpush1.bf16.msra.mxu0 %v7661_v45  ;;  %v10144_v28 = vadd.f32 %v11226_v16, %v1142_v3 }
 0x20c   : > { %9456 = vmatprep.subr.bf16.mxu0 %v10825_v4  ;;  %v1740_v35 = vrot.slane %v1720_v26, %v11205_v46 }
 0x20f   : > { %9458 = vmatpush1.bf16.msra.mxu0 %v7662_v47  ;;  %v1698_v47 = vmax.f32 %v10142_v59, 0.0 }
 0x210   : > { %9459 = vmatprep.subr.bf16.mxu0 %v10825_v4 }
 0x213   : > { %9461 = vmatpush1.bf16.msra.mxu0 %v7663_v48  ;;  %v1702_v48 = vmax.f32 %v10144_v28, 0.0 }
 0x214   : > { %9462 = vmatprep.subr.bf16.mxu0 %v10825_v4 }
 0x217   : > { %9464 = vmatpush1.bf16.msra.mxu0 %v7664_v49 }
 0x218   : > { %9530 = vmatprep.subr.bf16.mxu0 %v11307_v20 }
 0x2bb   : > { %v7997_v52 = vpop.f32.mrb[8].mxu0 }
 0x2bc   : > { %v7998_v58 = vpop.f32.mrb[9].mxu0 }
 0x2bd   : > { %v7999_v61 = vadd.f32 %v7998_v58, %v7997_v52  ;;  %v1792_v52 = vrot.slane %v1772_v44, %v11208_v56  ;;  %v10146_v58 = vadd.f32 %v11232_v27, %v1142_v3  ;;  %v7683_v44 = vld [vmem:[%s11128_s17 + $0x150] sm:$0xff]  }
 0x2bf   : > { %v2001_v0 = vadd.f32 %v7999_v61, %v1933_v55 }
 0x2c0   : > { %v8000_v57 = vpop.f32.mrb[10].mxu0  ;;  %v8851_v60 = vpop.f32.mrb[8].mxu1 }
 0x2c1   : > { %v8001_v1 = vpop.f32.mrb[11].mxu0  ;;  %v2085_v7 = vpop.f32.mrb[9].mxu1 }
 0x2c2   : > { %v8002_v6 = vadd.f32 %v8001_v1, %v8000_v57  ;;  %v2086_v9 = vadd.f32 %v2085_v7, %v2001_v0  ;;  %v1750_v57 = vmul.f32 %v1740_v35, %v1698_v47  ;;  %v1754_v0 = vmul.f32 %v1740_v35, %v1702_v48  ;;  %v7684_v47 = vld [vmem:[%s11128_s17 + $0x158] sm:$0xff]   ;;  %v7693_v48 = vld [vmem:[%s11128_s17 + $0x1a0] sm:$0xff]  }
 0x2c4   : > { %v2006_v10 = vadd.f32 %v8002_v6, %v1933_v55  ;;  %v8003_v11 = vpop.f32.mrb[12].mxu0  ;;  %v2104_v15 = vmax.f32 %v2086_v9, 0.0  ;;  %v11326_v6 = vadd.f32 %v1792_v52, %v1750_v57  ;;  %v11328_v7 = vadd.f32 %v1792_v52, %v1754_v0  ;;  %v7696_v57 = vld [vmem:[%s11128_s17 + $0x1b8] sm:$0xff]  }
 0x2c5   : > { %v8004_v17 = vpop.f32.mrb[13].mxu0  ;;  %v1710_v9 = vmax.f32 %v10148_v39, 0.0  ;;  %v7688_v0 = vld [vmem:[%s11128_s17 + $0x178] sm:$0xff]  }
 0x2c6   : > { %v2091_v18 = vadd.f32 %v8851_v60, %v2006_v10  ;;  %v8005_v19 = vadd.f32 %v8004_v17, %v8003_v11  ;;  %v2112_v33 = vmul.f32 %v2111_v8, %v2104_v15  ;;  %v1706_v60 = vmax.f32 %v10146_v58, 0.0  ;;  %v7695_v58 = vld [vmem:[%s11128_s17 + $0x1b0] sm:$0xff]  }
 0x2c8   : > { %v2105_v21 = vmax.f32 %v2091_v18, 0.0  ;;  %v8006_v23 = vpop.f32.mrb[14].mxu0  ;;  %v2011_v24 = vadd.f32 %v8005_v19, %v1933_v55  ;;  %v2120_v29 = vadd.f32 %v2119_v14, %v2112_v33  ;;  %v8854_v30 = vpop.f32.mrb[10].mxu1  ;;  %v1758_v3 = vmul.f32 %v1740_v35, %v1706_v60  ;;  %v7681_v19 = vld [vmem:[%s11128_s17 + $0x140] sm:$0xff]  }
 0x2c9   : > { %v8007_v34 = vpop.f32.mrb[15].mxu0  ;;  %v2095_v41 = vpop.f32.mrb[11].mxu1 }
 0x2ca   : > { %v2113_v37 = vmul.f32 %v2111_v8, %v2105_v21  ;;  %v8008_v38 = vadd.f32 %v8007_v34, %v8006_v23  ;;  %2124 = vst.msk [vmem:[#allocation2 + $0x5] sm:$0xff] %vm448_vm0, %v2120_v29  ;;  %v2096_v42 = vadd.f32 %v2095_v41, %v2011_v24  ;;  %v11342_v17 = vadd.f32 %v1792_v52, %v1758_v3  ;;  %v7690_v29 = vld [vmem:[%s11128_s17 + $0x188] sm:$0xff]  }
 0x2cb   : > { %v7682_v34 = vld [vmem:[%s11128_s17 + $0x148] sm:$0xff]  }
 0x2cc   : > { %v2121_v2 = vadd.f32 %v2119_v14, %v2113_v37  ;;  %v2016_v45 = vadd.f32 %v8008_v38, %v1933_v55  ;;  %v2106_v16 = vmax.f32 %v2096_v42, 0.0  ;;  %v7691_v38 = vld [vmem:[%s11128_s17 + $0x190] sm:$0xff]  }
 0x2ce   : > { %2125 = vst.msk [vmem:[#allocation2 + $0xd] sm:$0xff] %vm448_vm0, %v2121_v2  ;;  %v2101_v49 = vadd.f32 %v8854_v30, %v2016_v45  ;;  %v2114_v51 = vmul.f32 %v2111_v8, %v2106_v16  ;;  %v7692_v2 = vld [vmem:[%s11128_s17 + $0x198] sm:$0xff]  }
 0x2d0   : > { %v2107_v61 = vmax.f32 %v2101_v49, 0.0  ;;  %v2122_v54 = vadd.f32 %v2119_v14, %v2114_v51  ;;  %v7685_v49 = vld [vmem:[%s11128_s17 + $0x160] sm:$0xff]   ;;  %v7694_v51 = vld [vmem:[%s11128_s17 + $0x1a8] sm:$0xff]  }
 0x2d1   : > { %v2132_v5 = vld [vmem:[#allocation2 + $0x5] sm:$0xff] }
 0x2d2   : > { %v2115_v55 = vmul.f32 %v2111_v8, %v2107_v61  ;;  %2126 = vst.msk [vmem:[#allocation2 + $0x25] sm:$0xff] %vm448_vm0, %v2122_v54  ;;  %2144 = vrot.lane.b32.xlu0 %v2132_v5, %s10824_s13  ;;  %v11335_v43 = vld [vmem:[#allocation2 + $0x4] sm:$0xff]  ;;  %v7687_v61 = vld [vmem:[%s11128_s17 + $0x170] sm:$0xff]  }
 0x2d4   : > { %v2123_v1 = vadd.f32 %v2119_v14, %v2115_v55  ;;  %v1762_v14 = vmul.f32 %v1740_v35, %v1710_v9  ;;  %v7699_v9 = vld [vmem:[%s11128_s17 + $0x1d0] sm:$0xff]  }
 0x2d5   : > { %v2133_v27 = vld [vmem:[#allocation2 + $0xd] sm:$0xff] }
 0x2d6   : > { %v11330_v10 = vld [vmem:[#allocation2 + $0xe] sm:$0xff]  ;;  %2127 = vst.msk [vmem:[#allocation2 + $0x2d] sm:$0xff] %vm448_vm0, %v2123_v1  ;;  %2146 = vrot.lane.b32.xlu1 %v2133_v27, %s10824_s13  ;;  %v2136_v8 = vld [vmem:[#allocation2 + $0x6] sm:$0xff]  ;;  %v11347_v33 = vadd.f32 %v1792_v52, %v1762_v14 }
 0x2d7   : > { %v11332_v11 = vld [vmem:[#allocation2 + $0xc] sm:$0xff]  ;;  %6259 = vmatprep.mubr.msk.f32.mxu0 %vm448_vm0, %v2136_v8  ;;  %v7701_v8 = vld [vmem:[%s11128_s17 + $0x1e0] sm:$0xff]  }
 0x2d8   : > { %2331 = vst [vmem:[#allocation2 + $0x5] sm:$0xff] %v11326_v6  ;;  %2332 = vst [vmem:[#allocation2 + $0xd] sm:$0xff] %v11328_v7  ;;  %v7686_v52 = vld [vmem:[%s11128_s17 + $0x168] sm:$0xff]  }
 0x2d9   : > { %v2134_v15 = vld [vmem:[#allocation2 + $0x25] sm:$0xff] }
 0x2da   : > { %2148 = vrot.lane.b32.xlu0 %v2134_v15, %s10824_s13  ;;  %v11344_v18 = vld [vmem:[#allocation2 + $0x24] sm:$0xff]  ;;  %v7703_v15 = vld [vmem:[%s11128_s17 + $0x1f0] sm:$0xff]  }
 0x2db   : > { %v7698_v1 = vld [vmem:[%s11128_s17 + $0x1c8] sm:$0xff]  }
 0x2dc   : > { %v7702_v14 = vld [vmem:[%s11128_s17 + $0x1e8] sm:$0xff]  }
 0x2dd   : > { %v11349_v21 = vld [vmem:[#allocation2 + $0x2c] sm:$0xff] }
 0x2de   : > { %v2135_v23 = vld [vmem:[#allocation2 + $0x2d] sm:$0xff] }
 0x2df   : > { %v11351_v24 = vld [vmem:[#allocation2 + $0x26] sm:$0xff]  ;;  %v11353_v59 = vld [vmem:[#allocation2 + $0x2e] sm:$0xff]  ;;  %2150 = vrot.lane.b32.xlu1 %v2135_v23, %s10824_s13 }
 0x2e0   : > { %2333 = vst [vmem:[#allocation2 + $0x25] sm:$0xff] %v11342_v17  ;;  %v2339_v26 = vld [vmem:[#allocation2 + $0x4] sm:$0xff]  ;;  %2334 = vst [vmem:[#allocation2 + $0x2d] sm:$0xff] %v11347_v33  ;;  %v2340_v30 = vld [vmem:[#allocation2 + $0xc] sm:$0xff] }
 0x2e1   : > { %v2335_v28 = vld [vmem:[#allocation2 + $0x3] sm:$0xff]  ;;  %2585 = vmatprep.mubr.f32.mxu1 %v2339_v26  ;;  %v2336_v37 = vld [vmem:[#allocation2 + $0xb] sm:$0xff] }
 0x2e2   : > { %2586 = vmatmul.mubr.f32.vlgmr.msra.gmra.mrb[12].mxu1 %v2335_v28  ;;  %v2347_v16 = vld [vmem:[#allocation2 + $0x6] sm:$0xff]  ;;  %v2348_v39 = vld [vmem:[#allocation2 + $0xe] sm:$0xff] }
 0x2e3   : > { %9500 = vmatpush3.bf16.msra.mxu1 %v7681_v19  ;;  %2590 = vmatprep.mubr.f32.mxu1 %v2340_v30  ;;  %v2351_v3 = vld [vmem:[#allocation2 + $0x7] sm:$0xff] }
 0x2e4   : > { %9502 = vmatprep.subr.bf16.mxu1 %v7690_v29 }
 0x2e6   : > { %2591 = vmatmul.mubr.f32.gmra.mrb[14].mxu1 %v2336_v37  ;;  %v7721_v37 = vld [vmem:[%s11265_s30 + $0xe0] sm:$0xff]  }
 0x2e7   : > { %9504 = vmatpush3.bf16.msra.mxu1 %v7682_v34  ;;  %v2341_v41 = vld [vmem:[#allocation2 + $0x24] sm:$0xff]  ;;  %v2342_v45 = vld [vmem:[#allocation2 + $0x2c] sm:$0xff] }
 0x2e8   : > { %v2337_v42 = vld [vmem:[#allocation2 + $0x23] sm:$0xff]  ;;  %2595 = vmatprep.mubr.f32.mxu1 %v2341_v41  ;;  %9506 = vmatprep.subr.bf16.mxu1 %v7691_v38  ;;  %v2338_v35 = vld [vmem:[#allocation2 + $0x2b] sm:$0xff] }
 0x2e9   : > { %v2349_v54 = vld [vmem:[#allocation2 + $0x26] sm:$0xff]  ;;  %v2350_v55 = vld [vmem:[#allocation2 + $0x2e] sm:$0xff] }
 0x2ea   : > { %2596 = vmatmul.mubr.f32.gmra.mrb[16].mxu1 %v2337_v42  ;;  %v2353_v19 = vld [vmem:[#allocation2 + $0x27] sm:$0xff] }
 0x2eb   : > { %9508 = vmatpush3.bf16.msra.mxu1 %v7683_v44  ;;  %2600 = vmatprep.mubr.f32.mxu1 %v2342_v45  ;;  %v7722_v44 = vld [vmem:[%s11265_s30 + $0xe8] sm:$0xff]   ;;  %v7724_v45 = vld [vmem:[%s11265_s30 + $0xf8] sm:$0xff]  }
 0x2ec   : > { %9510 = vmatprep.subr.bf16.mxu1 %v7692_v2  ;;  %v7723_v2 = vld [vmem:[%s11265_s30 + $0xf0] sm:$0xff]  }
 0x2ee   : > { %2601 = vmatmul.mubr.f32.gmra.mrb[18].mxu1 %v2338_v35  ;;  %v11404_v35 = vld [vmem:[%s11294_s10 + $0x8] sm:$0x7] }
 0x2ef   : > { %9512 = vmatpush3.bf16.msra.mxu1 %v7684_v47  ;;  %2670 = vmatprep.mubr.f32.mxu1 %v2347_v16  ;;  %v7733_v47 = vld [vmem:[%s11128_s17 + $0x240] sm:$0xff]  }
 0x2f0   : > { %9514 = vmatprep.subr.bf16.mxu1 %v7693_v48  ;;  %v2520_v48 = vrot.slane %v11404_v35, %v11197_v53 }
 0x2f3   : > { %9516 = vmatpush3.bf16.msra.mxu1 %v7685_v49 }
 0x2f4   : > { %9518 = vmatprep.subr.bf16.mxu1 %v7694_v51 }
 0x2f7   : > { %9520 = vmatpush3.bf16.msra.mxu1 %v7686_v52 }
 0x2f8   : > { %9522 = vmatprep.subr.bf16.mxu1 %v7695_v58 }
 0x2fb   : > { %9524 = vmatpush3.bf16.msra.mxu1 %v7687_v61 }
 0x2fc   : > { %9526 = vmatprep.subr.bf16.mxu1 %v7696_v57 }
 0x2ff   : > { %9528 = vmatpush3.bf16.msra.mxu1 %v7688_v0 }
 0x302   : > { %2671 = vmatmul.mubr.f32.vlgmr.msra.gmra.mrb[20].mxu1 %v11326_v6 }
 0x303   : > { %2675 = vmatprep.mubr.f32.mxu1 %v2348_v39 }
 0x306   : > { %2676 = vmatmul.mubr.f32.gmra.mrb[22].mxu1 %v11328_v7 }
 0x307   : > { %2680 = vmatprep.mubr.f32.mxu1 %v2349_v54 }
 0x30a   : > { %2681 = vmatmul.mubr.f32.gmra.mrb[24].mxu1 %v11342_v17  ;;  %v7704_v17 = vld [vmem:[%s11128_s17 + $0x1f8] sm:$0xff]  }
 0x30b   : > { %2685 = vmatprep.mubr.f32.mxu1 %v2350_v55 }
 0x30e   : > { %2686 = vmatmul.mubr.f32.gmra.mrb[26].mxu1 %v11347_v33  ;;  %v2354_v33 = vld [vmem:[#allocation2 + $0x2f] sm:$0xff] }
 0x344   : > { %v2145_v5 = vpop.permute.xlu0 %2144 }
 0x345   : > { %v2156_v60 = vsel %vm448_vm0, %v11335_v43, %v2145_v5  ;;  %v7700_v43 = vld [vmem:[%s11128_s17 + $0x1d8] sm:$0xff]  }
 0x346   : > { %2291 = vmatmul.mubr.f32.vlgmr.msra.gmra.mrb[16].mxu0 %v2156_v60 }
 0x347   : > { %9532 = vmatpush3.bf16.msra.mxu0 %v11307_v20  ;;  %6260 = vmatprep.mubr.msk.f32.mxu0 %vm448_vm0, %v11330_v10 }
 0x348   : > { %v2147_v6 = vpop.permute.xlu1 %2146  ;;  %9534 = vmatprep.subr.bf16.mxu0 %v7698_v1 }
 0x349   : > { %v2157_v7 = vsel %vm448_vm0, %v11332_v11, %v2147_v6 }
 0x34a   : > { %2296 = vmatmul.mubr.f32.gmra.mrb[18].mxu0 %v2157_v7 }
 0x34b   : > { %9536 = vmatpush3.bf16.msra.mxu0 %v7698_v1  ;;  %6261 = vmatprep.mubr.msk.f32.mxu0 %vm448_vm0, %v11351_v24 }
 0x34c   : > { %v2149_v27 = vpop.permute.xlu0 %2148  ;;  %9538 = vmatprep.subr.bf16.mxu0 %v7699_v9 }
 0x34d   : > { %v2158_v20 = vsel %vm448_vm0, %v11344_v18, %v2149_v27  ;;  %v2352_v18 = vld [vmem:[#allocation2 + $0xf] sm:$0xff] }
 0x34e   : > { %2301 = vmatmul.mubr.f32.gmra.mrb[20].mxu0 %v2158_v20 }
 0x34f   : > { %9540 = vmatpush3.bf16.msra.mxu0 %v7699_v9  ;;  %6262 = vmatprep.mubr.msk.f32.mxu0 %vm448_vm0, %v11353_v59 }
 0x350   : > { %9542 = vmatprep.subr.bf16.mxu0 %v7700_v43 }
 0x351   : > { %v2151_v10 = vpop.permute.xlu1 %2150 }
 0x352   : > { %v2159_v11 = vsel %vm448_vm0, %v11349_v21, %v2151_v10 }
 0x353   : > { %2306 = vmatmul.mubr.f32.gmra.mrb[22].mxu0 %v2159_v11 }
 0x354   : > { %9544 = vmatpush3.bf16.msra.mxu0 %v7700_v43  ;;  %8887 = vmatprep.mubr.f32.mxu0 %v2351_v3 }
 0x355   : > { %9546 = vmatprep.subr.bf16.mxu0 %v7701_v8 }
 0x358   : > { %9548 = vmatpush3.bf16.msra.mxu0 %v7701_v8 }
 0x359   : > { %9550 = vmatprep.subr.bf16.mxu0 %v7702_v14 }
 0x35c   : > { %9552 = vmatpush3.bf16.msra.mxu0 %v7702_v14 }
 0x35d   : > { %9554 = vmatprep.subr.bf16.mxu0 %v7703_v15 }
 0x360   : > { %9556 = vmatpush3.bf16.msra.mxu0 %v7703_v15  ;;  %v7713_v15 = vld [vmem:[%s11265_s30 + $0xa0] sm:$0xff]  }
 0x361   : > { %9558 = vmatprep.subr.bf16.mxu0 %v7704_v17  ;;  %9562 = vmatprep.subr.bf16.mxu1 %v7713_v15 }
 0x364   : > { %9560 = vmatpush3.bf16.msra.mxu0 %v7704_v17 }
 0x365   : > { %9594 = vmatprep.subr.bf16.mxu0 %v7721_v37 }
 0x367   : > { %8888 = vmatmul.mubr.f32.vlgmr.msra.gmra.mrb[24].mxu0 %v2352_v18  ;;  %v7705_v18 = vld [vmem:[%s11265_s30 + $0x60] sm:$0xff]  }
 0x368   : > { %8890 = vmatprep.mubr.f32.mxu0 %v2353_v19  ;;  %9596 = vmatpush3.bf16.msra.mxu0 %v7721_v37  ;;  %v7710_v37 = vld [vmem:[%s11265_s30 + $0x88] sm:$0xff]  }
 0x369   : > { %9598 = vmatprep.subr.bf16.mxu0 %v7722_v44  ;;  %9564 = vmatpush3.bf16.msra.mxu1 %v7705_v18 }
 0x36b   : > { %8891 = vmatmul.mubr.f32.gmra.mrb[26].mxu0 %v2354_v33  ;;  %v7714_v33 = vld [vmem:[%s11265_s30 + $0xa8] sm:$0xff]  }
 0x36c   : > { %9600 = vmatpush3.bf16.msra.mxu0 %v7722_v44  ;;  %9566 = vmatprep.subr.bf16.mxu1 %v7714_v33 }
 0x36d   : > { %9602 = vmatprep.subr.bf16.mxu0 %v7723_v2 }
 0x370   : > { %9604 = vmatpush3.bf16.msra.mxu0 %v7723_v2  ;;  %v2783_v2 = vrot.slane %v11404_v35, %v11205_v46 }
 0x371   : > { %9606 = vmatprep.subr.bf16.mxu0 %v7724_v45 }
 0x374   : > { %9608 = vmatpush3.bf16.msra.mxu0 %v7724_v45 }
 0x375   : > { %9610 = vmatprep.subr.bf16.mxu0 %v7733_v47  ;;  %v7711_v47 = vld [vmem:[%s11265_s30 + $0x90] sm:$0xff]  }
 0x3b5   : > { %v8061_v21 = vpop.f32.mrb[12].mxu1 }
 0x3b6   : > { %v8062_v23 = vpop.f32.mrb[13].mxu1 }
 0x3b7   : > { %v8063_v24 = vadd.f32 %v8062_v23, %v8061_v21  ;;  %v7706_v23 = vld [vmem:[%s11265_s30 + $0x68] sm:$0xff]  }
 0x3b8   : > { %9568 = vmatpush3.bf16.msra.mxu1 %v7706_v23 }
 0x3b9   : > { %v8064_v59 = vpop.f32.mrb[14].mxu1  ;;  %v2588_v51 = vadd.f32 %v8063_v24, %v2520_v48  ;;  %v7715_v24 = vld [vmem:[%s11265_s30 + $0xb0] sm:$0xff]  }
 0x3ba   : > { %v8065_v26 = vpop.f32.mrb[15].mxu1  ;;  %9570 = vmatprep.subr.bf16.mxu1 %v7715_v24 }
 0x3bb   : > { %v8066_v28 = vadd.f32 %v8065_v26, %v8064_v59  ;;  %v7707_v59 = vld [vmem:[%s11265_s30 + $0x70] sm:$0xff]   ;;  %v7716_v26 = vld [vmem:[%s11265_s30 + $0xb8] sm:$0xff]  }
 0x3bc   : > { %9572 = vmatpush3.bf16.msra.mxu1 %v7707_v59 }
 0x3bd   : > { %v8067_v29 = vpop.f32.mrb[16].mxu1  ;;  %v2593_v0 = vadd.f32 %v8066_v28, %v2520_v48  ;;  %9574 = vmatprep.subr.bf16.mxu1 %v7716_v26  ;;  %v7708_v28 = vld [vmem:[%s11265_s30 + $0x78] sm:$0xff]  }
 0x3be   : > { %v8068_v30 = vpop.f32.mrb[17].mxu1 }
 0x3bf   : > { %v8069_v34 = vadd.f32 %v8068_v30, %v8067_v29  ;;  %v7717_v29 = vld [vmem:[%s11265_s30 + $0xc0] sm:$0xff]  }
 0x3c0   : > { %9576 = vmatpush3.bf16.msra.mxu1 %v7708_v28  ;;  %v7709_v30 = vld [vmem:[%s11265_s30 + $0x80] sm:$0xff]  }
 0x3c1   : > { %v8070_v38 = vpop.f32.mrb[18].mxu1  ;;  %v2598_v60 = vadd.f32 %v8069_v34, %v2520_v48  ;;  %9578 = vmatprep.subr.bf16.mxu1 %v7717_v29  ;;  %v7718_v34 = vld [vmem:[%s11265_s30 + $0xc8] sm:$0xff]  }
 0x3c2   : > { %v8071_v41 = vpop.f32.mrb[19].mxu1  ;;  %v7734_v29 = vld [vmem:[%s11128_s17 + $0x248] sm:$0xff]  }
 0x3c3   : > { %v8072_v42 = vadd.f32 %v8071_v41, %v8070_v38  ;;  %v1126_v38 = vrot.slane %v11169_v32, %v11197_v53  ;;  %v7719_v41 = vld [vmem:[%s11265_s30 + $0xd0] sm:$0xff]  }
 0x3c4   : > { %9580 = vmatpush3.bf16.msra.mxu1 %v7709_v30 }
 0x3c5   : > { %v2603_v27 = vadd.f32 %v8072_v42, %v2520_v48  ;;  %9582 = vmatprep.subr.bf16.mxu1 %v7718_v34  ;;  %v1146_v48 = vrot.slane %v1126_v38, %v11197_v53 }
 0x3c8   : > { %9584 = vmatpush3.bf16.msra.mxu1 %v7710_v37 }
 0x3c9   : > { %9586 = vmatprep.subr.bf16.mxu1 %v7719_v41 }
 0x3cc   : > { %9588 = vmatpush3.bf16.msra.mxu1 %v7711_v47 }
 0x3d5   : > { %v8105_v16 = vpop.f32.mrb[20].mxu1 }
 0x3d6   : > { %v8106_v49 = vpop.f32.mrb[21].mxu1 }
 0x3d7   : > { %v8107_v52 = vadd.f32 %v8106_v49, %v8105_v16  ;;  %v7720_v49 = vld [vmem:[%s11265_s30 + $0xd8] sm:$0xff]  }
 0x3d8   : > { %9590 = vmatprep.subr.bf16.mxu1 %v7720_v49 }
 0x3d9   : > { %v8108_v58 = vpop.f32.mrb[22].mxu1  ;;  %v2673_v61 = vadd.f32 %v8107_v52, %v2588_v51  ;;  %v2791_v52 = vrot.slane %v11404_v35, %v11208_v56 }
 0x3da   : > { %v8109_v57 = vpop.f32.mrb[23].mxu1 }
 0x3db   : > { %v8110_v39 = vadd.f32 %v8109_v57, %v8108_v58 }
 0x3dd   : > { %v8111_v54 = vpop.f32.mrb[24].mxu1  ;;  %v2678_v55 = vadd.f32 %v8110_v39, %v2593_v0  ;;  %v1724_v0 = vrot.slane %v11169_v32, %v11205_v46  ;;  %v10151_v39 = vadd.f32 %v11224_v13, %v1146_v48 }
 0x3de   : > { %v8112_v5 = vpop.f32.mrb[25].mxu1 }
 0x3df   : > { %v8113_v1 = vadd.f32 %v8112_v5, %v8111_v54  ;;  %v1703_v15 = vmax.f32 %v10151_v39, 0.0 }
 0x3e1   : > { %v8114_v6 = vpop.f32.mrb[26].mxu1  ;;  %v2683_v7 = vadd.f32 %v8113_v1, %v2598_v60 }
 0x3e2   : > { %v8115_v9 = vpop.f32.mrb[27].mxu1 }
 0x3e3   : > { %v8116_v20 = vadd.f32 %v8115_v9, %v8114_v6 }
 0x3e5   : > { %v2688_v43 = vadd.f32 %v8116_v20, %v2603_v27  ;;  %v7712_v20 = vld [vmem:[%s11265_s30 + $0x98] sm:$0xff]  }
 0x3e6   : > { %9592 = vmatpush3.bf16.msra.mxu1 %v7712_v20 }
 0x419   : > { %v11408_v10 = vpop.f32.mrb[16].mxu0 }
 0x41a   : > { %v2294_v11 = vpop.f32.mrb[17].mxu0 }
 0x41b   : > { %v7749_v11 = vld [vmem:[%s11128_s17 + $0x2c0] sm:$0xff]  }
 0x41c   : > { %9642 = vmatprep.subr.bf16.mxu1 %v7749_v11  ;;  %v7727_v11 = vld [vmem:[%s11128_s17 + $0x210] sm:$0xff]  }
 0x41d   : > { %v11410_v8 = vpop.f32.mrb[18].mxu0 }
 0x41e   : > { %v2299_v3 = vpop.f32.mrb[19].mxu0 }
 0x41f   : > { %v1744_v3 = vrot.slane %v1724_v0, %v11205_v46  ;;  %v7735_v0 = vld [vmem:[%s11128_s17 + $0x250] sm:$0xff]  }
 0x421   : > { %v11412_v14 = vpop.f32.mrb[20].mxu0  ;;  %v1755_v23 = vmul.f32 %v1744_v3, %v1703_v15 }
 0x422   : > { %v2304_v17 = vpop.f32.mrb[21].mxu0 }
 0x423   : > { %v10155_v17 = vadd.f32 %v11236_v40, %v1146_v48 }
 0x425   : > { %v1711_v40 = vmax.f32 %v10155_v17, 0.0  ;;  %v7728_v17 = vld [vmem:[%s11128_s17 + $0x218] sm:$0xff]  }
 0x426   : > { %v11416_v19 = vpop.f32.mrb[22].mxu0 }
 0x427   : > { %v2309_v21 = vpop.f32.mrb[23].mxu0  ;;  %v1763_v37 = vmul.f32 %v1744_v3, %v1711_v40  ;;  %v7765_v40 = vld [vmem:[%s11128_s17 + $0x340] sm:$0xff]  }
 0x43a   : > { %v8889_v42 = vpop.f32.mrb[24].mxu0 }
 0x43b   : > { %v2763_v44 = vadd.f32 %v8889_v42, %v2678_v55  ;;  %v2757_v45 = vpop.f32.mrb[25].mxu0 }
 0x43c   : > { %v2758_v16 = vadd.f32 %v2757_v45, %v2673_v61  ;;  %v10149_v61 = vadd.f32 %v11216_v63, %v1146_v48  ;;  %v1776_v63 = vrot.slane %v11169_v32, %v11208_v56  ;;  %v7725_v32 = vld [vmem:[%s11128_s17 + $0x200] sm:$0xff]  }
 0x43d   : > { %v2777_v51 = vmax.f32 %v2763_v44, 0.0 }
 0x43e   : > { %v2776_v58 = vmax.f32 %v2758_v16, 0.0  ;;  %v8892_v57 = vpop.f32.mrb[26].mxu0  ;;  %v1796_v59 = vrot.slane %v1776_v63, %v11208_v56  ;;  %v7738_v63 = vld [vmem:[%s11128_s17 + $0x268] sm:$0xff]  }
 0x43f   : > { %v2785_v54 = vmul.f32 %v2783_v2, %v2777_v51  ;;  %v2773_v55 = vadd.f32 %v8892_v57, %v2688_v43  ;;  %v2767_v5 = vpop.f32.mrb[27].mxu0  ;;  %v1699_v43 = vmax.f32 %v10149_v61, 0.0  ;;  %v7726_v51 = vld [vmem:[%s11128_s17 + $0x208] sm:$0xff]  }
 0x440   : > { %v2784_v60 = vmul.f32 %v2783_v2, %v2776_v58  ;;  %v2768_v1 = vadd.f32 %v2767_v5, %v2683_v7  ;;  %v10153_v7 = vadd.f32 %v11230_v25, %v1146_v48  ;;  %v11458_v34 = vadd.f32 %v1796_v59, %v1755_v23  ;;  %v7732_v23 = vld [vmem:[%s11128_s17 + $0x238] sm:$0xff]  }
 0x441   : > { %v2793_v6 = vadd.f32 %v2791_v52, %v2785_v54  ;;  %v2779_v35 = vmax.f32 %v2773_v55, 0.0  ;;  %v1751_v24 = vmul.f32 %v1744_v3, %v1699_v43  ;;  %v11477_v54 = vadd.f32 %v1796_v59, %v1763_v37  ;;  %v7729_v43 = vld [vmem:[%s11128_s17 + $0x220] sm:$0xff]  }
 0x442   : > { %v2792_v9 = vadd.f32 %v2791_v52, %v2784_v60  ;;  %v2778_v27 = vmax.f32 %v2768_v1, 0.0  ;;  %v1707_v26 = vmax.f32 %v10153_v7, 0.0  ;;  %v7730_v7 = vld [vmem:[%s11128_s17 + $0x228] sm:$0xff]  }
 0x443   : > { %2797 = vst.msk [vmem:[#allocation2 + $0xd] sm:$0xff] %vm448_vm0, %v2793_v6  ;;  %v2787_v13 = vmul.f32 %v2783_v2, %v2779_v35  ;;  %v11460_v44 = vadd.f32 %v1796_v59, %v1751_v24  ;;  %v7757_v24 = vld [vmem:[%s11128_s17 + $0x300] sm:$0xff]  }
 0x444   : > { %2796 = vst.msk [vmem:[#allocation2 + $0x5] sm:$0xff] %vm448_vm0, %v2792_v9  ;;  %v2786_v18 = vmul.f32 %v2783_v2, %v2778_v27  ;;  %v1759_v2 = vmul.f32 %v1744_v3, %v1707_v26  ;;  %v7736_v3 = vld [vmem:[%s11128_s17 + $0x258] sm:$0xff]   ;;  %v7766_v26 = vld [vmem:[%s11128_s17 + $0x348] sm:$0xff]  }
 0x445   : > { %v2795_v33 = vadd.f32 %v2791_v52, %v2787_v13  ;;  %v7737_v13 = vld [vmem:[%s11128_s17 + $0x260] sm:$0xff]  }
 0x446   : > { %v2794_v21 = vadd.f32 %v2791_v52, %v2786_v18  ;;  %v11480_v60 = vadd.f32 %v1796_v59, %v1759_v2  ;;  %v7739_v18 = vld [vmem:[%s11128_s17 + $0x270] sm:$0xff]  }
 0x447   : > { %2799 = vst.msk [vmem:[#allocation2 + $0x2d] sm:$0xff] %vm448_vm0, %v2795_v33  ;;  %v7731_v33 = vld [vmem:[%s11128_s17 + $0x230] sm:$0xff]  }
 0x448   : > { %2798 = vst.msk [vmem:[#allocation2 + $0x25] sm:$0xff] %vm448_vm0, %v2794_v21  ;;  %v7740_v21 = vld [vmem:[%s11128_s17 + $0x278] sm:$0xff]  }
 0x44a   : > { %v2817_v28 = vld [vmem:[#allocation2 + $0xf] sm:$0xff] }
 0x44b   : > { %v2813_v25 = vld [vmem:[#allocation2 + $0xe] sm:$0xff]  ;;  %v2804_v42 = vld [vmem:[#allocation2 + $0x4] sm:$0xff] }
 0x44c   : > { %v11456_v30 = vld [vmem:[#allocation2 + $0xd] sm:$0xff]  ;;  %v11463_v48 = vld [vmem:[#allocation2 + $0x3] sm:$0xff] }
 0x44d   : > { %v2816_v38 = vld [vmem:[#allocation2 + $0x7] sm:$0xff] }
 0x44e   : > { %v2805_v41 = vld [vmem:[#allocation2 + $0xc] sm:$0xff]  ;;  %8909 = vmatprep.mubr.msk.f32.mxu0 %vm448_vm0, %v2816_v38 }
 0x44f   : > { %v10440_v45 = vpack.i.bf16 %v2805_v41, %v2813_v25  ;;  %v2812_v47 = vld [vmem:[#allocation2 + $0x6] sm:$0xff]  ;;  %8910 = vmatmul.mubr.msk.f32.vlgmr.msra.gmra.mrb[28].mxu0 %vm448_vm0, %v2817_v28  ;;  %v2819_v58 = vld [vmem:[#allocation2 + $0x2f] sm:$0xff] }
 0x450   : > { %v11465_v16 = vld [vmem:[#allocation2 + $0xb] sm:$0xff]  ;;  %v10435_v49 = vpack.i.bf16 %v2804_v42, %v2812_v47  ;;  %9612 = vmatpush3.bf16.msra.mxu0 %v7725_v32  ;;  %v11483_v35 = vld [vmem:[#allocation2 + $0x23] sm:$0xff]  ;;  %v7768_v42 = vld [vmem:[%s11128_s17 + $0x358] sm:$0xff]  }
 0x451   : > { %v11469_v52 = vld [vmem:[#allocation2 + $0x5] sm:$0xff]  ;;  %3153 = vst [vmem:[#allocation2 + $0xd] sm:$0xff] %v11458_v34  ;;  %10441 = vrot.lane.b32.xlu1 %v10440_v45, %s10824_s13  ;;  %v2815_v57 = vld [vmem:[#allocation2 + $0x2e] sm:$0xff]  ;;  %9614 = vmatprep.subr.bf16.mxu0 %v7734_v29  ;;  %v7760_v45 = vld [vmem:[%s11128_s17 + $0x318] sm:$0xff]  }
 0x452   : > { %3152 = vst [vmem:[#allocation2 + $0x5] sm:$0xff] %v11460_v44  ;;  %v11475_v39 = vld [vmem:[#allocation2 + $0x2d] sm:$0xff]  ;;  %10436 = vrot.lane.b32.xlu0 %v10435_v49, %s10824_s13  ;;  %v2806_v61 = vld [vmem:[#allocation2 + $0x24] sm:$0xff] }
 0x453   : > { %v2818_v55 = vld [vmem:[#allocation2 + $0x27] sm:$0xff]  ;;  %v7767_v29 = vld [vmem:[%s11128_s17 + $0x350] sm:$0xff]  }
 0x454   : > { %v2807_v5 = vld [vmem:[#allocation2 + $0x2c] sm:$0xff]  ;;  %8912 = vmatprep.mubr.msk.f32.mxu0 %vm448_vm0, %v2818_v55  ;;  %9616 = vmatpush3.bf16.msra.mxu0 %v7726_v51  ;;  %v7769_v49 = vld [vmem:[%s11128_s17 + $0x360] sm:$0xff]  }
 0x455   : > { %v10450_v1 = vpack.i.bf16 %v2807_v5, %v2815_v57  ;;  %v2814_v6 = vld [vmem:[#allocation2 + $0x26] sm:$0xff]  ;;  %8913 = vmatmul.mubr.msk.f32.gmra.mrb[30].mxu0 %vm448_vm0, %v2819_v58  ;;  %9618 = vmatprep.subr.bf16.mxu0 %v7735_v0  ;;  %v7759_v38 = vld [vmem:[%s11128_s17 + $0x310] sm:$0xff]  }
 0x456   : > { %v11485_v9 = vld [vmem:[#allocation2 + $0x2b] sm:$0xff]  ;;  %v10445_v27 = vpack.i.bf16 %v2806_v61, %v2814_v6  ;;  %v7761_v58 = vld [vmem:[%s11128_s17 + $0x320] sm:$0xff]   ;;  %v7772_v61 = vld [vmem:[%s11128_s17 + $0x378] sm:$0xff]  }
 0x457   : > { %v11488_v20 = vld [vmem:[#allocation2 + $0x25] sm:$0xff]  ;;  %3155 = vst [vmem:[#allocation2 + $0x2d] sm:$0xff] %v11477_v54  ;;  %10451 = vrot.lane.b32.xlu1 %v10450_v1, %s10824_s13  ;;  %v7771_v55 = vld [vmem:[%s11128_s17 + $0x370] sm:$0xff]   ;;  %v7764_v1 = vld [vmem:[%s11128_s17 + $0x338] sm:$0xff]  }
 0x458   : > { %3154 = vst [vmem:[#allocation2 + $0x25] sm:$0xff] %v11480_v60  ;;  %10446 = vrot.lane.b32.xlu0 %v10445_v27, %s10824_s13  ;;  %9620 = vmatpush3.bf16.msra.mxu0 %v7727_v11  ;;  %v7758_v28 = vld [vmem:[%s11128_s17 + $0x308] sm:$0xff]   ;;  %v7763_v5 = vld [vmem:[%s11128_s17 + $0x330] sm:$0xff]   ;;  %v7789_v6 = vld [vmem:[%s11128_s17 + $0x400] sm:$0xff]  }
 0x459   : > { %v3160_v15 = vld [vmem:[#allocation2 + $0x2] sm:$0xff]  ;;  %9622 = vmatprep.subr.bf16.mxu0 %v7736_v3  ;;  %v3161_v32 = vld [vmem:[#allocation2 + $0xa] sm:$0xff] }
 0x45a   : > { %3548 = vmatprep.mubr.f32.mxu0 %v3160_v15  ;;  %v3156_v59 = vld [vmem:[#allocation2 + $0x1] sm:$0xff]  ;;  %v3157_v25 = vld [vmem:[#allocation2 + $0x9] sm:$0xff] }
 0x45b   : > { %v3176_v51 = vld [vmem:[#allocation2 + $0x6] sm:$0xff]  ;;  %v3177_v11 = vld [vmem:[#allocation2 + $0xe] sm:$0xff] }
 0x45c   : > { %9624 = vmatpush3.bf16.msra.mxu0 %v7728_v17  ;;  %v7770_v57 = vld [vmem:[%s11128_s17 + $0x368] sm:$0xff]   ;;  %v7791_v3 = vld [vmem:[%s11128_s17 + $0x410] sm:$0xff]   ;;  %v7792_v17 = vld [vmem:[%s11128_s17 + $0x418] sm:$0xff]  }
 0x45d   : > { %9626 = vmatprep.subr.bf16.mxu0 %v7737_v13  ;;  %v7762_v0 = vld [vmem:[%s11128_s17 + $0x328] sm:$0xff]  }
 0x45e   : > { %v7790_v27 = vld [vmem:[%s11128_s17 + $0x408] sm:$0xff]  }
 0x45f   : > { %v3162_v37 = vld [vmem:[#allocation2 + $0x22] sm:$0xff]  ;;  %v3163_v2 = vld [vmem:[#allocation2 + $0x2a] sm:$0xff] }
 0x460   : > { %9628 = vmatpush3.bf16.msra.mxu0 %v7729_v43  ;;  %v3158_v41 = vld [vmem:[#allocation2 + $0x21] sm:$0xff]  ;;  %v3159_v47 = vld [vmem:[#allocation2 + $0x29] sm:$0xff] }
 0x461   : > { %9630 = vmatprep.subr.bf16.mxu0 %v7738_v63  ;;  %v3178_v15 = vld [vmem:[#allocation2 + $0x26] sm:$0xff]  ;;  %v3179_v13 = vld [vmem:[#allocation2 + $0x2e] sm:$0xff]  ;;  %v7796_v63 = vld [vmem:[%s11128_s17 + $0x438] sm:$0xff]  }
 0x462   : > { %v7795_v43 = vld [vmem:[%s11128_s17 + $0x430] sm:$0xff]  }
 0x464   : > { %9632 = vmatpush3.bf16.msra.mxu0 %v7730_v7  ;;  %v3189_v7 = vld [vmem:[#allocation2 + $0x31] sm:$0xff] }
 0x465   : > { %9634 = vmatprep.subr.bf16.mxu0 %v7739_v18 }
 0x468   : > { %9636 = vmatpush3.bf16.msra.mxu0 %v7731_v33 }
 0x469   : > { %9638 = vmatprep.subr.bf16.mxu0 %v7740_v21 }
 0x46c   : > { %9640 = vmatpush3.bf16.msra.mxu0 %v7732_v23 }
 0x46d   : > { %9674 = vmatprep.subr.bf16.mxu0 %v7765_v40 }
 0x46f   : > { %3549 = vmatmul.mubr.f32.vlgmr.msra.gmra.mrb[32].mxu0 %v3156_v59  ;;  %v7741_v59 = vld [vmem:[%s11128_s17 + $0x280] sm:$0xff]  }
 0x470   : > { %3553 = vmatprep.mubr.f32.mxu0 %v3161_v32  ;;  %9676 = vmatpush3.bf16.msra.mxu0 %v7757_v24 }
 0x471   : > { %9678 = vmatprep.subr.bf16.mxu0 %v7766_v26 }
 0x473   : > { %3554 = vmatmul.mubr.f32.gmra.mrb[34].mxu0 %v3157_v25 }
 0x474   : > { %3558 = vmatprep.mubr.f32.mxu0 %v3162_v37  ;;  %9680 = vmatpush3.bf16.msra.mxu0 %v7758_v28  ;;  %v7750_v28 = vld [vmem:[%s11128_s17 + $0x2c8] sm:$0xff]  }
 0x475   : > { %9682 = vmatprep.subr.bf16.mxu0 %v7767_v29 }
 0x477   : > { %3559 = vmatmul.mubr.f32.gmra.mrb[36].mxu0 %v3158_v41  ;;  %v7751_v41 = vld [vmem:[%s11128_s17 + $0x2d0] sm:$0xff]  }
 0x478   : > { %3563 = vmatprep.mubr.f32.mxu0 %v3163_v2  ;;  %9684 = vmatpush3.bf16.msra.mxu0 %v7759_v38 }
 0x479   : > { %9686 = vmatprep.subr.bf16.mxu0 %v7768_v42 }
 0x47b   : > { %3564 = vmatmul.mubr.f32.gmra.mrb[38].mxu0 %v3159_v47 }
 0x47c   : > { %9688 = vmatpush3.bf16.msra.mxu0 %v7760_v45  ;;  %3718 = vmatprep.mubr.f32.mxu0 %v3176_v51 }
 0x47d   : > { %9690 = vmatprep.subr.bf16.mxu0 %v7769_v49  ;;  %v7752_v49 = vld [vmem:[%s11128_s17 + $0x2d8] sm:$0xff]  }
 0x480   : > { %9692 = vmatpush3.bf16.msra.mxu0 %v7761_v58  ;;  %v7753_v58 = vld [vmem:[%s11128_s17 + $0x2e0] sm:$0xff]  }
 0x481   : > { %9694 = vmatprep.subr.bf16.mxu0 %v7770_v57  ;;  %v7754_v57 = vld [vmem:[%s11128_s17 + $0x2e8] sm:$0xff]  }
 0x484   : > { %9696 = vmatpush3.bf16.msra.mxu0 %v7762_v0  ;;  %v7746_v0 = vld [vmem:[%s11128_s17 + $0x2a8] sm:$0xff]  }
 0x485   : > { %9698 = vmatprep.subr.bf16.mxu0 %v7771_v55  ;;  %v7755_v55 = vld [vmem:[%s11128_s17 + $0x2f0] sm:$0xff]  }
 0x488   : > { %9700 = vmatpush3.bf16.msra.mxu0 %v7763_v5  ;;  %v7756_v5 = vld [vmem:[%s11128_s17 + $0x2f8] sm:$0xff]  }
 0x489   : > { %9702 = vmatprep.subr.bf16.mxu0 %v7772_v61  ;;  %v7748_v61 = vld [vmem:[%s11128_s17 + $0x2b8] sm:$0xff]  }
 0x48c   : > { %9704 = vmatpush3.bf16.msra.mxu0 %v7764_v1  ;;  %v7781_v1 = vld [vmem:[%s11128_s17 + $0x3c0] sm:$0xff]  }
 0x48d   : > { %9738 = vmatprep.subr.bf16.mxu0 %v7789_v6 }
 0x48f   : > { %3719 = vmatmul.mubr.f32.vlgmr.msra.gmra.mrb[40].mxu0 %v11460_v44  ;;  %v7793_v44 = vld [vmem:[%s11128_s17 + $0x420] sm:$0xff]  }
 0x490   : > { %3723 = vmatprep.mubr.f32.mxu0 %v3177_v11  ;;  %9740 = vmatpush3.bf16.msra.mxu0 %v7789_v6  ;;  %v7773_v6 = vld [vmem:[%s11128_s17 + $0x380] sm:$0xff]   ;;  %v7782_v11 = vld [vmem:[%s11128_s17 + $0x3c8] sm:$0xff]  }
 0x491   : > { %9742 = vmatprep.subr.bf16.mxu0 %v7790_v27 }
 0x493   : > { %3724 = vmatmul.mubr.f32.gmra.mrb[42].mxu0 %v11458_v34  ;;  %v7794_v34 = vld [vmem:[%s11128_s17 + $0x428] sm:$0xff]  }
 0x494   : > { %3728 = vmatprep.mubr.f32.mxu0 %v3178_v15  ;;  %9744 = vmatpush3.bf16.msra.mxu0 %v7790_v27  ;;  %v3164_v27 = vld [vmem:[#allocation2 + $0x3] sm:$0xff] }
 0x495   : > { %9746 = vmatprep.subr.bf16.mxu0 %v7791_v3  ;;  %v7774_v15 = vld [vmem:[%s11128_s17 + $0x388] sm:$0xff]  }
 0x497   : > { %3729 = vmatmul.mubr.f32.gmra.mrb[44].mxu0 %v11480_v60  ;;  %v3188_v60 = vld [vmem:[#allocation2 + $0x11] sm:$0xff] }
 0x498   : > { %3733 = vmatprep.mubr.f32.mxu0 %v3179_v13  ;;  %9748 = vmatpush3.bf16.msra.mxu0 %v7791_v3  ;;  %v3169_v3 = vld [vmem:[#allocation2 + $0xc] sm:$0xff] }
 0x499   : > { %9750 = vmatprep.subr.bf16.mxu0 %v7792_v17  ;;  %v7783_v13 = vld [vmem:[%s11128_s17 + $0x3d0] sm:$0xff]  }
 0x49b   : > { %3734 = vmatmul.mubr.f32.gmra.mrb[46].mxu0 %v11477_v54 }
 0x49c   : > { %9752 = vmatpush3.bf16.msra.mxu0 %v7792_v17  ;;  %8947 = vmatprep.mubr.f32.mxu0 %v3157_v25  ;;  %v3165_v17 = vld [vmem:[#allocation2 + $0xb] sm:$0xff] }
 0x49d   : > { %9754 = vmatprep.subr.bf16.mxu0 %v7793_v44 }
 0x4a0   : > { %9756 = vmatpush3.bf16.msra.mxu0 %v7793_v44  ;;  %v3170_v44 = vld [vmem:[#allocation2 + $0x24] sm:$0xff] }
 0x4a1   : > { %9758 = vmatprep.subr.bf16.mxu0 %v7794_v34 }
 0x4a4   : > { %9760 = vmatpush3.bf16.msra.mxu0 %v7794_v34  ;;  %v7775_v34 = vld [vmem:[%s11128_s17 + $0x390] sm:$0xff]  }
 0x4a5   : > { %9762 = vmatprep.subr.bf16.mxu0 %v7795_v43 }
 0x4a8   : > { %9764 = vmatpush3.bf16.msra.mxu0 %v7795_v43  ;;  %v3166_v43 = vld [vmem:[#allocation2 + $0x23] sm:$0xff] }
 0x4a9   : > { %9766 = vmatprep.subr.bf16.mxu0 %v7796_v63 }
 0x4ac   : > { %9768 = vmatpush3.bf16.msra.mxu0 %v7796_v63  ;;  %v7784_v63 = vld [vmem:[%s11128_s17 + $0x3d8] sm:$0xff]  }
 0x4af   : > { %8948 = vmatmul.mubr.f32.vlgmr.msra.gmra.mrb[48].mxu0 %v3188_v60  ;;  %v3171_v60 = vld [vmem:[#allocation2 + $0x2c] sm:$0xff] }
 0x4b0   : > { %8950 = vmatprep.mubr.f32.mxu0 %v3159_v47 }
 0x4b3   : > { %8951 = vmatmul.mubr.f32.gmra.mrb[50].mxu0 %v3189_v7  ;;  %v7776_v7 = vld [vmem:[%s11128_s17 + $0x398] sm:$0xff]  }
 0x4c3   : > { %v10442_v54 = vpop.permute.xlu1 %10441 }
 0x4c4   : > { %v10437_v18 = vpop.permute.xlu0 %10436  ;;  %v10443_v33 = vunpack.i.l.bf16 %v10442_v54  ;;  %v10444_v26 = vunpack.i.h.bf16 %v10442_v54  ;;  %v3167_v54 = vld [vmem:[#allocation2 + $0x2b] sm:$0xff] }
 0x4c5   : > { %v10439_v21 = vunpack.i.h.bf16 %v10437_v18  ;;  %v10438_v23 = vunpack.i.l.bf16 %v10437_v18  ;;  %v7785_v18 = vld [vmem:[%s11128_s17 + $0x3e0] sm:$0xff]  }
 0x4c6   : > { %v2857_v29 = vsel %vm448_vm0, %v11456_v30, %v10443_v33  ;;  %v7743_v30 = vld [vmem:[%s11128_s17 + $0x290] sm:$0xff]   ;;  %v3184_v33 = vld [vmem:[#allocation2 + $0x8] sm:$0xff] }
 0x4c7   : > { %v2856_v40 = vsel %vm448_vm0, %v11469_v52, %v10438_v23  ;;  %v2852_v24 = vsel %vm448_vm0, %v11463_v48, %v10439_v21  ;;  %v7742_v52 = vld [vmem:[%s11128_s17 + $0x288] sm:$0xff]   ;;  %v2853_v48 = vsel %vm448_vm0, %v11465_v16, %v10444_v26  ;;  %v7777_v21 = vld [vmem:[%s11128_s17 + $0x3a0] sm:$0xff]   ;;  %v7788_v26 = vld [vmem:[%s11128_s17 + $0x3f8] sm:$0xff]  }
 0x4c8   : > { %3022 = vmatprep.mubr.f32.mxu1 %v2856_v40  ;;  %v7786_v23 = vld [vmem:[%s11128_s17 + $0x3e8] sm:$0xff]  }
 0x4c9   : > { %3023 = vmatmul.mubr.f32.vlgmr.msra.gmra.mrb[28].mxu1 %v2852_v24  ;;  %v10452_v37 = vpop.permute.xlu1 %10451  ;;  %v7778_v40 = vld [vmem:[%s11128_s17 + $0x3a8] sm:$0xff]   ;;  %v7787_v24 = vld [vmem:[%s11128_s17 + $0x3f0] sm:$0xff]  }
 0x4ca   : > { %v10447_v32 = vpop.permute.xlu0 %10446  ;;  %9644 = vmatpush3.bf16.msra.mxu1 %v7741_v59  ;;  %3027 = vmatprep.mubr.f32.mxu1 %v2857_v29  ;;  %v10453_v42 = vunpack.i.l.bf16 %v10452_v37  ;;  %v10454_v45 = vunpack.i.h.bf16 %v10452_v37  ;;  %v7779_v59 = vld [vmem:[%s11128_s17 + $0x3b0] sm:$0xff]   ;;  %v3186_v37 = vld [vmem:[#allocation2 + $0x28] sm:$0xff] }
 0x4cb   : > { %v10448_v25 = vunpack.i.l.bf16 %v10447_v32  ;;  %9646 = vmatprep.subr.bf16.mxu1 %v7750_v28  ;;  %v10449_v38 = vunpack.i.h.bf16 %v10447_v32  ;;  %v7780_v32 = vld [vmem:[%s11128_s17 + $0x3b8] sm:$0xff]   ;;  %v3180_v28 = vld [vmem:[#allocation2 + $0x7] sm:$0xff]  ;;  %v3181_v29 = vld [vmem:[#allocation2 + $0xf] sm:$0xff] }
 0x4cc   : > { %v2859_v16 = vsel %vm448_vm0, %v11475_v39, %v10453_v42  ;;  %v2855_v51 = vsel %vm448_vm0, %v11485_v9, %v10454_v45  ;;  %v7745_v39 = vld [vmem:[%s11128_s17 + $0x2a0] sm:$0xff]   ;;  %v7747_v9 = vld [vmem:[%s11128_s17 + $0x2b0] sm:$0xff]  }
 0x4cd   : > { %3028 = vmatmul.mubr.f32.gmra.mrb[30].mxu1 %v2853_v48  ;;  %v2858_v2 = vsel %vm448_vm0, %v11488_v20, %v10448_v25  ;;  %v2854_v47 = vsel %vm448_vm0, %v11483_v35, %v10449_v38  ;;  %v7744_v20 = vld [vmem:[%s11128_s17 + $0x298] sm:$0xff]   ;;  %v3168_v35 = vld [vmem:[#allocation2 + $0x4] sm:$0xff]  ;;  %v3185_v25 = vld [vmem:[#allocation2 + $0x10] sm:$0xff] }
 0x4ce   : > { %9648 = vmatpush3.bf16.msra.mxu1 %v7742_v52  ;;  %3032 = vmatprep.mubr.f32.mxu1 %v2858_v2  ;;  %v3182_v52 = vld [vmem:[#allocation2 + $0x27] sm:$0xff]  ;;  %v3187_v38 = vld [vmem:[#allocation2 + $0x30] sm:$0xff] }
 0x4cf   : > { %9650 = vmatprep.subr.bf16.mxu1 %v7751_v41  ;;  %v3183_v48 = vld [vmem:[#allocation2 + $0x2f] sm:$0xff] }
 0x4d1   : > { %3033 = vmatmul.mubr.f32.gmra.mrb[32].mxu1 %v2854_v47 }
 0x4d2   : > { %9652 = vmatpush3.bf16.msra.mxu1 %v7743_v30  ;;  %3037 = vmatprep.mubr.f32.mxu1 %v2859_v16 }
 0x4d3   : > { %9654 = vmatprep.subr.bf16.mxu1 %v7752_v49 }
 0x4d5   : > { %3038 = vmatmul.mubr.f32.gmra.mrb[34].mxu1 %v2855_v51 }
 0x4d6   : > { %9656 = vmatpush3.bf16.msra.mxu1 %v7744_v20  ;;  %3633 = vmatprep.mubr.f32.mxu1 %v3168_v35 }
 0x4d7   : > { %9658 = vmatprep.subr.bf16.mxu1 %v7753_v58 }
 0x4da   : > { %9660 = vmatpush3.bf16.msra.mxu1 %v7745_v39 }
 0x4db   : > { %9662 = vmatprep.subr.bf16.mxu1 %v7754_v57 }
 0x4de   : > { %9664 = vmatpush3.bf16.msra.mxu1 %v7746_v0 }
 0x4df   : > { %9666 = vmatprep.subr.bf16.mxu1 %v7755_v55 }
 0x4e2   : > { %9668 = vmatpush3.bf16.msra.mxu1 %v7747_v9 }
 0x4e3   : > { %9670 = vmatprep.subr.bf16.mxu1 %v7756_v5 }
 0x4e6   : > { %9672 = vmatpush3.bf16.msra.mxu1 %v7748_v61 }
 0x4e7   : > { %9706 = vmatprep.subr.bf16.mxu1 %v7781_v1 }
 0x4e9   : > { %3634 = vmatmul.mubr.f32.vlgmr.msra.gmra.mrb[36].mxu1 %v3164_v27 }
 0x4ea   : > { %3638 = vmatprep.mubr.f32.mxu1 %v3169_v3  ;;  %9708 = vmatpush3.bf16.msra.mxu1 %v7773_v6 }
 0x4eb   : > { %9710 = vmatprep.subr.bf16.mxu1 %v7782_v11 }
 0x4ed   : > { %3639 = vmatmul.mubr.f32.gmra.mrb[38].mxu1 %v3165_v17 }
 0x4ee   : > { %3643 = vmatprep.mubr.f32.mxu1 %v3170_v44  ;;  %9712 = vmatpush3.bf16.msra.mxu1 %v7774_v15 }
 0x4ef   : > { %9714 = vmatprep.subr.bf16.mxu1 %v7783_v13 }
 0x4f1   : > { %3644 = vmatmul.mubr.f32.gmra.mrb[40].mxu1 %v3166_v43 }
 0x4f2   : > { %3648 = vmatprep.mubr.f32.mxu1 %v3171_v60  ;;  %9716 = vmatpush3.bf16.msra.mxu1 %v7775_v34 }
 0x4f3   : > { %9718 = vmatprep.subr.bf16.mxu1 %v7784_v63 }
 0x4f5   : > { %3649 = vmatmul.mubr.f32.gmra.mrb[42].mxu1 %v3167_v54  ;;  %v7813_v54 = vld [vmem:[%s11265_s30 + $0x180] sm:$0xff]  }
 0x4f6   : > { %9720 = vmatpush3.bf16.msra.mxu1 %v7776_v7  ;;  %3803 = vmatprep.mubr.f32.mxu1 %v3184_v33  ;;  %v7821_v7 = vld [vmem:[%s11265_s30 + $0x1c0] sm:$0xff]  }
 0x4f7   : > { %9722 = vmatprep.subr.bf16.mxu1 %v7785_v18  ;;  %v7822_v18 = vld [vmem:[%s11265_s30 + $0x1c8] sm:$0xff]   ;;  %9802 = vmatprep.subr.bf16.mxu0 %v7821_v7  ;;  %v7805_v33 = vld [vmem:[%s11265_s30 + $0x140] sm:$0xff]   ;;  %v7819_v7 = vld [vmem:[%s11265_s30 + $0x1b0] sm:$0xff]  }
 0x4f8   : > { %9804 = vmatpush3.bf16.msra.mxu0 %v7813_v54 }
 0x4f9   : > { %9806 = vmatprep.subr.bf16.mxu0 %v7822_v18  ;;  %v7828_v18 = vld [vmem:[%s11265_s30 + $0x1f8] sm:$0xff]  }
 0x4fa   : > { %9724 = vmatpush3.bf16.msra.mxu1 %v7777_v21  ;;  %v7797_v21 = vld [vmem:[%s11265_s30 + $0x100] sm:$0xff]  }
 0x4fb   : > { %9726 = vmatprep.subr.bf16.mxu1 %v7786_v23  ;;  %v7814_v23 = vld [vmem:[%s11265_s30 + $0x188] sm:$0xff]  }
 0x4fc   : > { %9808 = vmatpush3.bf16.msra.mxu0 %v7814_v23 }
 0x4fe   : > { %9728 = vmatpush3.bf16.msra.mxu1 %v7778_v40  ;;  %v7806_v40 = vld [vmem:[%s11265_s30 + $0x148] sm:$0xff]  }
 0x4ff   : > { %9730 = vmatprep.subr.bf16.mxu1 %v7787_v24  ;;  %v7823_v24 = vld [vmem:[%s11265_s30 + $0x1d0] sm:$0xff]  }
 0x500   : > { %9810 = vmatprep.subr.bf16.mxu0 %v7823_v24 }
 0x502   : > { %9732 = vmatpush3.bf16.msra.mxu1 %v7779_v59  ;;  %v7798_v59 = vld [vmem:[%s11265_s30 + $0x108] sm:$0xff]  }
 0x503   : > { %9734 = vmatprep.subr.bf16.mxu1 %v7788_v26  ;;  %v7807_v26 = vld [vmem:[%s11265_s30 + $0x150] sm:$0xff]  }
 0x506   : > { %9736 = vmatpush3.bf16.msra.mxu1 %v7780_v32  ;;  %v7815_v32 = vld [vmem:[%s11265_s30 + $0x190] sm:$0xff]  }
 0x507   : > { %9770 = vmatprep.subr.bf16.mxu1 %v7805_v33  ;;  %9812 = vmatpush3.bf16.msra.mxu0 %v7815_v32 }
 0x509   : > { %3804 = vmatmul.mubr.f32.vlgmr.msra.gmra.mrb[44].mxu1 %v3180_v28  ;;  %v7824_v28 = vld [vmem:[%s11265_s30 + $0x1d8] sm:$0xff]  }
 0x50a   : > { %3808 = vmatprep.mubr.f32.mxu1 %v3185_v25  ;;  %9772 = vmatpush3.bf16.msra.mxu1 %v7797_v21  ;;  %v7799_v25 = vld [vmem:[%s11265_s30 + $0x110] sm:$0xff]  }
 0x50b   : > { %9774 = vmatprep.subr.bf16.mxu1 %v7806_v40  ;;  %9814 = vmatprep.subr.bf16.mxu0 %v7824_v28 }
 0x50d   : > { %3809 = vmatmul.mubr.f32.gmra.mrb[46].mxu1 %v3181_v29  ;;  %v7808_v29 = vld [vmem:[%s11265_s30 + $0x158] sm:$0xff]  }
 0x50e   : > { %3813 = vmatprep.mubr.f32.mxu1 %v3186_v37  ;;  %9776 = vmatpush3.bf16.msra.mxu1 %v7798_v59  ;;  %v7816_v37 = vld [vmem:[%s11265_s30 + $0x198] sm:$0xff]  }
 0x50f   : > { %9778 = vmatprep.subr.bf16.mxu1 %v7807_v26  ;;  %9816 = vmatpush3.bf16.msra.mxu0 %v7816_v37 }
 0x511   : > { %3814 = vmatmul.mubr.f32.gmra.mrb[48].mxu1 %v3182_v52  ;;  %v6258_v52 = vld [vmem:[%s11294_s10 + $0x4] sm:$0x7] }
 0x512   : > { %3818 = vmatprep.mubr.f32.mxu1 %v3187_v38  ;;  %v7825_v38 = vld [vmem:[%s11265_s30 + $0x1e0] sm:$0xff]   ;;  %9780 = vmatpush3.bf16.msra.mxu1 %v7799_v25  ;;  %v2326_v59 = vrot.slane %v6258_v52, %v11208_v56 }
 0x513   : > { %9782 = vmatprep.subr.bf16.mxu1 %v7808_v29  ;;  %9818 = vmatprep.subr.bf16.mxu0 %v7825_v38 }
 0x515   : > { %3819 = vmatmul.mubr.f32.gmra.mrb[50].mxu1 %v3183_v48  ;;  %v7800_v48 = vld [vmem:[%s11265_s30 + $0x118] sm:$0xff]  }
 0x516   : > { %9784 = vmatpush3.bf16.msra.mxu1 %v7800_v48 }
 0x522   : > { %v11580_v41 = vpop.f32.mrb[28].mxu0 }
 0x523   : > { %v11582_v42 = vpop.f32.mrb[29].mxu0 }
 0x528   : > { %v11584_v2 = vpop.f32.mrb[30].mxu0 }
 0x529   : > { %v11586_v30 = vpop.f32.mrb[31].mxu0 }
 0x542   : > { %v8225_v45 = vpop.f32.mrb[32].mxu0 }
 0x543   : > { %v8226_v47 = vpop.f32.mrb[33].mxu0 }
 0x544   : > { %v11588_v49 = vadd.f32 %v8226_v47, %v8225_v45  ;;  %v7809_v45 = vld [vmem:[%s11265_s30 + $0x160] sm:$0xff]   ;;  %v2213_v47 = vrot.slane %v6258_v52, %v11197_v53 }
 0x545   : > { %9786 = vmatprep.subr.bf16.mxu1 %v7809_v45 }
 0x546   : > { %v8228_v16 = vpop.f32.mrb[34].mxu0  ;;  %v2303_v32 = vadd.f32 %v11412_v14, %v2213_v47 }
 0x547   : > { %v8229_v20 = vpop.f32.mrb[35].mxu0 }
 0x548   : > { %v11590_v51 = vadd.f32 %v8229_v20, %v8228_v16  ;;  %v7817_v16 = vld [vmem:[%s11265_s30 + $0x1a0] sm:$0xff]   ;;  %v7826_v20 = vld [vmem:[%s11265_s30 + $0x1e8] sm:$0xff]  }
 0x549   : > { %9820 = vmatpush3.bf16.msra.mxu0 %v7817_v16 }
 0x54a   : > { %v8231_v58 = vpop.f32.mrb[36].mxu0  ;;  %9822 = vmatprep.subr.bf16.mxu0 %v7826_v20  ;;  %v2313_v20 = vmax.f32 %v2303_v32, 0.0 }
 0x54b   : > { %v8232_v35 = vpop.f32.mrb[37].mxu0 }
 0x54c   : > { %v11592_v39 = vadd.f32 %v8232_v35, %v8231_v58  ;;  %v6264_v58 = vld [vmem:[%s11294_s10 + $0xc] sm:$0x7]  ;;  %v7801_v35 = vld [vmem:[%s11265_s30 + $0x120] sm:$0xff]  }
 0x54d   : > { %9788 = vmatpush3.bf16.msra.mxu1 %v7801_v35  ;;  %v3135_v23 = vrot.slane %v6264_v58, %v11205_v46  ;;  %v3143_v28 = vrot.slane %v6264_v58, %v11208_v56  ;;  %v2308_v35 = vadd.f32 %v11416_v19, %v2213_v47 }
 0x54e   : > { %v8234_v57 = vpop.f32.mrb[38].mxu0 }
 0x54f   : > { %v8235_v0 = vpop.f32.mrb[39].mxu0 }
 0x550   : > { %v11594_v55 = vadd.f32 %v8235_v0, %v8234_v57  ;;  %v2293_v57 = vadd.f32 %v11408_v10, %v2213_v47  ;;  %v7818_v0 = vld [vmem:[%s11265_s30 + $0x1a8] sm:$0xff]  }
 0x551   : > { %9824 = vmatpush3.bf16.msra.mxu0 %v7818_v0 }
 0x562   : > { %v8313_v9 = vpop.f32.mrb[40].mxu0 }
 0x563   : > { %v8314_v5 = vpop.f32.mrb[41].mxu0 }
 0x564   : > { %v11596_v61 = vadd.f32 %v8314_v5, %v8313_v9  ;;  %v2945_v5 = vrot.slane %v6264_v58, %v11197_v53 }
 0x566   : > { %v8316_v1 = vpop.f32.mrb[42].mxu0 }
 0x567   : > { %v8317_v6 = vpop.f32.mrb[43].mxu0 }
 0x568   : > { %v11598_v27 = vadd.f32 %v8317_v6, %v8316_v1  ;;  %v7827_v1 = vld [vmem:[%s11265_s30 + $0x1f0] sm:$0xff]  }
 0x569   : > { %9826 = vmatprep.subr.bf16.mxu0 %v7827_v1 }
 0x56a   : > { %v8319_v11 = vpop.f32.mrb[44].mxu0  ;;  %9828 = vmatpush3.bf16.msra.mxu0 %v7819_v7 }
 0x56b   : > { %v8320_v3 = vpop.f32.mrb[45].mxu0  ;;  %9830 = vmatprep.subr.bf16.mxu0 %v7828_v18 }
 0x56c   : > { %v11600_v15 = vadd.f32 %v8320_v3, %v8319_v11  ;;  %v2311_v3 = vmax.f32 %v2293_v57, 0.0 }
 0x56e   : > { %v8322_v17 = vpop.f32.mrb[46].mxu0 }
 0x56f   : > { %v8323_v13 = vpop.f32.mrb[47].mxu0 }
 0x570   : > { %v11602_v44 = vadd.f32 %v8323_v13, %v8322_v17  ;;  %v2318_v17 = vrot.slane %v6258_v52, %v11205_v46  ;;  %v2298_v13 = vadd.f32 %v11410_v8, %v2213_v47 }
 0x572   : > { %v2319_v24 = vmul.f32 %v2318_v17, %v2311_v3  ;;  %v2312_v26 = vmax.f32 %v2298_v13, 0.0  ;;  %v2321_v13 = vmul.f32 %v2318_v17, %v2313_v20 }
 0x574   : > { %v2327_v45 = vadd.f32 %v2326_v59, %v2319_v24  ;;  %v2320_v16 = vmul.f32 %v2318_v17, %v2312_v26 }
 0x576   : > { %v2328_v3 = vadd.f32 %v2326_v59, %v2320_v16 }
 0x582   : > { %v11604_v34 = vpop.f32.mrb[48].mxu0 }
 0x583   : > { %v11606_v43 = vpop.f32.mrb[49].mxu0 }
 0x586   : > { %v11608_v63 = vpop.f32.mrb[50].mxu0 }
 0x587   : > { %v11610_v60 = vpop.f32.mrb[51].mxu0 }
 0x59c   : > { %v8169_v9 = vpop.f32.mrb[28].mxu1 }
 0x59d   : > { %v8170_v6 = vpop.f32.mrb[29].mxu1 }
 0x59e   : > { %v8171_v11 = vadd.f32 %v8170_v6, %v8169_v9 }
 0x5a0   : > { %v3025_v54 = vadd.f32 %v8171_v11, %v2945_v5  ;;  %v8172_v10 = vpop.f32.mrb[30].mxu1 }
 0x5a1   : > { %v8173_v33 = vpop.f32.mrb[31].mxu1 }
 0x5a2   : > { %v3110_v21 = vadd.f32 %v11582_v42, %v3025_v54  ;;  %v8174_v40 = vadd.f32 %v8173_v33, %v8172_v10  ;;  %v2329_v33 = vadd.f32 %v2326_v59, %v2321_v13 }
 0x5a4   : > { %v3128_v8 = vmax.f32 %v3110_v21, 0.0  ;;  %v3030_v25 = vadd.f32 %v8174_v40, %v2945_v5  ;;  %v8175_v29 = vpop.f32.mrb[32].mxu1 }
 0x5a5   : > { %v8176_v37 = vpop.f32.mrb[33].mxu1 }
 0x5a6   : > { %v3136_v38 = vmul.f32 %v3135_v23, %v3128_v8  ;;  %v3115_v42 = vadd.f32 %v11580_v41, %v3030_v25  ;;  %v8177_v48 = vadd.f32 %v8176_v37, %v8175_v29  ;;  %v2314_v41 = vmax.f32 %v2308_v35, 0.0  ;;  %v6269_v29 = vld [vmem:[%s11294_s10 + $0x10] sm:$0x7] }
 0x5a7   : > { %v3483_v37 = vrot.slane %v6269_v29, %v11197_v53 }
 0x5a8   : > { %v3144_v52 = vadd.f32 %v3143_v28, %v3136_v38  ;;  %v3129_v57 = vmax.f32 %v3115_v42, 0.0  ;;  %v3035_v0 = vadd.f32 %v8177_v48, %v2945_v5  ;;  %v8178_v14 = vpop.f32.mrb[34].mxu1  ;;  %v2322_v21 = vmul.f32 %v2318_v17, %v2314_v41 }
 0x5a9   : > { %v8179_v9 = vpop.f32.mrb[35].mxu1  ;;  %v3556_v16 = vadd.f32 %v11590_v51, %v3483_v37 }
 0x5aa   : > { %v3137_v1 = vmul.f32 %v3135_v23, %v3129_v57  ;;  %v3120_v58 = vadd.f32 %v11586_v30, %v3035_v0  ;;  %v8180_v6 = vadd.f32 %v8179_v9, %v8178_v14  ;;  %v11652_v11 = vadd.f32 %v3144_v52, %v2327_v45 }
 0x5ab   : > { %v2330_v32 = vadd.f32 %v2326_v59, %v2322_v21  ;;  %v3561_v52 = vadd.f32 %v11592_v39, %v3483_v37 }
 0x5ac   : > { %v3145_v7 = vadd.f32 %v3143_v28, %v3137_v1  ;;  %v3130_v54 = vmax.f32 %v3120_v58, 0.0  ;;  %v3040_v10 = vadd.f32 %v8180_v6, %v2945_v5  ;;  %v3566_v1 = vadd.f32 %v11594_v55, %v3483_v37 }
 0x5ae   : > { %v3138_v18 = vmul.f32 %v3135_v23, %v3130_v54  ;;  %v3125_v19 = vadd.f32 %v11584_v2, %v3040_v10  ;;  %v11655_v47 = vadd.f32 %v3145_v7, %v2328_v3  ;;  %v3551_v2 = vadd.f32 %v11588_v49, %v3483_v37 }
 0x5b0   : > { %v3146_v40 = vadd.f32 %v3143_v28, %v3138_v18  ;;  %v3131_v24 = vmax.f32 %v3125_v19, 0.0  ;;  %v3924_v19 = vrot.slane %v6269_v29, %v11208_v56 }
 0x5b2   : > { %v3139_v30 = vmul.f32 %v3135_v23, %v3131_v24  ;;  %v11657_v26 = vadd.f32 %v3146_v40, %v2329_v33 }
 0x5b4   : > { %v3147_v8 = vadd.f32 %v3143_v28, %v3139_v30 }
 0x5b6   : > { %v11659_v25 = vadd.f32 %v3147_v8, %v2330_v32 }
 0x5bc   : > { %v8269_v5 = vpop.f32.mrb[36].mxu1 }
 0x5bd   : > { %v8270_v38 = vpop.f32.mrb[37].mxu1 }
 0x5be   : > { %v8271_v42 = vadd.f32 %v8270_v38, %v8269_v5 }
 0x5c0   : > { %v3636_v48 = vadd.f32 %v8271_v42, %v3551_v2  ;;  %v8272_v45 = vpop.f32.mrb[38].mxu1 }
 0x5c1   : > { %v8273_v17 = vpop.f32.mrb[39].mxu1 }
 0x5c2   : > { %v8274_v23 = vadd.f32 %v8273_v17, %v8272_v45  ;;  %v3721_v20 = vadd.f32 %v11596_v61, %v3636_v48  ;;  %v7820_v45 = vld [vmem:[%s11265_s30 + $0x1b8] sm:$0xff]   ;;  %v7802_v17 = vld [vmem:[%s11265_s30 + $0x128] sm:$0xff]  }
 0x5c3   : > { %9832 = vmatpush3.bf16.msra.mxu0 %v7820_v45 }
 0x5c4   : > { %v3641_v59 = vadd.f32 %v8274_v23, %v3556_v16  ;;  %v8275_v28 = vpop.f32.mrb[40].mxu1 }
 0x5c5   : > { %v8276_v35 = vpop.f32.mrb[41].mxu1 }
 0x5c6   : > { %v8277_v57 = vadd.f32 %v8276_v35, %v8275_v28  ;;  %v3726_v0 = vadd.f32 %v11598_v27, %v3641_v59  ;;  %v3916_v27 = vrot.slane %v6269_v29, %v11205_v46  ;;  %v7811_v35 = vld [vmem:[%s11265_s30 + $0x170] sm:$0xff]  }
 0x5c8   : > { %v3646_v14 = vadd.f32 %v8277_v57, %v3561_v52  ;;  %v8278_v9 = vpop.f32.mrb[42].mxu1  ;;  %v7803_v52 = vld [vmem:[%s11265_s30 + $0x130] sm:$0xff]  }
 0x5c9   : > { %v8279_v49 = vpop.f32.mrb[43].mxu1 }
 0x5ca   : > { %v8280_v58 = vadd.f32 %v8279_v49, %v8278_v9  ;;  %v3731_v6 = vadd.f32 %v11600_v15, %v3646_v14 }
 0x5cc   : > { %v3651_v51 = vadd.f32 %v8280_v58, %v3566_v1 }
 0x5ce   : > { %v3736_v3 = vadd.f32 %v11602_v44, %v3651_v51  ;;  %v7804_v51 = vld [vmem:[%s11265_s30 + $0x138] sm:$0xff]  }
 0x5dc   : > { %v8357_v61 = vpop.f32.mrb[44].mxu1 }
 0x5dd   : > { %v8358_v13 = vpop.f32.mrb[45].mxu1 }
 0x5de   : > { %v8359_v41 = vadd.f32 %v8358_v13, %v8357_v61 }
 0x5e0   : > { %v3806_v7 = vadd.f32 %v8359_v41, %v3721_v20  ;;  %v8360_v54 = vpop.f32.mrb[46].mxu1  ;;  %v11683_v20 = vld [vmem:[%s11265_s30 + $0x200] sm:$0xff]  }
 0x5e1   : > { %v8361_v39 = vpop.f32.mrb[47].mxu1  ;;  %9834 = vmatprep.subr.bf16.mxu0 %v11683_v20 }
 0x5e2   : > { %v3891_v10 = vadd.f32 %v11606_v43, %v3806_v7  ;;  %v8362_v18 = vadd.f32 %v8361_v39, %v8360_v54 }
 0x5e4   : > { %v3909_v55 = vmax.f32 %v3891_v10, 0.0  ;;  %v3811_v33 = vadd.f32 %v8362_v18, %v3726_v0  ;;  %v8363_v21 = vpop.f32.mrb[48].mxu1  ;;  %v7841_v10 = vld [vmem:[%s11128_s17 + $0x480] sm:$0xff]  }
 0x5e5   : > { %v8364_v15 = vpop.f32.mrb[49].mxu1 }
 0x5e6   : > { %v3917_v40 = vmul.f32 %v3916_v27, %v3909_v55  ;;  %v3896_v44 = vadd.f32 %v11604_v34, %v3811_v33  ;;  %v8365_v24 = vadd.f32 %v8364_v15, %v8363_v21  ;;  %v7810_v34 = vld [vmem:[%s11265_s30 + $0x168] sm:$0xff]  }
 0x5e7   : > { %9790 = vmatprep.subr.bf16.mxu1 %v7810_v34 }
 0x5e8   : > { %v3925_v30 = vadd.f32 %v3924_v19, %v3917_v40  ;;  %v3910_v32 = vmax.f32 %v3896_v44, 0.0  ;;  %v3816_v8 = vadd.f32 %v8365_v24, %v3731_v6  ;;  %v8366_v43 = vpop.f32.mrb[50].mxu1  ;;  %9792 = vmatpush3.bf16.msra.mxu1 %v7802_v17  ;;  %v7812_v6 = vld [vmem:[%s11265_s30 + $0x178] sm:$0xff]  }
 0x5e9   : > { %v8367_v37 = vpop.f32.mrb[51].mxu1  ;;  %9794 = vmatprep.subr.bf16.mxu1 %v7811_v35 }
 0x5ea   : > { %3929 = vst.msk [vmem:[#allocation2 + $0x5] sm:$0xff] %vm448_vm0, %v3925_v30  ;;  %v3918_v29 = vmul.f32 %v3916_v27, %v3910_v32  ;;  %v3901_v5 = vadd.f32 %v11610_v60, %v3816_v8  ;;  %v8368_v38 = vadd.f32 %v8367_v37, %v8366_v43 }
 0x5ec   : > { %v3926_v2 = vadd.f32 %v3924_v19, %v3918_v29  ;;  %v3911_v42 = vmax.f32 %v3901_v5, 0.0  ;;  %v3821_v48 = vadd.f32 %v8368_v38, %v3736_v3  ;;  %9796 = vmatpush3.bf16.msra.mxu1 %v7803_v52 }
 0x5ed   : > { %9798 = vmatprep.subr.bf16.mxu1 %v7812_v6 }
 0x5ee   : > { %3930 = vst.msk [vmem:[#allocation2 + $0xd] sm:$0xff] %vm448_vm0, %v3926_v2  ;;  %v3919_v16 = vmul.f32 %v3916_v27, %v3911_v42  ;;  %v3906_v23 = vadd.f32 %v11608_v63, %v3821_v48 }
 0x5f0   : > { %v3927_v60 = vadd.f32 %v3924_v19, %v3919_v16  ;;  %v3912_v59 = vmax.f32 %v3906_v23, 0.0  ;;  %9800 = vmatpush3.bf16.msra.mxu1 %v7804_v51 }
 0x5f1   : > { %v3945_v3 = vld [vmem:[#allocation2 + $0x4] sm:$0xff]  ;;  %9850 = vmatprep.subr.bf16.mxu1 %v7841_v10 }
 0x5f2   : > { %3931 = vst.msk [vmem:[#allocation2 + $0x25] sm:$0xff] %vm448_vm0, %v3927_v60  ;;  %v3920_v28 = vmul.f32 %v3916_v27, %v3912_v59  ;;  %v3937_v13 = vld [vmem:[#allocation2 + $0x2] sm:$0xff] }
 0x5f3   : > { %v3949_v7 = vld [vmem:[#allocation2 + $0x5] sm:$0xff] }
 0x5f4   : > { %v3928_v57 = vadd.f32 %v3924_v19, %v3920_v28  ;;  %v11699_v18 = vld [vmem:[#allocation2 + $0x3] sm:$0xff] }
 0x5f5   : > { %v3954_v0 = vld [vmem:[#allocation2 + $0xe] sm:$0xff]  ;;  %v3953_v63 = vld [vmem:[#allocation2 + $0x6] sm:$0xff] }
 0x5f6   : > { %v3962_v14 = vld [vmem:[#allocation2 + $0x10] sm:$0xff]  ;;  %3932 = vst.msk [vmem:[#allocation2 + $0x2d] sm:$0xff] %vm448_vm0, %v3928_v57  ;;  %v3961_v49 = vld [vmem:[#allocation2 + $0x8] sm:$0xff] }
 0x5f7   : > { %v10460_v9 = vpack.i.bf16 %v3954_v0, %v3962_v14  ;;  %v10455_v1 = vpack.i.bf16 %v3953_v63, %v3961_v49  ;;  %v3938_v58 = vld [vmem:[#allocation2 + $0xa] sm:$0xff]  ;;  %v11701_v19 = vld [vmem:[#allocation2 + $0x1] sm:$0xff] }
 0x5f8   : > { %v3946_v61 = vld [vmem:[#allocation2 + $0xc] sm:$0xff] }
 0x5f9   : > { %10461 = vrot.lane.b32.xlu1 %v10460_v9, %s10824_s13  ;;  %10456 = vrot.lane.b32.xlu0 %v10455_v1, %s10824_s13  ;;  %v3957_v41 = vld [vmem:[#allocation2 + $0x7] sm:$0xff]  ;;  %v3958_v54 = vld [vmem:[#allocation2 + $0xf] sm:$0xff]  ;;  %v10480_v45 = vpack.i.bf16 %v3938_v58, %v3946_v61 }
 0x5fa   : > { %v11694_v39 = vld [vmem:[#allocation2 + $0xd] sm:$0xff]  ;;  %v3939_v37 = vld [vmem:[#allocation2 + $0x22] sm:$0xff] }
 0x5fb   : > { %v11697_v27 = vld [vmem:[#allocation2 + $0xb] sm:$0xff]  ;;  %v11715_v48 = vld [vmem:[#allocation2 + $0x23] sm:$0xff] }
 0x5fc   : > { %v11703_v55 = vld [vmem:[#allocation2 + $0x9] sm:$0xff]  ;;  %v11706_v33 = vld [vmem:[#allocation2 + $0x11] sm:$0xff]  ;;  %v11717_v17 = vld [vmem:[#allocation2 + $0x21] sm:$0xff] }
 0x5fd   : > { %4488 = vst [vmem:[#allocation2 + $0x5] sm:$0xff] %v11228_v22  ;;  %v3955_v21 = vld [vmem:[#allocation2 + $0x26] sm:$0xff]  ;;  %v3964_v40 = vld [vmem:[#allocation2 + $0x30] sm:$0xff]  ;;  %4489 = vst [vmem:[#allocation2 + $0xd] sm:$0xff] %v11234_v36 }
 0x5fe   : > { %v3963_v15 = vld [vmem:[#allocation2 + $0x28] sm:$0xff]  ;;  %v10470_v24 = vpack.i.bf16 %v3964_v40, %v3945_v3  ;;  %v11721_v23 = vld [vmem:[#allocation2 + $0x31] sm:$0xff] }
 0x5ff   : > { %v10465_v44 = vpack.i.bf16 %v3955_v21, %v3963_v15  ;;  %v3956_v30 = vld [vmem:[#allocation2 + $0x2e] sm:$0xff]  ;;  %v3947_v2 = vld [vmem:[#allocation2 + $0x24] sm:$0xff] }
 0x600   : > { %v3940_v32 = vld [vmem:[#allocation2 + $0x2a] sm:$0xff]  ;;  %10471 = vrot.lane.b32.xlu1 %v10470_v24, %s10824_s13  ;;  %v10475_v34 = vpack.i.bf16 %v3956_v30, %v3937_v13  ;;  %v10485_v59 = vpack.i.bf16 %v3939_v37, %v3947_v2  ;;  %v7832_v24 = vld [vmem:[%s11265_s30 + $0x218] sm:$0xff]  }
 0x601   : > { %v3948_v8 = vld [vmem:[#allocation2 + $0x2c] sm:$0xff]  ;;  %10466 = vrot.lane.b32.xlu0 %v10465_v44, %s10824_s13 }
 0x602   : > { %v3959_v43 = vld [vmem:[#allocation2 + $0x27] sm:$0xff]  ;;  %v3960_v29 = vld [vmem:[#allocation2 + $0x2f] sm:$0xff]  ;;  %v10490_v60 = vpack.i.bf16 %v3940_v32, %v3948_v8 }
 0x603   : > { %v11711_v5 = vld [vmem:[#allocation2 + $0x2d] sm:$0xff]  ;;  %v3951_v42 = vld [vmem:[#allocation2 + $0x25] sm:$0xff] }
 0x604   : > { %v11713_v38 = vld [vmem:[#allocation2 + $0x29] sm:$0xff]  ;;  %10481 = vrot.lane.b32.xlu1 %v10480_v45, %s10824_s13  ;;  %v7833_v32 = vld [vmem:[%s11128_s17 + $0x440] sm:$0xff]  }
 0x605   : > { %v11719_v16 = vld [vmem:[#allocation2 + $0x2b] sm:$0xff]  ;;  %10476 = vrot.lane.b32.xlu0 %v10475_v34, %s10824_s13  ;;  %v7857_v34 = vld [vmem:[%s11128_s17 + $0x500] sm:$0xff]  }
 0x606   : > { %4490 = vst [vmem:[#allocation2 + $0x25] sm:$0xff] %v11240_v50  ;;  %4491 = vst [vmem:[#allocation2 + $0x2d] sm:$0xff] %v11242_v62  ;;  %v7830_v49 = vld [vmem:[%s11265_s30 + $0x208] sm:$0xff]  }
 0x607   : > { %v7842_v2 = vld [vmem:[%s11128_s17 + $0x488] sm:$0xff]  }
 0x608   : > { %10491 = vrot.lane.b32.xlu1 %v10490_v60, %s10824_s13 }
 0x609   : > { %10486 = vrot.lane.b32.xlu0 %v10485_v59, %s10824_s13  ;;  %v7843_v59 = vld [vmem:[%s11128_s17 + $0x490] sm:$0xff]  }
 0x66b   : > { %v10462_v28 = vpop.permute.xlu1 %10461  ;;  %v10457_v35 = vpop.permute.xlu0 %10456 }
 0x66c   : > { %v10463_v52 = vunpack.i.l.bf16 %v10462_v28  ;;  %v10459_v57 = vunpack.i.h.bf16 %v10457_v35  ;;  %v10458_v0 = vunpack.i.l.bf16 %v10457_v35  ;;  %v10464_v9 = vunpack.i.h.bf16 %v10462_v28  ;;  %v7849_v35 = vld [vmem:[%s11128_s17 + $0x4c0] sm:$0xff]  }
 0x66e   : > { %v4043_v14 = vsel %vm448_vm0, %v3957_v41, %v10458_v0  ;;  %v4039_v63 = vsel %vm448_vm0, %v3949_v7, %v10459_v57  ;;  %v4044_v1 = vsel %vm448_vm0, %v3958_v54, %v10463_v52  ;;  %v4040_v13 = vsel %vm448_vm0, %v11694_v39, %v10464_v9  ;;  %v7831_v7 = vld [vmem:[%s11265_s30 + $0x210] sm:$0xff]   ;;  %v7858_v52 = vld [vmem:[%s11128_s17 + $0x508] sm:$0xff]   ;;  %v7844_v0 = vld [vmem:[%s11128_s17 + $0x498] sm:$0xff]  }
 0x66f   : > { %4358 = vmatprep.mubr.f32.mxu0 %v4043_v14  ;;  %v7835_v57 = vld [vmem:[%s11128_s17 + $0x450] sm:$0xff]   ;;  %v4504_v9 = vld [vmem:[#allocation2 + $0x3] sm:$0xff] }
 0x670   : > { %4359 = vmatmul.mubr.f32.vlgmr.msra.gmra.mrb[52].mxu0 %v4039_v63  ;;  %v7859_v63 = vld [vmem:[%s11128_s17 + $0x510] sm:$0xff]  }
 0x671   : > { %9836 = vmatpush3.bf16.msra.mxu0 %v11683_v20  ;;  %4363 = vmatprep.mubr.f32.mxu0 %v4044_v1  ;;  %v4496_v1 = vld [vmem:[#allocation2 + $0x1] sm:$0xff] }
 0x672   : > { %9838 = vmatprep.subr.bf16.mxu0 %v7830_v49  ;;  %v10472_v6 = vpop.permute.xlu1 %10471 }
 0x673   : > { %v10467_v58 = vpop.permute.xlu0 %10466  ;;  %v10473_v61 = vunpack.i.l.bf16 %v10472_v6  ;;  %v10474_v41 = vunpack.i.h.bf16 %v10472_v6  ;;  %v7837_v6 = vld [vmem:[%s11128_s17 + $0x460] sm:$0xff]  }
 0x674   : > { %v10469_v51 = vunpack.i.h.bf16 %v10467_v58  ;;  %v10468_v3 = vunpack.i.l.bf16 %v10467_v58  ;;  %4364 = vmatmul.mubr.f32.gmra.mrb[54].mxu0 %v4040_v13  ;;  %v7851_v58 = vld [vmem:[%s11128_s17 + $0x4d0] sm:$0xff]  }
 0x675   : > { %9840 = vmatpush3.bf16.msra.mxu0 %v7830_v49  ;;  %v4035_v54 = vsel %vm448_vm0, %v11699_v18, %v10473_v61  ;;  %v4046_v30 = vsel %vm448_vm0, %v3960_v29, %v10474_v41  ;;  %v7845_v49 = vld [vmem:[%s11128_s17 + $0x4a0] sm:$0xff]   ;;  %v7838_v61 = vld [vmem:[%s11128_s17 + $0x468] sm:$0xff]   ;;  %v7847_v13 = vld [vmem:[%s11128_s17 + $0x4b0] sm:$0xff]  }
 0x676   : > { %v4045_v20 = vsel %vm448_vm0, %v3959_v43, %v10468_v3  ;;  %v4041_v10 = vsel %vm448_vm0, %v3951_v42, %v10469_v51  ;;  %4273 = vmatprep.mubr.f32.mxu1 %v4035_v54  ;;  %v10482_v21 = vpop.permute.xlu1 %10481  ;;  %9842 = vmatprep.subr.bf16.mxu0 %v7831_v7  ;;  %v7846_v51 = vld [vmem:[%s11128_s17 + $0x4a8] sm:$0xff]   ;;  %v7861_v3 = vld [vmem:[%s11128_s17 + $0x520] sm:$0xff]   ;;  %v7839_v54 = vld [vmem:[%s11128_s17 + $0x470] sm:$0xff]  }
 0x677   : > { %4368 = vmatprep.mubr.f32.mxu0 %v4045_v20  ;;  %v10477_v15 = vpop.permute.xlu0 %10476  ;;  %v10483_v39 = vunpack.i.l.bf16 %v10482_v21  ;;  %v10484_v18 = vunpack.i.h.bf16 %v10482_v21  ;;  %v7853_v41 = vld [vmem:[%s11128_s17 + $0x4e0] sm:$0xff]   ;;  %v7848_v20 = vld [vmem:[%s11128_s17 + $0x4b8] sm:$0xff]   ;;  %v7863_v21 = vld [vmem:[%s11128_s17 + $0x530] sm:$0xff]  }
 0x678   : > { %v10479_v40 = vunpack.i.h.bf16 %v10477_v15  ;;  %v10478_v44 = vunpack.i.l.bf16 %v10477_v15  ;;  %4369 = vmatmul.mubr.f32.gmra.mrb[56].mxu0 %v4041_v10  ;;  %v7854_v10 = vld [vmem:[%s11128_s17 + $0x4e8] sm:$0xff]   ;;  %v7840_v15 = vld [vmem:[%s11128_s17 + $0x478] sm:$0xff]  }
 0x679   : > { %9844 = vmatpush3.bf16.msra.mxu0 %v7831_v7  ;;  %4373 = vmatprep.mubr.f32.mxu0 %v4046_v30  ;;  %v4036_v43 = vsel %vm448_vm0, %v11697_v27, %v10483_v39  ;;  %v7862_v7 = vld [vmem:[%s11128_s17 + $0x528] sm:$0xff]   ;;  %v7873_v39 = vld [vmem:[%s11128_s17 + $0x580] sm:$0xff]  }
 0x67a   : > { %v4031_v8 = vsel %vm448_vm0, %v11701_v19, %v10478_v44  ;;  %v4042_v37 = vsel %vm448_vm0, %v11711_v5, %v10479_v40  ;;  %9846 = vmatprep.subr.bf16.mxu0 %v7832_v24  ;;  %v10492_v29 = vpop.permute.xlu1 %10491  ;;  %v7834_v19 = vld [vmem:[%s11128_s17 + $0x448] sm:$0xff]   ;;  %v4032_v5 = vsel %vm448_vm0, %v11703_v55, %v10484_v18  ;;  %v7855_v40 = vld [vmem:[%s11128_s17 + $0x4f0] sm:$0xff]   ;;  %v7864_v44 = vld [vmem:[%s11128_s17 + $0x538] sm:$0xff]  }
 0x67b   : > { %v10487_v42 = vpop.permute.xlu0 %10486  ;;  %4274 = vmatmul.mubr.f32.vlgmr.msra.gmra.mrb[52].mxu1 %v4031_v8  ;;  %v10493_v28 = vunpack.i.l.bf16 %v10492_v29  ;;  %v4492_v30 = vld [vmem:[#allocation2] sm:$0xff]  ;;  %v11800_v18 = vld [vmem:[#allocation2 + $0x9] sm:$0xff]  ;;  %v7856_v8 = vld [vmem:[%s11128_s17 + $0x4f8] sm:$0xff]  }
 0x67c   : > { %v10488_v45 = vunpack.i.l.bf16 %v10487_v42  ;;  %9852 = vmatpush3.bf16.msra.mxu1 %v7833_v32  ;;  %4278 = vmatprep.mubr.f32.mxu1 %v4036_v43  ;;  %v10489_v27 = vunpack.i.h.bf16 %v10487_v42  ;;  %v7874_v32 = vld [vmem:[%s11128_s17 + $0x588] sm:$0xff]   ;;  %v7889_v43 = vld [vmem:[%s11128_s17 + $0x600] sm:$0xff]   ;;  %v7875_v42 = vld [vmem:[%s11128_s17 + $0x590] sm:$0xff]  }
 0x67d   : > { %4374 = vmatmul.mubr.f32.gmra.mrb[58].mxu0 %v4042_v37  ;;  %9854 = vmatprep.subr.bf16.mxu1 %v7842_v2  ;;  %v4038_v14 = vsel %vm448_vm0, %v11719_v16, %v10493_v28  ;;  %v7866_v37 = vld [vmem:[%s11128_s17 + $0x548] sm:$0xff]  }
 0x67e   : > { %9848 = vmatpush3.bf16.msra.mxu0 %v7832_v24  ;;  %8969 = vmatprep.mubr.msk.f32.mxu0 %vm448_vm0, %v11703_v55  ;;  %v4037_v60 = vsel %vm448_vm0, %v11715_v48, %v10488_v45  ;;  %v10494_v55 = vunpack.i.h.bf16 %v10492_v29  ;;  %v4033_v48 = vsel %vm448_vm0, %v11717_v17, %v10489_v27  ;;  %v7836_v17 = vld [vmem:[%s11128_s17 + $0x458] sm:$0xff]   ;;  %v7865_v24 = vld [vmem:[%s11128_s17 + $0x540] sm:$0xff]   ;;  %v11806_v2 = vld [vmem:[#allocation2 + $0x8] sm:$0xff] }
 0x67f   : > { %4279 = vmatmul.mubr.f32.gmra.mrb[54].mxu1 %v4032_v5  ;;  %9882 = vmatprep.subr.bf16.mxu0 %v7857_v34  ;;  %v4498_v29 = vld [vmem:[#allocation2 + $0x21] sm:$0xff]  ;;  %v4505_v27 = vld [vmem:[#allocation2 + $0xb] sm:$0xff] }
 0x680   : > { %9856 = vmatpush3.bf16.msra.mxu1 %v7834_v19  ;;  %4283 = vmatprep.mubr.f32.mxu1 %v4037_v60  ;;  %v4034_v16 = vsel %vm448_vm0, %v11713_v38, %v10494_v55  ;;  %v7881_v45 = vld [vmem:[%s11128_s17 + $0x5c0] sm:$0xff]   ;;  %v7890_v19 = vld [vmem:[%s11128_s17 + $0x608] sm:$0xff]   ;;  %v7867_v5 = vld [vmem:[%s11128_s17 + $0x550] sm:$0xff]  }
 0x681   : > { %8970 = vmatmul.mubr.msk.f32.vlgmr.msra.gmra.mrb[60].mxu0 %vm448_vm0, %v11706_v33  ;;  %9858 = vmatprep.subr.bf16.mxu1 %v7843_v59  ;;  %v7850_v33 = vld [vmem:[%s11128_s17 + $0x4c8] sm:$0xff]   ;;  %v4494_v60 = vld [vmem:[#allocation2 + $0x20] sm:$0xff]  ;;  %v7876_v59 = vld [vmem:[%s11128_s17 + $0x598] sm:$0xff]  }
 0x682   : > { %9884 = vmatpush3.bf16.msra.mxu0 %v7849_v35  ;;  %8972 = vmatprep.mubr.msk.f32.mxu0 %vm448_vm0, %v11713_v38  ;;  %v7852_v38 = vld [vmem:[%s11128_s17 + $0x4d8] sm:$0xff]   ;;  %v4500_v34 = vld [vmem:[#allocation2 + $0x2] sm:$0xff] }
 0x683   : > { %4284 = vmatmul.mubr.f32.gmra.mrb[56].mxu1 %v4033_v48  ;;  %9886 = vmatprep.subr.bf16.mxu0 %v7858_v52  ;;  %v11814_v28 = vld [vmem:[#allocation2 + $0x29] sm:$0xff]  ;;  %v7868_v48 = vld [vmem:[%s11128_s17 + $0x558] sm:$0xff]  }
 0x684   : > { %9860 = vmatpush3.bf16.msra.mxu1 %v7835_v57  ;;  %4288 = vmatprep.mubr.f32.mxu1 %v4038_v14  ;;  %v7882_v35 = vld [vmem:[%s11128_s17 + $0x5c8] sm:$0xff]   ;;  %v7891_v57 = vld [vmem:[%s11128_s17 + $0x610] sm:$0xff]   ;;  %v7877_v14 = vld [vmem:[%s11128_s17 + $0x5a0] sm:$0xff]  }
 0x685   : > { %8973 = vmatmul.mubr.msk.f32.gmra.mrb[62].mxu0 %vm448_vm0, %v11721_v23  ;;  %9862 = vmatprep.subr.bf16.mxu1 %v7844_v0  ;;  %v7860_v23 = vld [vmem:[%s11128_s17 + $0x518] sm:$0xff]   ;;  %v11818_v52 = vld [vmem:[#allocation2 + $0xa] sm:$0xff] }
 0x686   : > { %9888 = vmatpush3.bf16.msra.mxu0 %v7850_v33  ;;  %5039 = vmatprep.mubr.f32.mxu0 %v4504_v9  ;;  %v4506_v55 = vld [vmem:[#allocation2 + $0x23] sm:$0xff]  ;;  %v7883_v33 = vld [vmem:[%s11128_s17 + $0x5d0] sm:$0xff]   ;;  %v7892_v9 = vld [vmem:[%s11128_s17 + $0x618] sm:$0xff]  }
 0x687   : > { %4289 = vmatmul.mubr.f32.gmra.mrb[58].mxu1 %v4034_v16  ;;  %9890 = vmatprep.subr.bf16.mxu0 %v7859_v63  ;;  %v11823_v0 = vld [vmem:[#allocation2 + $0x28] sm:$0xff]  ;;  %v7869_v16 = vld [vmem:[%s11128_s17 + $0x560] sm:$0xff]  }
 0x688   : > { %9864 = vmatpush3.bf16.msra.mxu1 %v7836_v17  ;;  %4954 = vmatprep.mubr.f32.mxu1 %v4496_v1  ;;  %v4502_v63 = vld [vmem:[#allocation2 + $0x22] sm:$0xff]  ;;  %v4507_v17 = vld [vmem:[#allocation2 + $0x2b] sm:$0xff]  ;;  %v7884_v1 = vld [vmem:[%s11128_s17 + $0x5d8] sm:$0xff]  }
 0x689   : > { %9866 = vmatprep.subr.bf16.mxu1 %v7845_v49  ;;  %v7878_v49 = vld [vmem:[%s11128_s17 + $0x5a8] sm:$0xff]  }
 0x68a   : > { %9892 = vmatpush3.bf16.msra.mxu0 %v7851_v58  ;;  %v11833_v58 = vld [vmem:[#allocation2 + $0x2a] sm:$0xff] }
 0x68b   : > { %9894 = vmatprep.subr.bf16.mxu0 %v7860_v23  ;;  %v4520_v23 = vld [vmem:[#allocation2 + $0x7] sm:$0xff] }
 0x68c   : > { %9868 = vmatpush3.bf16.msra.mxu1 %v7837_v6  ;;  %v7870_v6 = vld [vmem:[%s11128_s17 + $0x568] sm:$0xff]  }
 0x68d   : > { %9870 = vmatprep.subr.bf16.mxu1 %v7846_v51  ;;  %v7879_v51 = vld [vmem:[%s11128_s17 + $0x5b0] sm:$0xff]  }
 0x68e   : > { %9896 = vmatpush3.bf16.msra.mxu0 %v7852_v38  ;;  %v7885_v38 = vld [vmem:[%s11128_s17 + $0x5e0] sm:$0xff]  }
 0x68f   : > { %9898 = vmatprep.subr.bf16.mxu0 %v7861_v3  ;;  %v7894_v3 = vld [vmem:[%s11128_s17 + $0x628] sm:$0xff]  }
 0x690   : > { %9872 = vmatpush3.bf16.msra.mxu1 %v7838_v61  ;;  %v7871_v61 = vld [vmem:[%s11128_s17 + $0x570] sm:$0xff]  }
 0x691   : > { %9874 = vmatprep.subr.bf16.mxu1 %v7847_v13  ;;  %v7880_v13 = vld [vmem:[%s11128_s17 + $0x5b8] sm:$0xff]  }
 0x692   : > { %9900 = vmatpush3.bf16.msra.mxu0 %v7853_v41  ;;  %v7886_v41 = vld [vmem:[%s11128_s17 + $0x5e8] sm:$0xff]  }
 0x693   : > { %9902 = vmatprep.subr.bf16.mxu0 %v7862_v7  ;;  %v7895_v7 = vld [vmem:[%s11128_s17 + $0x630] sm:$0xff]  }
 0x694   : > { %9876 = vmatpush3.bf16.msra.mxu1 %v7839_v54  ;;  %v7872_v54 = vld [vmem:[%s11128_s17 + $0x578] sm:$0xff]  }
 0x695   : > { %9878 = vmatprep.subr.bf16.mxu1 %v7848_v20  ;;  %v7905_v20 = vld [vmem:[%s11128_s17 + $0x680] sm:$0xff]  }
 0x696   : > { %9904 = vmatpush3.bf16.msra.mxu0 %v7854_v10  ;;  %v7887_v10 = vld [vmem:[%s11128_s17 + $0x5f0] sm:$0xff]  }
 0x697   : > { %9906 = vmatprep.subr.bf16.mxu0 %v7863_v21  ;;  %v7896_v21 = vld [vmem:[%s11128_s17 + $0x638] sm:$0xff]  }
 0x698   : > { %9880 = vmatpush3.bf16.msra.mxu1 %v7840_v15  ;;  %v7897_v15 = vld [vmem:[%s11128_s17 + $0x640] sm:$0xff]  }
 0x699   : > { %9914 = vmatprep.subr.bf16.mxu1 %v7873_v39  ;;  %v4508_v39 = vld [vmem:[#allocation2 + $0x4] sm:$0xff] }
 0x69a   : > { %9908 = vmatpush3.bf16.msra.mxu0 %v7855_v40  ;;  %v7906_v40 = vld [vmem:[%s11128_s17 + $0x688] sm:$0xff]  }
 0x69b   : > { %4955 = vmatmul.mubr.f32.vlgmr.msra.gmra.mrb[60].mxu1 %v4492_v30  ;;  %9910 = vmatprep.subr.bf16.mxu0 %v7864_v44  ;;  %v7888_v44 = vld [vmem:[%s11128_s17 + $0x5f8] sm:$0xff]   ;;  %v7898_v30 = vld [vmem:[%s11128_s17 + $0x648] sm:$0xff]  }
 0x69c   : > { %4959 = vmatprep.mubr.f32.mxu1 %v11800_v18  ;;  %9916 = vmatpush3.bf16.msra.mxu1 %v7865_v24  ;;  %v7913_v24 = vld [vmem:[%s11128_s17 + $0x6c0] sm:$0xff]  }
 0x69d   : > { %9918 = vmatprep.subr.bf16.mxu1 %v7874_v32  ;;  %v4509_v32 = vld [vmem:[#allocation2 + $0xc] sm:$0xff] }
 0x69e   : > { %9912 = vmatpush3.bf16.msra.mxu0 %v7856_v8  ;;  %v7907_v8 = vld [vmem:[%s11128_s17 + $0x690] sm:$0xff]  }
 0x69f   : > { %4960 = vmatmul.mubr.f32.gmra.mrb[62].mxu1 %v11806_v2  ;;  %9946 = vmatprep.subr.bf16.mxu0 %v7889_v43  ;;  %v4516_v43 = vld [vmem:[#allocation2 + $0x6] sm:$0xff] }
 0x6a0   : > { %4964 = vmatprep.mubr.f32.mxu1 %v4498_v29  ;;  %9920 = vmatpush3.bf16.msra.mxu1 %v7866_v37  ;;  %v7914_v37 = vld [vmem:[%s11128_s17 + $0x6c8] sm:$0xff]  }
 0x6a1   : > { %5040 = vmatmul.mubr.f32.vlgmr.msra.gmra.mrb[64].mxu0 %v4500_v34  ;;  %9922 = vmatprep.subr.bf16.mxu1 %v7875_v42  ;;  %v4521_v42 = vld [vmem:[#allocation2 + $0xf] sm:$0xff]  ;;  %v4510_v29 = vld [vmem:[#allocation2 + $0x24] sm:$0xff] }
 0x6a2   : > { %5044 = vmatprep.mubr.f32.mxu0 %v4505_v27  ;;  %9948 = vmatpush3.bf16.msra.mxu0 %v7881_v45  ;;  %v7908_v45 = vld [vmem:[%s11128_s17 + $0x698] sm:$0xff]   ;;  %v4517_v34 = vld [vmem:[#allocation2 + $0xe] sm:$0xff] }
 0x6a3   : > { %4965 = vmatmul.mubr.f32.gmra.mrb[64].mxu1 %v4494_v60  ;;  %9950 = vmatprep.subr.bf16.mxu0 %v7890_v19  ;;  %v4522_v19 = vld [vmem:[#allocation2 + $0x27] sm:$0xff]  ;;  %v7900_v27 = vld [vmem:[%s11128_s17 + $0x658] sm:$0xff]  }
 0x6a4   : > { %4969 = vmatprep.mubr.f32.mxu1 %v11814_v28  ;;  %9924 = vmatpush3.bf16.msra.mxu1 %v7867_v5  ;;  %v4511_v5 = vld [vmem:[#allocation2 + $0x2c] sm:$0xff]  ;;  %v7909_v60 = vld [vmem:[%s11128_s17 + $0x6a0] sm:$0xff]  }
 0x6a5   : > { %5045 = vmatmul.mubr.f32.gmra.mrb[66].mxu0 %v11818_v52  ;;  %9926 = vmatprep.subr.bf16.mxu1 %v7876_v59  ;;  %v4518_v59 = vld [vmem:[#allocation2 + $0x26] sm:$0xff] }
 0x6a6   : > { %5049 = vmatprep.mubr.f32.mxu0 %v4506_v55  ;;  %9952 = vmatpush3.bf16.msra.mxu0 %v7882_v35  ;;  %v4523_v35 = vld [vmem:[#allocation2 + $0x2f] sm:$0xff] }
 0x6a7   : > { %4970 = vmatmul.mubr.f32.gmra.mrb[66].mxu1 %v11823_v0  ;;  %9954 = vmatprep.subr.bf16.mxu0 %v7891_v57  ;;  %v7901_v57 = vld [vmem:[%s11128_s17 + $0x660] sm:$0xff]   ;;  %v7910_v55 = vld [vmem:[%s11128_s17 + $0x6a8] sm:$0xff]  }
 0x6a8   : > { %9928 = vmatpush3.bf16.msra.mxu1 %v7868_v48  ;;  %5124 = vmatprep.mubr.f32.mxu1 %v11228_v22  ;;  %v7893_v22 = vld [vmem:[%s11128_s17 + $0x620] sm:$0xff]   ;;  %v4519_v48 = vld [vmem:[#allocation2 + $0x2e] sm:$0xff] }
 0x6a9   : > { %5050 = vmatmul.mubr.f32.gmra.mrb[68].mxu0 %v4502_v63  ;;  %9930 = vmatprep.subr.bf16.mxu1 %v7877_v14  ;;  %v7917_v14 = vld [vmem:[%s11128_s17 + $0x6e0] sm:$0xff]   ;;  %v7918_v63 = vld [vmem:[%s11128_s17 + $0x6e8] sm:$0xff]  }
 0x6aa   : > { %5054 = vmatprep.mubr.f32.mxu0 %v4507_v17  ;;  %9956 = vmatpush3.bf16.msra.mxu0 %v7883_v33  ;;  %v7911_v33 = vld [vmem:[%s11128_s17 + $0x6b0] sm:$0xff]   ;;  %v7912_v17 = vld [vmem:[%s11128_s17 + $0x6b8] sm:$0xff]  }
 0x6ab   : > { %9958 = vmatprep.subr.bf16.mxu0 %v7892_v9  ;;  %v7903_v9 = vld [vmem:[%s11128_s17 + $0x670] sm:$0xff]  }
 0x6ac   : > { %9932 = vmatpush3.bf16.msra.mxu1 %v7869_v16  ;;  %v7919_v16 = vld [vmem:[%s11128_s17 + $0x6f0] sm:$0xff]  }
 0x6ad   : > { %5055 = vmatmul.mubr.f32.gmra.mrb[70].mxu0 %v11833_v58  ;;  %9934 = vmatprep.subr.bf16.mxu1 %v7878_v49  ;;  %v7904_v49 = vld [vmem:[%s11128_s17 + $0x678] sm:$0xff]  }
 0x6ae   : > { %9960 = vmatpush3.bf16.msra.mxu0 %v7884_v1  ;;  %5209 = vmatprep.mubr.f32.mxu0 %v4520_v23  ;;  %v7920_v1 = vld [vmem:[%s11128_s17 + $0x6f8] sm:$0xff]  }
 0x6af   : > { %9962 = vmatprep.subr.bf16.mxu0 %v7893_v22  ;;  %v4524_v22 = vld [vmem:[#allocation2 + $0x10] sm:$0xff] }
 0x6b0   : > { %9936 = vmatpush3.bf16.msra.mxu1 %v7870_v6  ;;  %v4529_v23 = vld [vmem:[#allocation2 + $0x12] sm:$0xff] }
 0x6b1   : > { %9938 = vmatprep.subr.bf16.mxu1 %v7879_v51  ;;  %v4527_v6 = vld [vmem:[#allocation2 + $0x31] sm:$0xff] }
 0x6b2   : > { %9964 = vmatpush3.bf16.msra.mxu0 %v7885_v38  ;;  %v4531_v51 = vld [vmem:[#allocation2 + $0x32] sm:$0xff] }
 0x6b3   : > { %9966 = vmatprep.subr.bf16.mxu0 %v7894_v3 }
 0x6b4   : > { %9940 = vmatpush3.bf16.msra.mxu1 %v7871_v61 }
 0x6b5   : > { %9942 = vmatprep.subr.bf16.mxu1 %v7880_v13 }
 0x6b6   : > { %9968 = vmatpush3.bf16.msra.mxu0 %v7886_v41 }
 0x6b7   : > { %9970 = vmatprep.subr.bf16.mxu0 %v7895_v7 }
 0x6b8   : > { %9944 = vmatpush3.bf16.msra.mxu1 %v7872_v54 }
 0x6b9   : > { %9978 = vmatprep.subr.bf16.mxu1 %v7905_v20 }
 0x6ba   : > { %9972 = vmatpush3.bf16.msra.mxu0 %v7887_v10 }
 0x6bb   : > { %5125 = vmatmul.mubr.f32.vlgmr.msra.gmra.mrb[68].mxu1 %v4508_v39  ;;  %9974 = vmatprep.subr.bf16.mxu0 %v7896_v21 }
 0x6bc   : > { %5129 = vmatprep.mubr.f32.mxu1 %v11234_v36  ;;  %9980 = vmatpush3.bf16.msra.mxu1 %v7897_v15  ;;  %v7899_v36 = vld [vmem:[%s11128_s17 + $0x650] sm:$0xff]  }
 0x6bd   : > { %9982 = vmatprep.subr.bf16.mxu1 %v7906_v40 }
 0x6be   : > { %9976 = vmatpush3.bf16.msra.mxu0 %v7888_v44 }
 0x6bf   : > { %5130 = vmatmul.mubr.f32.gmra.mrb[70].mxu1 %v4509_v32  ;;  %10010 = vmatprep.subr.bf16.mxu0 %v7913_v24 }
 0x6c0   : > { %5134 = vmatprep.mubr.f32.mxu1 %v11240_v50  ;;  %9984 = vmatpush3.bf16.msra.mxu1 %v7898_v30  ;;  %v7915_v50 = vld [vmem:[%s11128_s17 + $0x6d0] sm:$0xff]  }
 0x6c1   : > { %5210 = vmatmul.mubr.f32.vlgmr.msra.gmra.mrb[72].mxu0 %v4516_v43  ;;  %9986 = vmatprep.subr.bf16.mxu1 %v7907_v8 }
 0x6c2   : > { %5214 = vmatprep.mubr.f32.mxu0 %v4521_v42  ;;  %10012 = vmatpush3.bf16.msra.mxu0 %v7913_v24 }
 0x6c3   : > { %5135 = vmatmul.mubr.f32.gmra.mrb[72].mxu1 %v4510_v29  ;;  %10014 = vmatprep.subr.bf16.mxu0 %v7914_v37 }
 0x6c4   : > { %5139 = vmatprep.mubr.f32.mxu1 %v11242_v62  ;;  %9988 = vmatpush3.bf16.msra.mxu1 %v7899_v36  ;;  %v7916_v62 = vld [vmem:[%s11128_s17 + $0x6d8] sm:$0xff]  }
 0x6c5   : > { %5215 = vmatmul.mubr.f32.gmra.mrb[74].mxu0 %v4517_v34  ;;  %9990 = vmatprep.subr.bf16.mxu1 %v7908_v45 }
 0x6c6   : > { %5219 = vmatprep.mubr.f32.mxu0 %v4522_v19  ;;  %10016 = vmatpush3.bf16.msra.mxu0 %v7914_v37 }
 0x6c7   : > { %5140 = vmatmul.mubr.f32.gmra.mrb[74].mxu1 %v4511_v5  ;;  %10018 = vmatprep.subr.bf16.mxu0 %v7915_v50 }
 0x6c8   : > { %9992 = vmatpush3.bf16.msra.mxu1 %v7900_v27  ;;  %5294 = vmatprep.mubr.f32.mxu1 %v11800_v18  ;;  %v7902_v18 = vld [vmem:[%s11128_s17 + $0x668] sm:$0xff]  }
 0x6c9   : > { %5220 = vmatmul.mubr.f32.gmra.mrb[76].mxu0 %v4518_v59  ;;  %9994 = vmatprep.subr.bf16.mxu1 %v7909_v60 }
 0x6ca   : > { %5224 = vmatprep.mubr.f32.mxu0 %v4523_v35  ;;  %10020 = vmatpush3.bf16.msra.mxu0 %v7915_v50 }
 0x6cb   : > { %10022 = vmatprep.subr.bf16.mxu0 %v7916_v62 }
 0x6cc   : > { %9996 = vmatpush3.bf16.msra.mxu1 %v7901_v57 }
 0x6cd   : > { %5225 = vmatmul.mubr.f32.gmra.mrb[78].mxu0 %v4519_v48  ;;  %9998 = vmatprep.subr.bf16.mxu1 %v7910_v55 }
 0x6ce   : > { %10024 = vmatpush3.bf16.msra.mxu0 %v7916_v62  ;;  %9007 = vmatprep.mubr.f32.mxu0 %v11818_v52  ;;  %v4526_v52 = vld [vmem:[#allocation2 + $0x11] sm:$0xff] }
 0x6cf   : > { %10026 = vmatprep.subr.bf16.mxu0 %v7917_v14 }
 0x6d0   : > { %10000 = vmatpush3.bf16.msra.mxu1 %v7902_v18 }
 0x6d1   : > { %10002 = vmatprep.subr.bf16.mxu1 %v7911_v33 }
 0x6d2   : > { %10028 = vmatpush3.bf16.msra.mxu0 %v7917_v14 }
 0x6d3   : > { %10030 = vmatprep.subr.bf16.mxu0 %v7918_v63 }
 0x6d4   : > { %10004 = vmatpush3.bf16.msra.mxu1 %v7903_v9 }
 0x6d5   : > { %10006 = vmatprep.subr.bf16.mxu1 %v7912_v17 }
 0x6d6   : > { %10032 = vmatpush3.bf16.msra.mxu0 %v7918_v63 }
 0x6d7   : > { %10034 = vmatprep.subr.bf16.mxu0 %v7919_v16 }
 0x6d8   : > { %10008 = vmatpush3.bf16.msra.mxu1 %v7904_v49 }
 0x6da   : > { %10036 = vmatpush3.bf16.msra.mxu0 %v7919_v16 }
 0x6db   : > { %5295 = vmatmul.mubr.f32.vlgmr.msra.gmra.mrb[76].mxu1 %v11806_v2  ;;  %10038 = vmatprep.subr.bf16.mxu0 %v7920_v1  ;;  %v4525_v2 = vld [vmem:[#allocation2 + $0x30] sm:$0xff] }
 0x6dc   : > { %5299 = vmatprep.mubr.f32.mxu1 %v4526_v52  ;;  %v7921_v52 = vld [vmem:[%s11265_s30 + $0x220] sm:$0xff]  }
 0x6de   : > { %10040 = vmatpush3.bf16.msra.mxu0 %v7920_v1  ;;  %v7929_v1 = vld [vmem:[%s11265_s30 + $0x260] sm:$0xff]  }
 0x6df   : > { %5300 = vmatmul.mubr.f32.gmra.mrb[78].mxu1 %v4524_v22  ;;  %v7930_v22 = vld [vmem:[%s11265_s30 + $0x268] sm:$0xff]   ;;  %10042 = vmatprep.subr.bf16.mxu1 %v7929_v1 }
 0x6e0   : > { %5304 = vmatprep.mubr.f32.mxu1 %v11814_v28  ;;  %v6270_v28 = vld [vmem:[%s11294_s10 + $0x14] sm:$0x7]  ;;  %10044 = vmatpush3.bf16.msra.mxu1 %v7921_v52 }
 0x6e1   : > { %9008 = vmatmul.mubr.f32.vlgmr.msra.gmra.mrb[80].mxu0 %v4529_v23  ;;  %v4471_v29 = vrot.slane %v6270_v28, %v11205_v46  ;;  %v4479_v27 = vrot.slane %v6270_v28, %v11208_v56  ;;  %10046 = vmatprep.subr.bf16.mxu1 %v7930_v22 }
 0x6e2   : > { %9010 = vmatprep.mubr.f32.mxu0 %v11833_v58  ;;  %v4196_v58 = vrot.slane %v6270_v28, %v11197_v53  ;;  %v7931_v28 = vld [vmem:[%s11265_s30 + $0x270] sm:$0xff]  }
 0x6e3   : > { %5305 = vmatmul.mubr.f32.gmra.mrb[80].mxu1 %v11823_v0 }
 0x6e4   : > { %5309 = vmatprep.mubr.f32.mxu1 %v4527_v6 }
 0x6e5   : > { %9011 = vmatmul.mubr.f32.gmra.mrb[82].mxu0 %v4531_v51 }
 0x6e7   : > { %5310 = vmatmul.mubr.f32.gmra.mrb[82].mxu1 %v4525_v2 }
 0x743   : > { %v8465_v38 = vpop.f32.mrb[52].mxu0 }
 0x744   : > { %v8466_v3 = vpop.f32.mrb[53].mxu0 }
 0x745   : > { %v8467_v61 = vadd.f32 %v8466_v3, %v8465_v38  ;;  %v7945_v38 = vld [vmem:[%s11265_s30 + $0x2e0] sm:$0xff]   ;;  %v7922_v3 = vld [vmem:[%s11265_s30 + $0x228] sm:$0xff]  }
 0x746   : > { %10074 = vmatprep.subr.bf16.mxu0 %v7945_v38  ;;  %10048 = vmatpush3.bf16.msra.mxu1 %v7922_v3 }
 0x747   : > { %v8468_v13 = vpop.f32.mrb[54].mxu0  ;;  %10050 = vmatprep.subr.bf16.mxu1 %v7931_v28 }
 0x748   : > { %v8469_v41 = vpop.f32.mrb[55].mxu0 }
 0x749   : > { %v8470_v7 = vadd.f32 %v8469_v41, %v8468_v13  ;;  %v7946_v13 = vld [vmem:[%s11265_s30 + $0x2e8] sm:$0xff]  }
 0x74b   : > { %v8471_v54 = vpop.f32.mrb[56].mxu0 }
 0x74c   : > { %v8472_v20 = vpop.f32.mrb[57].mxu0 }
 0x74d   : > { %v8473_v10 = vadd.f32 %v8472_v20, %v8471_v54  ;;  %v7938_v54 = vld [vmem:[%s11265_s30 + $0x2a8] sm:$0xff]  }
 0x74e   : > { %v8421_v21 = vpop.f32.mrb[52].mxu1 }
 0x74f   : > { %v8422_v0 = vpop.f32.mrb[53].mxu1 }
 0x750   : > { %v8423_v15 = vadd.f32 %v8422_v0, %v8421_v21  ;;  %v8474_v39 = vpop.f32.mrb[58].mxu0  ;;  %v7947_v21 = vld [vmem:[%s11265_s30 + $0x2f0] sm:$0xff]  }
 0x751   : > { %v8475_v40 = vpop.f32.mrb[59].mxu0 }
 0x752   : > { %v4276_v44 = vadd.f32 %v8423_v15, %v4196_v58  ;;  %v8476_v24 = vadd.f32 %v8475_v40, %v8474_v39  ;;  %v8424_v30 = vpop.f32.mrb[54].mxu1  ;;  %v7932_v15 = vld [vmem:[%s11265_s30 + $0x278] sm:$0xff]  }
 0x753   : > { %v8425_v32 = vpop.f32.mrb[55].mxu1  ;;  %v7948_v40 = vld [vmem:[%s11265_s30 + $0x2f8] sm:$0xff]  }
 0x754   : > { %v8426_v8 = vadd.f32 %v8425_v32, %v8424_v30  ;;  %v8971_v43 = vpop.f32.mrb[60].mxu0  ;;  %v4361_v37 = vadd.f32 %v8467_v61, %v4276_v44  ;;  %v7937_v61 = vld [vmem:[%s11265_s30 + $0x2a0] sm:$0xff]  }
 0x755   : > { %v4445_v42 = vpop.f32.mrb[61].mxu0  ;;  %10076 = vmatpush3.bf16.msra.mxu0 %v7937_v61  ;;  %v7933_v30 = vld [vmem:[%s11265_s30 + $0x280] sm:$0xff]  }
 0x756   : > { %v4281_v36 = vadd.f32 %v8426_v8, %v4196_v58  ;;  %v4446_v45 = vadd.f32 %v4445_v42, %v4361_v37  ;;  %v8427_v34 = vpop.f32.mrb[56].mxu1  ;;  %10078 = vmatprep.subr.bf16.mxu0 %v7946_v13  ;;  %v7940_v8 = vld [vmem:[%s11265_s30 + $0x2b8] sm:$0xff]   ;;  %v7934_v42 = vld [vmem:[%s11265_s30 + $0x288] sm:$0xff]  }
 0x757   : > { %v8428_v50 = vpop.f32.mrb[57].mxu1 }
 0x758   : > { %v4366_v19 = vadd.f32 %v8470_v7, %v4281_v36  ;;  %v4464_v5 = vmax.f32 %v4446_v45, 0.0  ;;  %v8429_v60 = vadd.f32 %v8428_v50, %v8427_v34  ;;  %v8974_v59 = vpop.f32.mrb[62].mxu0  ;;  %v11919_v36 = vld [vmem:[%s11294_s10 + $0x18] sm:$0x7] }
 0x759   : > { %v4455_v62 = vpop.f32.mrb[63].mxu0  ;;  %10080 = vmatpush3.bf16.msra.mxu0 %v7938_v54  ;;  %v4889_v34 = vrot.slane %v11919_v36, %v11197_v53 }
 0x75a   : > { %v4451_v35 = vadd.f32 %v8971_v43, %v4366_v19  ;;  %v4472_v57 = vmul.f32 %v4471_v29, %v4464_v5  ;;  %v4286_v55 = vadd.f32 %v8429_v60, %v4196_v58  ;;  %v8430_v48 = vpop.f32.mrb[58].mxu1  ;;  %10082 = vmatprep.subr.bf16.mxu0 %v7947_v21  ;;  %v7925_v43 = vld [vmem:[%s11265_s30 + $0x240] sm:$0xff]   ;;  %v7935_v19 = vld [vmem:[%s11265_s30 + $0x290] sm:$0xff]  }
 0x75b   : > { %v8431_v14 = vpop.f32.mrb[59].mxu1 }
 0x75c   : > { %v4465_v18 = vmax.f32 %v4451_v35, 0.0  ;;  %v4480_v33 = vadd.f32 %v4479_v27, %v4472_v57  ;;  %v4371_v63 = vadd.f32 %v8473_v10, %v4286_v55  ;;  %v8432_v9 = vadd.f32 %v8431_v14, %v8430_v48  ;;  %v7936_v48 = vld [vmem:[%s11265_s30 + $0x298] sm:$0xff]  }
 0x75e   : > { %v4473_v17 = vmul.f32 %v4471_v29, %v4465_v18  ;;  %v4456_v16 = vadd.f32 %v4455_v62, %v4371_v63  ;;  %v4291_v49 = vadd.f32 %v8432_v9, %v4196_v58  ;;  %v11890_v23 = vadd.f32 %v4480_v33, %v11652_v11  ;;  %v7923_v58 = vld [vmem:[%s11265_s30 + $0x230] sm:$0xff]  }
 0x75f   : > { %10052 = vmatpush3.bf16.msra.mxu1 %v7923_v58  ;;  %v7927_v62 = vld [vmem:[%s11265_s30 + $0x250] sm:$0xff]  }
 0x760   : > { %v4481_v6 = vadd.f32 %v4479_v27, %v4473_v17  ;;  %v4466_v51 = vmax.f32 %v4456_v16, 0.0  ;;  %v4376_v2 = vadd.f32 %v8476_v24, %v4291_v49  ;;  %10054 = vmatprep.subr.bf16.mxu1 %v7932_v15  ;;  %v7924_v24 = vld [vmem:[%s11265_s30 + $0x238] sm:$0xff]  }
 0x762   : > { %v4474_v41 = vmul.f32 %v4471_v29, %v4466_v51  ;;  %v4461_v7 = vadd.f32 %v8974_v59, %v4376_v2  ;;  %v11898_v11 = vadd.f32 %v4481_v6, %v11655_v47  ;;  %v7939_v47 = vld [vmem:[%s11265_s30 + $0x2b0] sm:$0xff]  }
 0x763   : > { %10084 = vmatpush3.bf16.msra.mxu0 %v7939_v47  ;;  %10056 = vmatpush3.bf16.msra.mxu1 %v7924_v24 }
 0x764   : > { %v4482_v20 = vadd.f32 %v4479_v27, %v4474_v41  ;;  %v4467_v10 = vmax.f32 %v4461_v7, 0.0  ;;  %10086 = vmatprep.subr.bf16.mxu0 %v7948_v40  ;;  %10058 = vmatprep.subr.bf16.mxu1 %v7933_v30 }
 0x766   : > { %v4475_v0 = vmul.f32 %v4471_v29, %v4467_v10  ;;  %v11905_v39 = vadd.f32 %v4482_v20, %v11657_v26  ;;  %v7949_v26 = vld [vmem:[%s11265_s30 + $0x300] sm:$0xff]  }
 0x767   : > { %10088 = vmatpush3.bf16.msra.mxu0 %v7940_v8  ;;  %10060 = vmatpush3.bf16.msra.mxu1 %v7925_v43 }
 0x768   : > { %v4483_v44 = vadd.f32 %v4479_v27, %v4475_v0  ;;  %10090 = vmatprep.subr.bf16.mxu0 %v7949_v26  ;;  %10062 = vmatprep.subr.bf16.mxu1 %v7934_v42 }
 0x76a   : > { %v11912_v32 = vadd.f32 %v4483_v44, %v11659_v25  ;;  %v7926_v25 = vld [vmem:[%s11265_s30 + $0x248] sm:$0xff]  }
 0x76b   : > { %10064 = vmatpush3.bf16.msra.mxu1 %v7926_v25 }
 0x76c   : > { %10066 = vmatprep.subr.bf16.mxu1 %v7935_v19 }
 0x76e   : > { %v8521_v37 = vpop.f32.mrb[60].mxu1 }
 0x76f   : > { %v8522_v29 = vpop.f32.mrb[61].mxu1  ;;  %10068 = vmatpush3.bf16.msra.mxu1 %v7927_v62 }
 0x770   : > { %v8523_v45 = vadd.f32 %v8522_v29, %v8521_v37  ;;  %10070 = vmatprep.subr.bf16.mxu1 %v7936_v48 }
 0x772   : > { %v8524_v50 = vpop.f32.mrb[62].mxu1  ;;  %v4957_v35 = vadd.f32 %v8523_v45, %v4889_v34 }
 0x773   : > { %v8525_v27 = vpop.f32.mrb[63].mxu1 }
 0x774   : > { %v8526_v5 = vadd.f32 %v8525_v27, %v8524_v50  ;;  %v8565_v60 = vpop.f32.mrb[64].mxu0 }
 0x775   : > { %v8566_v59 = vpop.f32.mrb[65].mxu0 }
 0x776   : > { %v8567_v57 = vadd.f32 %v8566_v59, %v8565_v60  ;;  %v8527_v55 = vpop.f32.mrb[64].mxu1  ;;  %v4962_v17 = vadd.f32 %v8526_v5, %v4889_v34 }
 0x777   : > { %v8528_v14 = vpop.f32.mrb[65].mxu1 }
 0x778   : > { %v5042_v18 = vadd.f32 %v8567_v57, %v4957_v35  ;;  %v8529_v33 = vadd.f32 %v8528_v14, %v8527_v55  ;;  %v8568_v63 = vpop.f32.mrb[66].mxu0 }
 0x779   : > { %v8569_v9 = vpop.f32.mrb[67].mxu0 }
 0x77a   : > { %v8570_v16 = vadd.f32 %v8569_v9, %v8568_v63  ;;  %v8530_v49 = vpop.f32.mrb[66].mxu1  ;;  %v4967_v2 = vadd.f32 %v8529_v33, %v4889_v34 }
 0x77b   : > { %v8531_v1 = vpop.f32.mrb[67].mxu1 }
 0x77c   : > { %v5047_v52 = vadd.f32 %v8570_v16, %v4962_v17  ;;  %v8532_v22 = vadd.f32 %v8531_v1, %v8530_v49  ;;  %v8571_v6 = vpop.f32.mrb[68].mxu0 }
 0x77d   : > { %v8572_v51 = vpop.f32.mrb[69].mxu0 }
 0x77e   : > { %v8573_v38 = vadd.f32 %v8572_v51, %v8571_v6  ;;  %v4972_v41 = vadd.f32 %v8532_v22, %v4889_v34  ;;  %v5407_v22 = vrot.slane %v11919_v36, %v11205_v46 }
 0x780   : > { %v5052_v3 = vadd.f32 %v8573_v38, %v4967_v2  ;;  %v8574_v61 = vpop.f32.mrb[70].mxu0 }
 0x781   : > { %v8575_v13 = vpop.f32.mrb[71].mxu0 }
 0x782   : > { %v8576_v7 = vadd.f32 %v8575_v13, %v8574_v61 }
 0x784   : > { %v5057_v28 = vadd.f32 %v8576_v7, %v4972_v41 }
 0x78e   : > { %v8609_v54 = vpop.f32.mrb[68].mxu1 }
 0x78f   : > { %v8610_v20 = vpop.f32.mrb[69].mxu1 }
 0x790   : > { %v8611_v10 = vadd.f32 %v8610_v20, %v8609_v54 }
 0x792   : > { %v5127_v21 = vadd.f32 %v8611_v10, %v5042_v18  ;;  %v8612_v58 = vpop.f32.mrb[70].mxu1 }
 0x793   : > { %v8613_v0 = vpop.f32.mrb[71].mxu1 }
 0x794   : > { %v8614_v15 = vadd.f32 %v8613_v0, %v8612_v58  ;;  %v8653_v47 = vpop.f32.mrb[72].mxu0  ;;  %v7928_v58 = vld [vmem:[%s11265_s30 + $0x258] sm:$0xff]   ;;  %v7941_v0 = vld [vmem:[%s11265_s30 + $0x2c0] sm:$0xff]  }
 0x795   : > { %v8654_v40 = vpop.f32.mrb[73].mxu0  ;;  %10072 = vmatpush3.bf16.msra.mxu1 %v7928_v58  ;;  %10092 = vmatpush3.bf16.msra.mxu0 %v7941_v0 }
 0x796   : > { %v5132_v44 = vadd.f32 %v8614_v15, %v5047_v52  ;;  %v8655_v24 = vadd.f32 %v8654_v40, %v8653_v47  ;;  %v8615_v30 = vpop.f32.mrb[72].mxu1  ;;  %10105 = vmatprep.subr.bf16.mxu1 %v10825_v4 }
 0x797   : > { %v8616_v8 = vpop.f32.mrb[73].mxu1 }
 0x798   : > { %v5212_v26 = vadd.f32 %v8655_v24, %v5127_v21  ;;  %v8617_v43 = vadd.f32 %v8616_v8, %v8615_v30  ;;  %v8656_v37 = vpop.f32.mrb[74].mxu0  ;;  %v7950_v8 = vld [vmem:[%s11265_s30 + $0x308] sm:$0xff]  }
 0x799   : > { %v8657_v42 = vpop.f32.mrb[75].mxu0  ;;  %10094 = vmatprep.subr.bf16.mxu0 %v7950_v8  ;;  %v7954_v8 = vld [vmem:[%s11265_s30 + $0x328] sm:$0xff]  }
 0x79a   : > { %v5137_v29 = vadd.f32 %v8617_v43, %v5052_v3  ;;  %v8658_v45 = vadd.f32 %v8657_v42, %v8656_v37  ;;  %v8618_v25 = vpop.f32.mrb[74].mxu1  ;;  %v5415_v3 = vrot.slane %v11919_v36, %v11208_v56  ;;  %v7951_v42 = vld [vmem:[%s11265_s30 + $0x310] sm:$0xff]  }
 0x79b   : > { %v8619_v34 = vpop.f32.mrb[75].mxu1 }
 0x79c   : > { %v5217_v50 = vadd.f32 %v8658_v45, %v5132_v44  ;;  %v8620_v19 = vadd.f32 %v8619_v34, %v8618_v25  ;;  %v8659_v27 = vpop.f32.mrb[76].mxu0  ;;  %v7943_v25 = vld [vmem:[%s11265_s30 + $0x2d0] sm:$0xff]  }
 0x79d   : > { %v8660_v5 = vpop.f32.mrb[77].mxu0 }
 0x79e   : > { %v5142_v60 = vadd.f32 %v8620_v19, %v5057_v28  ;;  %v8661_v59 = vadd.f32 %v8660_v5, %v8659_v27 }
 0x7a0   : > { %v5222_v62 = vadd.f32 %v8661_v59, %v5137_v29  ;;  %v8662_v35 = vpop.f32.mrb[78].mxu0 }
 0x7a1   : > { %v8663_v57 = vpop.f32.mrb[79].mxu0 }
 0x7a2   : > { %v8664_v55 = vadd.f32 %v8663_v57, %v8662_v35  ;;  %v7944_v57 = vld [vmem:[%s11265_s30 + $0x2d8] sm:$0xff]  }
 0x7a4   : > { %v5227_v48 = vadd.f32 %v8664_v55, %v5142_v60  ;;  %v7952_v60 = vld [vmem:[%s11265_s30 + $0x318] sm:$0xff]  }
 0x7ae   : > { %v8697_v14 = vpop.f32.mrb[76].mxu1 }
 0x7af   : > { %v8698_v18 = vpop.f32.mrb[77].mxu1 }
 0x7b0   : > { %v8699_v33 = vadd.f32 %v8698_v18, %v8697_v14 }
 0x7b2   : > { %v8700_v63 = vpop.f32.mrb[78].mxu1  ;;  %v5297_v9 = vadd.f32 %v8699_v33, %v5212_v26  ;;  %v7942_v26 = vld [vmem:[%s11265_s30 + $0x2c8] sm:$0xff]  }
 0x7b3   : > { %v8701_v17 = vpop.f32.mrb[79].mxu1  ;;  %10096 = vmatpush3.bf16.msra.mxu0 %v7942_v26 }
 0x7b4   : > { %v8702_v16 = vadd.f32 %v8701_v17, %v8700_v63  ;;  %v9009_v49 = vpop.f32.mrb[80].mxu0  ;;  %10098 = vmatprep.subr.bf16.mxu0 %v7951_v42 }
 0x7b5   : > { %v5381_v1 = vpop.f32.mrb[81].mxu0 }
 0x7b6   : > { %v5302_v52 = vadd.f32 %v8702_v16, %v5217_v50  ;;  %v5382_v6 = vadd.f32 %v5381_v1, %v5297_v9  ;;  %v8703_v51 = vpop.f32.mrb[80].mxu1 }
 0x7b7   : > { %v8704_v2 = vpop.f32.mrb[81].mxu1  ;;  %10100 = vmatpush3.bf16.msra.mxu0 %v7943_v25 }
 0x7b8   : > { %v5387_v38 = vadd.f32 %v9009_v49, %v5302_v52  ;;  %v5400_v61 = vmax.f32 %v5382_v6, 0.0  ;;  %v8705_v13 = vadd.f32 %v8704_v2, %v8703_v51  ;;  %v9012_v41 = vpop.f32.mrb[82].mxu0  ;;  %10102 = vmatprep.subr.bf16.mxu0 %v7952_v60 }
 0x7b9   : > { %v5391_v7 = vpop.f32.mrb[83].mxu0 }
 0x7ba   : > { %v5401_v28 = vmax.f32 %v5387_v38, 0.0  ;;  %v5408_v54 = vmul.f32 %v5407_v22, %v5400_v61  ;;  %v5307_v20 = vadd.f32 %v8705_v13, %v5222_v62  ;;  %v8706_v10 = vpop.f32.mrb[82].mxu1 }
 0x7bb   : > { %v8707_v21 = vpop.f32.mrb[83].mxu1  ;;  %10104 = vmatpush3.bf16.msra.mxu0 %v7944_v57 }
 0x7bc   : > { %v5409_v15 = vmul.f32 %v5407_v22, %v5401_v28  ;;  %v5416_v47 = vadd.f32 %v5415_v3, %v5408_v54  ;;  %v5392_v40 = vadd.f32 %v5391_v7, %v5307_v20  ;;  %v8708_v44 = vadd.f32 %v8707_v21, %v8706_v10 }
 0x7be   : > { %v5417_v36 = vadd.f32 %v5415_v3, %v5409_v15  ;;  %5420 = vst.msk [vmem:[#allocation2 + $0x5] sm:$0xff] %vm448_vm0, %v5416_v47  ;;  %v5402_v24 = vmax.f32 %v5392_v40, 0.0  ;;  %v5312_v30 = vadd.f32 %v8708_v44, %v5227_v48  ;;  %v7953_v15 = vld [vmem:[%s11265_s30 + $0x320] sm:$0xff]  }
 0x7c0   : > { %5421 = vst.msk [vmem:[#allocation2 + $0xd] sm:$0xff] %vm448_vm0, %v5417_v36  ;;  %v5410_v43 = vmul.f32 %v5407_v22, %v5402_v24  ;;  %v5397_v37 = vadd.f32 %v9012_v41, %v5312_v30 }
 0x7c2   : > { %v5418_v29 = vadd.f32 %v5415_v3, %v5410_v43  ;;  %v5403_v45 = vmax.f32 %v5397_v37, 0.0 }
 0x7c4   : > { %5422 = vst.msk [vmem:[#allocation2 + $0x25] sm:$0xff] %vm448_vm0, %v5418_v29  ;;  %v5411_v34 = vmul.f32 %v5407_v22, %v5403_v45 }
 0x7c5   : > { %v5428_v50 = vld [vmem:[#allocation2 + $0x1] sm:$0xff] }
 0x7c6   : > { %v5436_v19 = vld [vmem:[#allocation2 + $0x3] sm:$0xff]  ;;  %v5419_v27 = vadd.f32 %v5415_v3, %v5411_v34 }
 0x7c7   : > { %v10495_v5 = vpack.i.bf16 %v5428_v50, %v5436_v19  ;;  %v5429_v59 = vld [vmem:[#allocation2 + $0x9] sm:$0xff]  ;;  %v5458_v38 = vld [vmem:[#allocation2 + $0x11] sm:$0xff]  ;;  %v5424_v10 = vld [vmem:[#allocation2] sm:$0xff] }
 0x7c8   : > { %v5437_v62 = vld [vmem:[#allocation2 + $0xb] sm:$0xff]  ;;  %5423 = vst.msk [vmem:[#allocation2 + $0x2d] sm:$0xff] %vm448_vm0, %v5419_v27  ;;  %v5432_v20 = vld [vmem:[#allocation2 + $0x2] sm:$0xff] }
 0x7c9   : > { %10496 = vrot.lane.b32.xlu0 %v10495_v5, %s10824_s13  ;;  %v10500_v35 = vpack.i.bf16 %v5429_v59, %v5437_v62  ;;  %v5444_v18 = vld [vmem:[#allocation2 + $0x5] sm:$0xff]  ;;  %v5445_v49 = vld [vmem:[#allocation2 + $0xd] sm:$0xff] }
 0x7ca   : > { %v5452_v63 = vld [vmem:[#allocation2 + $0x7] sm:$0xff]  ;;  %v5453_v1 = vld [vmem:[#allocation2 + $0xf] sm:$0xff] }
 0x7cb   : > { %10501 = vrot.lane.b32.xlu1 %v10500_v35, %s10824_s13  ;;  %v5430_v55 = vld [vmem:[#allocation2 + $0x21] sm:$0xff]  ;;  %v10520_v6 = vpack.i.bf16 %v5445_v49, %v5453_v1  ;;  %v5433_v40 = vld [vmem:[#allocation2 + $0xa] sm:$0xff] }
 0x7cc   : > { %v5438_v48 = vld [vmem:[#allocation2 + $0x23] sm:$0xff]  ;;  %v7955_v27 = vld [vmem:[%s11265_s30 + $0x330] sm:$0xff]  }
 0x7cd   : > { %v10505_v14 = vpack.i.bf16 %v5430_v55, %v5438_v48  ;;  %v5446_v22 = vld [vmem:[#allocation2 + $0x25] sm:$0xff]  ;;  %v5449_v1 = vld [vmem:[#allocation2 + $0xe] sm:$0xff] }
 0x7ce   : > { %v5425_v30 = vld [vmem:[#allocation2 + $0x8] sm:$0xff]  ;;  %v5426_v19 = vld [vmem:[#allocation2 + $0x20] sm:$0xff] }
 0x7cf   : > { %10506 = vrot.lane.b32.xlu0 %v10505_v14, %s10824_s13  ;;  %v5439_v33 = vld [vmem:[#allocation2 + $0x2b] sm:$0xff]  ;;  %v5434_v37 = vld [vmem:[#allocation2 + $0x22] sm:$0xff] }
 0x7d0   : > { %v5431_v9 = vld [vmem:[#allocation2 + $0x29] sm:$0xff]  ;;  %v10510_v17 = vpack.i.bf16 %v5439_v33, %v5452_v63  ;;  %v5459_v13 = vld [vmem:[#allocation2 + $0x31] sm:$0xff] }
 0x7d1   : > { %v10515_v16 = vpack.i.bf16 %v5431_v9, %v5444_v18  ;;  %v5454_v52 = vld [vmem:[#allocation2 + $0x27] sm:$0xff]  ;;  %v5455_v2 = vld [vmem:[#allocation2 + $0x2f] sm:$0xff] }
 0x7d2   : > { %10511 = vrot.lane.b32.xlu1 %v10510_v17, %s10824_s13  ;;  %v10525_v51 = vpack.i.bf16 %v5446_v22, %v5454_v52  ;;  %v10530_v3 = vpack.i.bf16 %v5455_v2, %v5458_v38  ;;  %v5447_v61 = vld [vmem:[#allocation2 + $0x2d] sm:$0xff]  ;;  %v5440_v35 = vld [vmem:[#allocation2 + $0x4] sm:$0xff]  ;;  %v7956_v17 = vld [vmem:[%s11265_s30 + $0x338] sm:$0xff]  }
 0x7d3   : > { %10516 = vrot.lane.b32.xlu0 %v10515_v16, %s10824_s13  ;;  %v5448_v59 = vld [vmem:[#allocation2 + $0x6] sm:$0xff] }
 0x7d4   : > { %v11968_v62 = vld [vmem:[#allocation2 + $0x2a] sm:$0xff] }
 0x7d5   : > { %v5427_v9 = vld [vmem:[#allocation2 + $0x28] sm:$0xff] }
 0x7d6   : > { %10521 = vrot.lane.b32.xlu1 %v10520_v6, %s10824_s13  ;;  %v5441_v52 = vld [vmem:[#allocation2 + $0xc] sm:$0xff] }
 0x7d7   : > { %10526 = vrot.lane.b32.xlu0 %v10525_v51, %s10824_s13  ;;  %v5450_v38 = vld [vmem:[#allocation2 + $0x26] sm:$0xff] }
 0x7da   : > { %10531 = vrot.lane.b32.xlu1 %v10530_v3, %s10824_s13  ;;  %v7957_v3 = vld [vmem:[%s11265_s30 + $0x340] sm:$0xff]  }
 0x7db   : > { %5506 = vrot.lane.b32.xlu0 %v5447_v61, %s10824_s13 }
 0x7de   : > { %5532 = vrot.lane.b32.xlu1 %v5459_v13, %s10824_s13  ;;  %s6249_s13 = sshll.u32 %s12053_s24, 1 }
 0x7df   : > { %s435_s16 = scalar_lea.vmem %s12047_s7, %s6249_s13 }
 0x83b   : > { %v10497_v41 = vpop.permute.xlu0 %10496 }
 0x83c   : > { %v10499_v7 = vunpack.i.h.bf16 %v10497_v41  ;;  %v10498_v28 = vunpack.i.l.bf16 %v10497_v41  ;;  %v5442_v41 = vld [vmem:[#allocation2 + $0x24] sm:$0xff] }
 0x83d   : > { %v10502_v54 = vpop.permute.xlu1 %10501 }
 0x83e   : > { %v10503_v21 = vunpack.i.l.bf16 %v10502_v54  ;;  %v5540_v58 = vsel %vm448_vm0, %v5432_v20, %v10498_v28  ;;  %v5536_v0 = vsel %vm448_vm0, %v5424_v10, %v10499_v7  ;;  %v10504_v47 = vunpack.i.h.bf16 %v10502_v54  ;;  %v5451_v28 = vld [vmem:[#allocation2 + $0x2e] sm:$0xff] }
 0x83f   : > { %5812 = vmatprep.mubr.f32.mxu1 %v5540_v58  ;;  %v7958_v54 = vld [vmem:[%s11265_s30 + $0x348] sm:$0xff]  }
 0x840   : > { %5813 = vmatmul.mubr.f32.vlgmr.msra.gmra.mrb[84].mxu1 %v5536_v0  ;;  %v5541_v44 = vsel %vm448_vm0, %v5433_v40, %v10503_v21  ;;  %v11961_v43 = vsel %vm448_vm0, %v5425_v30, %v10504_v47  ;;  %v5443_v21 = vld [vmem:[#allocation2 + $0x2c] sm:$0xff]  ;;  %v7961_v47 = vld [vmem:[%s11265_s30 + $0x360] sm:$0xff]  }
 0x841   : > { %10107 = vmatpush1.bf16.msra.mxu1 %v7953_v15  ;;  %v10507_v36 = vpop.permute.xlu0 %10506  ;;  %5817 = vmatprep.mubr.f32.mxu1 %v5541_v44  ;;  %v7959_v0 = vld [vmem:[%s11265_s30 + $0x350] sm:$0xff]   ;;  %v7960_v15 = vld [vmem:[%s11265_s30 + $0x358] sm:$0xff]  }
 0x842   : > { %v10508_v24 = vunpack.i.l.bf16 %v10507_v36  ;;  %10108 = vmatprep.subr.bf16.mxu1 %v10825_v4  ;;  %v10509_v26 = vunpack.i.h.bf16 %v10507_v36  ;;  %v7963_v44 = vld [vmem:[%s11265_s30 + $0x370] sm:$0xff]   ;;  %v7964_v36 = vld [vmem:[%s11265_s30 + $0x378] sm:$0xff]  }
 0x843   : > { %v5461_v30 = vld [vmem:[#allocation2 + $0x12] sm:$0xff] }
 0x844   : > { %5818 = vmatmul.mubr.f32.gmra.mrb[86].mxu1 %v11961_v43  ;;  %v5542_v42 = vsel %vm448_vm0, %v5434_v37, %v10508_v24  ;;  %v10512_v29 = vpop.permute.xlu1 %10511  ;;  %v5538_v60 = vsel %vm448_vm0, %v5426_v19, %v10509_v26 }
 0x845   : > { %10110 = vmatpush1.bf16.msra.mxu1 %v7954_v8  ;;  %v10517_v45 = vpop.permute.xlu0 %10516  ;;  %5822 = vmatprep.mubr.f32.mxu1 %v5542_v42  ;;  %v10514_v25 = vunpack.i.h.bf16 %v10512_v29  ;;  %v10513_v34 = vunpack.i.l.bf16 %v10512_v29  ;;  %v5456_v8 = vld [vmem:[#allocation2 + $0x10] sm:$0xff] }
 0x846   : > { %v10518_v50 = vunpack.i.l.bf16 %v10517_v45  ;;  %10111 = vmatprep.subr.bf16.mxu1 %v10825_v4  ;;  %v10519_v5 = vunpack.i.h.bf16 %v10517_v45  ;;  %v5463_v42 = vld [vmem:[#allocation2 + $0x32] sm:$0xff] }
 0x847   : > { %v5548_v57 = vsel %vm448_vm0, %v5448_v59, %v10513_v34  ;;  %v5543_v55 = vsel %vm448_vm0, %v11968_v62, %v10514_v25 }
 0x848   : > { %5823 = vmatmul.mubr.f32.gmra.mrb[88].mxu1 %v5538_v60  ;;  %v5544_v48 = vsel %vm448_vm0, %v5440_v35, %v10518_v50  ;;  %v10522_v14 = vpop.permute.xlu1 %10521  ;;  %5897 = vmatprep.mubr.f32.mxu0 %v5548_v57  ;;  %v5539_v49 = vsel %vm448_vm0, %v5427_v9, %v10519_v5  ;;  %v6276_v50 = vld [vmem:[%s11294_s10 + $0x1c] sm:$0x7] }
 0x849   : > { %10113 = vmatpush1.bf16.msra.mxu1 %v7955_v27  ;;  %v10527_v18 = vpop.permute.xlu0 %10526  ;;  %v10524_v33 = vunpack.i.h.bf16 %v10522_v14  ;;  %v10523_v63 = vunpack.i.l.bf16 %v10522_v14  ;;  %5827 = vmatprep.mubr.f32.mxu1 %v5543_v55  ;;  %v5735_v5 = vrot.slane %v6276_v50, %v11197_v53 }
 0x84a   : > { %5898 = vmatmul.mubr.f32.vlgmr.msra.gmra.mrb[84].mxu0 %v5544_v48  ;;  %v10528_v16 = vunpack.i.l.bf16 %v10527_v18  ;;  %10114 = vmatprep.subr.bf16.mxu1 %v10825_v4  ;;  %v10529_v2 = vunpack.i.h.bf16 %v10527_v18 }
 0x84b   : > { %v5549_v22 = vsel %vm448_vm0, %v5449_v1, %v10523_v63  ;;  %v5545_v6 = vsel %vm448_vm0, %v5441_v52, %v10524_v33 }
 0x84c   : > { %5828 = vmatmul.mubr.f32.gmra.mrb[90].mxu1 %v5539_v49  ;;  %v10532_v51 = vpop.permute.xlu1 %10531  ;;  %5902 = vmatprep.mubr.f32.mxu0 %v5549_v22  ;;  %v5550_v13 = vsel %vm448_vm0, %v5450_v38, %v10528_v16  ;;  %v5546_v7 = vsel %vm448_vm0, %v5442_v41, %v10529_v2 }
 0x84d   : > { %10116 = vmatpush1.bf16.msra.mxu1 %v7956_v17  ;;  %6277 = vmatprep.mubr.msk.f32.mxu1 %vm448_vm0, %v5433_v40  ;;  %v10534_v61 = vunpack.i.h.bf16 %v10532_v51  ;;  %v5507_v20 = vpop.permute.xlu0 %5506  ;;  %v7962_v40 = vld [vmem:[%s11265_s30 + $0x368] sm:$0xff]   ;;  %v10533_v24 = vunpack.i.l.bf16 %v10532_v51 }
 0x84e   : > { %10117 = vmatprep.subr.bf16.mxu1 %v10825_v4  ;;  %5903 = vmatmul.mubr.f32.gmra.mrb[86].mxu0 %v5545_v6  ;;  %v5547_v58 = vsel %vm448_vm0, %v5443_v21, %v5507_v20 }
 0x84f   : > { %5907 = vmatprep.mubr.f32.mxu0 %v5550_v13  ;;  %v5551_v10 = vsel %vm448_vm0, %v5451_v28, %v10534_v61  ;;  %v5552_v26 = vsel %vm448_vm0, %v5456_v8, %v10533_v24  ;;  %v6010_v28 = vrot.slane %v6276_v50, %v11205_v46 }
 0x850   : > { %v5533_v37 = vpop.permute.xlu1 %5532 }
 0x851   : > { %10119 = vmatpush1.bf16.msra.mxu1 %v7957_v3 }
 0x852   : > { %10120 = vmatprep.subr.bf16.mxu1 %v10825_v4  ;;  %5908 = vmatmul.mubr.f32.gmra.mrb[88].mxu0 %v5546_v7 }
 0x853   : > { %5912 = vmatprep.mubr.f32.mxu0 %v5551_v10  ;;  %v6018_v10 = vrot.slane %v6276_v50, %v11208_v56 }
 0x855   : > { %10122 = vmatpush1.bf16.msra.mxu1 %v7958_v54 }
 0x856   : > { %10123 = vmatprep.subr.bf16.mxu1 %v10825_v4  ;;  %5913 = vmatmul.mubr.f32.gmra.mrb[90].mxu0 %v5547_v58 }
 0x859   : > { %10125 = vmatpush1.bf16.msra.mxu1 %v7959_v0 }
 0x85a   : > { %10126 = vmatprep.subr.bf16.mxu1 %v10825_v4 }
 0x85d   : > { %10128 = vmatpush1.bf16.msra.mxu1 %v7960_v15 }
 0x85e   : > { %10129 = vmatprep.subr.bf16.mxu1 %v10825_v4 }
 0x861   : > { %10131 = vmatpush1.bf16.msra.mxu1 %v7961_v47 }
 0x862   : > { %10132 = vmatprep.subr.bf16.mxu1 %v10825_v4 }
 0x865   : > { %10134 = vmatpush1.bf16.msra.mxu1 %v7962_v40 }
 0x866   : > { %10135 = vmatprep.subr.bf16.mxu1 %v10825_v4 }
 0x869   : > { %10137 = vmatpush1.bf16.msra.mxu1 %v7963_v44 }
 0x86a   : > { %10138 = vmatprep.subr.bf16.mxu1 %v10825_v4  ;;  %v5457_v4 = vld [vmem:[#allocation2 + $0x30] sm:$0xff] }
 0x86b   : > { %v5553_v29 = vsel %vm448_vm0, %v5457_v4, %v5533_v37  ;;  %v6028_v4 = vld [vmem:[%s428_s12 + $0x8] sm:$0xff] }
 0x86d   : > { %10140 = vmatpush1.bf16.msra.mxu1 %v7964_v36  ;;  %v6027_v36 = vld [vmem:[%s428_s12] sm:$0xff] }
 0x870   : > { %5983 = vmatmul.mubr.f32.vlgmr.msra.gmra.mrb[92].mxu1 %v11961_v43 }
 0x871   : > { %6278 = vmatprep.mubr.msk.f32.mxu1 %vm448_vm0, %v5461_v30 }
 0x874   : > { %5988 = vmatmul.mubr.f32.gmra.mrb[94].mxu1 %v5552_v26 }
 0x875   : > { %6279 = vmatprep.mubr.msk.f32.mxu1 %vm448_vm0, %v11968_v62 }
 0x878   : > { %5993 = vmatmul.mubr.f32.gmra.mrb[96].mxu1 %v5539_v49 }
 0x879   : > { %6280 = vmatprep.mubr.msk.f32.mxu1 %vm448_vm0, %v5463_v42 }
 0x87c   : > { %5998 = vmatmul.mubr.f32.gmra.mrb[98].mxu1 %v5553_v29 }
 0x913   : > { %v8761_v43 = vpop.f32.mrb[84].mxu1 }
 0x914   : > { %v8762_v45 = vpop.f32.mrb[85].mxu1 }
 0x915   : > { %v8763_v25 = vadd.f32 %v8762_v45, %v8761_v43 }
 0x917   : > { %v8764_v34 = vpop.f32.mrb[86].mxu1  ;;  %v5815_v55 = vadd.f32 %v8763_v25, %v5735_v5 }
 0x918   : > { %v8765_v19 = vpop.f32.mrb[87].mxu1 }
 0x919   : > { %v8766_v27 = vadd.f32 %v8765_v19, %v8764_v34 }
 0x91b   : > { %v8767_v60 = vpop.f32.mrb[88].mxu1  ;;  %v5820_v16 = vadd.f32 %v8766_v27, %v5735_v5 }
 0x91c   : > { %v8768_v59 = vpop.f32.mrb[89].mxu1 }
 0x91d   : > { %v8769_v62 = vadd.f32 %v8768_v59, %v8767_v60  ;;  %v8805_v35 = vpop.f32.mrb[84].mxu0 }
 0x91e   : > { %v8806_v57 = vpop.f32.mrb[85].mxu0 }
 0x91f   : > { %v8770_v48 = vpop.f32.mrb[90].mxu1  ;;  %v8807_v14 = vadd.f32 %v8806_v57, %v8805_v35  ;;  %v5825_v6 = vadd.f32 %v8769_v62, %v5735_v5 }
 0x920   : > { %v8771_v18 = vpop.f32.mrb[91].mxu1 }
 0x921   : > { %v8772_v33 = vadd.f32 %v8771_v18, %v8770_v48  ;;  %v5900_v63 = vadd.f32 %v8807_v14, %v5815_v55  ;;  %v8808_v9 = vpop.f32.mrb[86].mxu0  ;;  %v6051_v48 = vand.u32 127, %v1115_v31 }
 0x922   : > { %v8809_v17 = vpop.f32.mrb[87].mxu0 }
 0x923   : > { %v8810_v49 = vadd.f32 %v8809_v17, %v8808_v9  ;;  %v5830_v3 = vadd.f32 %v8772_v33, %v5735_v5  ;;  %v6056_v14 = vadd.s32 4294967288, %v6051_v48  ;;  %v6054_v9 = vsub.s32 %v6051_v48, %v11159_v12 }
 0x925   : > { %v8811_v1 = vpop.f32.mrb[88].mxu0  ;;  %v5905_v52 = vadd.f32 %v8810_v49, %v5820_v16  ;;  %v6059_v33 = vsub.s32 %v6056_v14, %v11159_v12 }
 0x926   : > { %v8812_v22 = vpop.f32.mrb[89].mxu0 }
 0x927   : > { %v8813_v53 = vadd.f32 %v8812_v22, %v8811_v1 }
 0x929   : > { %v8814_v51 = vpop.f32.mrb[90].mxu0  ;;  %v5910_v2 = vadd.f32 %v8813_v53, %v5825_v6 }
 0x92a   : > { %v8815_v38 = vpop.f32.mrb[91].mxu0 }
 0x92b   : > { %v8816_v61 = vadd.f32 %v8815_v38, %v8814_v51 }
 0x92d   : > { %v5915_v13 = vadd.f32 %v8816_v61, %v5830_v3 }
 0x943   : > { %v5984_v41 = vpop.f32.mrb[92].mxu1 }
 0x944   : > { %v5985_v7 = vadd.f32 %v5984_v41, %v5900_v63  ;;  %v5986_v54 = vpop.f32.mrb[93].mxu1 }
 0x946   : > { %v6003_v20 = vmax.f32 %v5985_v7, 0.0 }
 0x947   : > { %v5989_v21 = vpop.f32.mrb[94].mxu1 }
 0x948   : > { %v6011_v58 = vmul.f32 %v6010_v28, %v6003_v20  ;;  %v5990_v0 = vadd.f32 %v5989_v21, %v5905_v52  ;;  %v5991_v15 = vpop.f32.mrb[95].mxu1 }
 0x94a   : > { %v6019_v47 = vadd.f32 %v6018_v10, %v6011_v58  ;;  %v6004_v40 = vmax.f32 %v5990_v0, 0.0 }
 0x94b   : > { %v5994_v44 = vpop.f32.mrb[96].mxu1 }
 0x94c   : > { %v6012_v24 = vmul.f32 %v6010_v28, %v6004_v40  ;;  %v5995_v30 = vadd.f32 %v5994_v44, %v5910_v2  ;;  %v5996_v46 = vpop.f32.mrb[97].mxu1  ;;  %v6023_v8 = vadd.f32 %v6019_v47, %v11890_v23 }
 0x94e   : > { %v6020_v56 = vadd.f32 %v6018_v10, %v6012_v24  ;;  %v6005_v26 = vmax.f32 %v5995_v30, 0.0  ;;  %v6029_v37 = vmul.f32 %v6027_v36, %v6023_v8 }
 0x94f   : > { %v5999_v42 = vpop.f32.mrb[98].mxu1 }
 0x950   : > { %v6013_v29 = vmul.f32 %v6010_v28, %v6005_v26  ;;  %v6000_v43 = vadd.f32 %v5999_v42, %v5915_v13  ;;  %v6001_v45 = vpop.f32.mrb[99].mxu1  ;;  %v6034_v25 = vsel %vm6033_vm1, %v6029_v37, 0.0  ;;  %v6024_v34 = vadd.f32 %v6020_v56, %v11898_v11 }
 0x951   : > { %6035 = vadd.xlane.f32.xlu0 %v6034_v25 }
 0x952   : > { %v6021_v50 = vadd.f32 %v6018_v10, %v6013_v29  ;;  %v6006_v19 = vmax.f32 %v6000_v43, 0.0  ;;  %v6030_v27 = vmul.f32 %v6028_v4, %v6024_v34 }
 0x954   : > { %v6014_v5 = vmul.f32 %v6010_v28, %v6006_v19  ;;  %v6037_v23 = vsel %vm6033_vm1, %v6030_v27, 0.0  ;;  %v6025_v60 = vadd.f32 %v6021_v50, %v11905_v39 }
 0x955   : > { %6038 = vadd.xlane.f32.xlu1 %v6037_v23 }
 0x956   : > { %v6022_v59 = vadd.f32 %v6018_v10, %v6014_v5  ;;  %v6031_v62 = vmul.f32 %v6027_v36, %v6025_v60 }
 0x958   : > { %v6040_v35 = vsel %vm6033_vm1, %v6031_v62, 0.0  ;;  %v6026_v57 = vadd.f32 %v6022_v59, %v11912_v32 }
 0x959   : > { %6041 = vadd.xlane.f32.xlu0 %v6040_v35 }
 0x95a   : > { %v6032_v55 = vmul.f32 %v6028_v4, %v6026_v57 }
 0x95c   : > { %v6043_v11 = vsel %vm6033_vm1, %v6032_v55, 0.0 }
 0x95d   : > { %6044 = vadd.xlane.f32.xlu0 %v6043_v11 }
 0x9de   : > { %v6036_v18 = vpop.xlane.xlu0 %6035 }
 0x9df   : > { %v6055_v32 = vrot.slane %v6036_v18, %v6054_v9 }
 0x9e2   : > { %v6039_v63 = vpop.xlane.xlu1 %6038 }
 0x9e3   : > { %v6060_v17 = vrot.slane %v6039_v63, %v6059_v33 }
 0x9e5   : > { %v6062_v52 = vsel %vm6061_vm2, %v6060_v17, %v6055_v32 }
 0x9e6   : > { %v6042_v39 = vpop.xlane.xlu0 %6041 }
 0x9e7   : > { %v6066_v49 = vrot.slane %v6042_v39, %v6054_v9 }
 0x9ea   : > { %v6045_v16 = vpop.xlane.xlu0 %6044 }
 0x9eb   : > { %v6070_v1 = vrot.slane %v6045_v16, %v6059_v33 }
 0x9ed   : > { %v6071_v22 = vsel %vm6061_vm2, %v6070_v1, %v6066_v49 }
 0x9ee   : > { %v6073_v31 = vsel %vm6072_vm3, %v6071_v22, %v6062_v52 }
 0x9ef   : > { %v6076_v6 = vsel %vm6075_vm4, %v6073_v31, 0.0 }
 0x9f0   : > { %6077 = vadd.xlane.f32.xlu1 %v6076_v6 }
 0xa7d   : > { %v6078_v12 = vpop.xlane.xlu1 %6077 }
 0xa7e   : > { %6080 = vst.msk [vmem:[%s435_s16] sm:$0x3] %vm6079_vm5, %v6078_v12 }
 0xa7f PF: > { %s17_s26 = sadd.s32 1, %s10821_s26   ;;  %s12048_s24 = smov %s10817_s25 }
 0xa80   : > { %p14_p5 = scmp.ge.s32.totalorder %s17_s26, 4   ;;  %s12049_s25 = smov %s12051_s27 }
 0xa82   :  { %16 = sbr.rel (!%p14_p5) target bundleno = 2 (0x2), region = 103 }

</bundles_post_ra>
